<compile_context>
chip_gen: v5e
topology: v5e:2x2
jax: 0.10.0
libtpu: 0.0.40
codegen_flags: <defaults>
</compile_context>

<pallas_src>
import functools

import jax
import jax.numpy as jnp
import numpy as np
from jax.experimental import pallas as pl
from jax.experimental.pallas import tpu as pltpu


# ----------------------------- in-kernel activations -------------------------
def _sigmoid_k(v):
    # exact exp (EUP) + approx reciprocal (EUP) instead of a VALU divide.
    return pl.reciprocal(1.0 + jnp.exp(-v), approx=True)


def _silu_k(v):
    return v * _sigmoid_k(v)


# ----------------------------- reference activations -------------------------
def _sigmoid(v):
    return 1.0 / (1.0 + jnp.exp(-v))


def _silu(v):
    return v * _sigmoid(v)


# ----------------------------- fused kernel ----------------------------------
def _egnn_fused_kernel(n_layers, N, D, H,
                       x_ref, h0_ref, mats_ref, rows_ref, mask_ref, scal_ref,
                       x_out_ref):
    """All EquivariantBlocks fused; one batch instance per grid step.

    x_ref    : (N, D)        coordinates of this instance
    h0_ref   : (N, H)        initial node features (ones @ emb_w + emb_b), shared
    mats_ref : (n_mats*H, H) packed (H,H) weight matrices, shared
    rows_ref : (n_rows, H)   packed (1,H) rows / biases, shared
    mask_ref : (N*N, 1)      off-diagonal edge mask (1 where j != i), i-major
    scal_ref : (n_layers,)   bc3 scalars in SMEM
    """
    f32 = jnp.float32

    x = x_ref[...].astype(f32)      # (N, D)
    h = h0_ref[...].astype(f32)     # (N, H)
    mask = mask_ref[...]            # (E, 1)

    def rows_i(a):
        # edge e = i*N + j takes a[i]: per-row sublane broadcast (one vreg row-group each).
        return jnp.concatenate(
            [jnp.broadcast_to(a[i:i + 1, :], (N, a.shape[1])) for i in range(N)],
            axis=0)

    def rows_j(a):
        # edge e = i*N + j takes a[j]: whole block tiled N times along sublanes.
        return jnp.concatenate([a] * N, axis=0)

    def mat(k):     # k-th packed (H, H) matrix (static, sublane-aligned offset)
        return mats_ref[pl.ds(k * H, H), :]

    def row(r):     # r-th packed (1, H) row
        return rows_ref[pl.ds(r, 1), :]

    mp, rp = 0, 0
    for layer in range(n_layers):               # Python-unrolled (n_layers static)
        last = layer == n_layers - 1

        wc1_i, wc1_j, wc2 = mat(mp), mat(mp + 1), mat(mp + 2)
        wc1c, bc1, bc2, wc3 = row(rp), row(rp + 1), row(rp + 2), row(rp + 3)
        bc3 = scal_ref[layer]
        mp, rp = mp + 3, rp + 4

        # ---- pairwise geometry over E = N*N edges (i-major, diagonal included)
        diff = rows_j(x) - rows_i(x)                               # (E, D)
        d2 = jnp.sum(diff * diff, axis=1, keepdims=True)           # (E, 1)

        # ---- coord_mlp: first layer hoisted to node level (N x H, not E x 2H)
        hc_i = jnp.dot(h, wc1_i, preferred_element_type=f32)       # (N, H)
        hc_j = jnp.dot(h, wc1_j, preferred_element_type=f32)       # (N, H)
        z = _silu_k(rows_i(hc_i) + rows_j(hc_j) + d2 * wc1c + bc1)  # (E, H)
        z = _silu_k(jnp.dot(z, wc2, preferred_element_type=f32) + bc2)
        phi = jnp.sum(z * wc3, axis=1, keepdims=True) + bc3        # (E, 1)

        inv = pl.reciprocal(jnp.sqrt(d2) + 1.0, approx=True)       # norm_constant = 1
        xij = diff * (phi * inv)                                   # (E, D); zero on diagonal
        x = x + jnp.sum(xij.reshape(N, N, D), axis=1)              # scatter-add over j

        if not last:
            we1_i, we1_j, we2 = mat(mp), mat(mp + 1), mat(mp + 2)
            wn1_h, wn1_a, wn2 = mat(mp + 3), mat(mp + 4), mat(mp + 5)
            we1c, be1, be2, wa = row(rp), row(rp + 1), row(rp + 2), row(rp + 3)
            bn1, bn2 = row(rp + 4), row(rp + 5)
            mp, rp = mp + 6, rp + 6

            # ---- edge_mlp (first layer hoisted) + attention + node_mlp -------
            he_i = jnp.dot(h, we1_i, preferred_element_type=f32)   # (N, H)
            he_j = jnp.dot(h, we1_j, preferred_element_type=f32)   # (N, H)
            m = _silu_k(rows_i(he_i) + rows_j(he_j) + d2 * we1c + be1)
            m = _silu_k(jnp.dot(m, we2, preferred_element_type=f32) + be2)
            att = _sigmoid_k(jnp.sum(m * wa, axis=1, keepdims=True))   # (E, 1)
            msg = m * (att * mask)                                     # self messages zeroed
            agg = jnp.sum(msg.reshape(N, N, H), axis=1)                # (N, H)
            hn = _silu_k(jnp.dot(h, wn1_h, preferred_element_type=f32)
                         + jnp.dot(agg, wn1_a, preferred_element_type=f32) + bn1)
            h = jnp.dot(hn, wn2, preferred_element_type=f32) + bn2

    # NaN guard folded into the kernel (module resets output to zero on any NaN).
    nan_mask = jnp.where(x != x, 1.0, 0.0)
    bad = jnp.max(jnp.max(nan_mask, axis=1, keepdims=True), axis=0, keepdims=True)  # (1, 1)
    x = jnp.where(bad > 0.0, jnp.zeros_like(x), x)
    x_out_ref[...] = x.astype(x_out_ref.dtype)


# ----------------------------- host-side packing ------------------------------
def pack_egnn_params(params, n_particles, hidden_nf, n_layers):
    """Repack ~44 tiny weight refs into a few lane/DMA-friendly slabs (call once, outside jit)."""
    N, H = n_particles, hidden_nf
    mats, rows, scals = [], [], []
    for i in range(n_layers):
        last = i == n_layers - 1
        b = params["blocks"][i]
        mats += [b["wc1"][:H], b["wc1"][H:], b["wc2"]]
        rows += [b["wc1c"], b["bc1"], b["bc2"], b["wc3"]]
        scals.append(jnp.reshape(b["bc3"], ()))
        if not last:
            mats += [b["we1"][:H], b["we1"][H:], b["we2"],
                     b["wn1"][:H], b["wn1"][H:], b["wn2"]]
            rows += [b["we1c"], b["be1"], b["be2"], b["wa"], b["bn1"], b["bn2"]]
    # embedding(ones(N)) precomputed once (constant w.r.t. the input coordinates)
    h0 = (jnp.ones((N,), jnp.float32) @ params["emb_w"] + params["emb_b"]).reshape(N, H)
    mask_e = (1.0 - np.eye(N, dtype=np.float32)).reshape(N * N, 1)   # i-major edge order
    return {
        "h0": h0.astype(jnp.float32),
        "mats": jnp.concatenate(mats, axis=0).astype(jnp.float32),   # (n_mats*H, H)
        "rows": jnp.concatenate(rows, axis=0).astype(jnp.float32),   # (n_rows, H)
        "mask": jnp.asarray(mask_e),                                  # (N*N, 1)
        "scal": jnp.stack(scals).astype(jnp.float32),                 # (n_layers,)
    }


# ----------------------------- wrappers ---------------------------------------
def egnn_forward_batched(x_batch, packed, n_particles, n_dim, hidden_nf, n_layers):
    """x_batch: (B, N*D) -> (B, N*D).  Each batch element is one independent EGNN forward."""
    N, D, H = n_particles, n_dim, hidden_nf
    if x_batch.shape[-1] != N * D:
        raise ValueError("Wrong formatting of data")
    B = x_batch.shape[0]
    x3 = x_batch.reshape(B, N, D).astype(jnp.float32)
    n_mats = packed["mats"].shape[0] // H
    n_rows = packed["rows"].shape[0]

    kernel = functools.partial(_egnn_fused_kernel, n_layers, N, D, H)
    out = pl.pallas_call(
        kernel,
        out_shape=jax.ShapeDtypeStruct((B, N, D), jnp.float32),
        grid=(B,),
        in_specs=[
            pl.BlockSpec((None, N, D), lambda b: (b, 0, 0)),           # per-instance coords
            pl.BlockSpec((N, H), lambda b: (0, 0)),                    # h0 (shared)
            pl.BlockSpec((n_mats * H, H), lambda b: (0, 0)),           # packed (H,H) weights
            pl.BlockSpec((n_rows, H), lambda b: (0, 0)),               # packed rows / biases
            pl.BlockSpec((N * N, 1), lambda b: (0, 0)),                # off-diagonal edge mask
            pl.BlockSpec(memory_space=pltpu.MemorySpace.SMEM),         # bc3 scalars
        ],
        out_specs=pl.BlockSpec((None, N, D), lambda b: (b, 0, 0)),
        compiler_params=pltpu.CompilerParams(
            dimension_semantics=("parallel",)),                         # megacore batch split
    )(x3, packed["h0"], packed["mats"], packed["rows"], packed["mask"], packed["scal"])
    return out.reshape(B, N * D)


def egnn_forward(x_inp, packed, n_particles, n_dim, hidden_nf, n_layers):
    """Module-equivalent single-instance forward: (N*D,) -> (N*D,)."""
    if x_inp.shape[0] != n_particles * n_dim:
        raise ValueError("Wrong formatting of data")
    out = egnn_forward_batched(x_inp[None, :], packed,
                               n_particles, n_dim, hidden_nf, n_layers)
    return out[0]


# ----------------------------- parameter init --------------------------------
def _init_block_params(key, hidden_nf, last, std=0.1, att_gain=1.0):
    H = hidden_nf
    keys = iter(jax.random.split(key, 32))

    def nrm(shape):
        return std * jax.random.normal(next(keys), shape, jnp.float32)

    # Linear weights in (in, out) layout; the (2H+1)-wide first layers are stored
    # as a fused (2H, H) block for [h_i | h_j] plus a (1, H) row for the d2 column.
    p = {"wc1": nrm((2 * H, H)), "wc1c": nrm((1, H)), "bc1": nrm((1, H)),
         "wc2": nrm((H, H)), "bc2": nrm((1, H)),
         "wc3": nrm((1, H)), "bc3": nrm((1, 1))}
    if not last:
        p.update({"we1": nrm((2 * H, H)), "we1c": nrm((1, H)), "be1": nrm((1, H)),
                  "we2": nrm((H, H)), "be2": nrm((1, H)),
                  "wn1": nrm((2 * H, H)), "bn1": nrm((1, H)),
                  "wn2": nrm((H, H)), "bn2": nrm((1, H))})
        # edge_att_mlp: Linear(H, 1, bias=False), xavier_uniform(gain); stored as a row.
        bound = att_gain * (6.0 / (H + 1)) ** 0.5
        p["wa"] = jax.random.uniform(next(keys), (1, H), jnp.float32, -bound, bound)
    return p


def init_egnn_params(key, n_particles, hidden_nf, n_layers, std=0.1, att_gain=1.0):
    N, H = n_particles, hidden_nf
    k_w, k_b, *k_blocks = jax.random.split(key, 2 + n_layers)
    return {
        "emb_w": std * jax.random.normal(k_w, (N, N * H), jnp.float32),
        "emb_b": std * jax.random.normal(k_b, (N * H,), jnp.float32),
        "blocks": [_init_block_params(k_blocks[i], H, last=(i == n_layers - 1),
                                      std=std, att_gain=att_gain)
                   for i in range(n_layers)],
    }


# ----------------------------- pure-JAX reference ----------------------------
def _reference_forward(x_inp, params, n_particles, n_dim, hidden_nf, n_layers):
    """Gather-based reference over the true N*(N-1) edge list (like the PyTorch code)."""
    N, D, H = n_particles, n_dim, hidden_nf
    x = x_inp.reshape(N, D).astype(jnp.float32)
    h = (jnp.ones((N,), jnp.float32) @ params["emb_w"] + params["emb_b"]).reshape(N, H)
    idx = np.stack([[(i, j) for j in range(N) if j != i] for i in range(N)])  # (N, N-1, 2)
    ii = jnp.asarray(idx[:, :, 0].reshape(-1))
    jj = jnp.asarray(idx[:, :, 1].reshape(-1))
    for layer in range(n_layers):
        last = layer == n_layers - 1
        p = params["blocks"][layer]
        cd = (x[jj] - x[ii]).reshape(N, N - 1, D)
        d2 = jnp.sum(cd ** 2, axis=2, keepdims=True)
        d2f = d2.reshape(-1, 1)
        hij = jnp.concatenate([h[ii], h[jj]], axis=1)
        z = _silu(hij @ p["wc1"] + d2f * p["wc1c"] + p["bc1"])
        z = _silu(z @ p["wc2"] + p["bc2"])
        phi = (jnp.sum(z * p["wc3"], axis=1, keepdims=True) + p["bc3"]).reshape(N, N - 1, 1)
        x = x + jnp.sum(cd / (jnp.sqrt(d2) + 1.0) * phi, axis=1)
        if not last:
            m = _silu(hij @ p["we1"] + d2f * p["we1c"] + p["be1"])
            m = _silu(m @ p["we2"] + p["be2"])
            m = m * _sigmoid(jnp.sum(m * p["wa"], axis=1, keepdims=True))
            agg = jnp.sum(m.reshape(N, N - 1, H), axis=1)
            h = _silu(jnp.concatenate([h, agg], axis=1) @ p["wn1"] + p["bn1"]) @ p["wn2"] + p["bn2"]
    x = jnp.where(jnp.any(jnp.isnan(x)), jnp.zeros_like(x), x)
    return x.reshape(N * D)


if __name__ == "__main__":
    n_particles, n_dim, hidden_nf, n_layers = 8, 3, 32, 3
    batch = 4
    key = jax.random.PRNGKey(0)
    k_params, k_x = jax.random.split(key)
    params = init_egnn_params(k_params, n_particles, hidden_nf, n_layers)
    packed = pack_egnn_params(params, n_particles, hidden_nf, n_layers)  # once, outside jit

    x_batch = jax.random.normal(k_x, (batch, n_particles * n_dim), jnp.float32)

    fwd_batched = jax.jit(lambda xs, p: egnn_forward_batched(
        xs, p, n_particles, n_dim, hidden_nf, n_layers))
    out_batch = jax.block_until_ready(fwd_batched(x_batch, packed))

    fwd_single = jax.jit(lambda xi, p: egnn_forward(
        xi, p, n_particles, n_dim, hidden_nf, n_layers))
    out_single = jax.block_until_ready(fwd_single(x_batch[0], packed))

    assert out_batch.shape == (batch, n_particles * n_dim)
    for b in range(batch):
        ref_b = _reference_forward(x_batch[b], params, n_particles, n_dim, hidden_nf, n_layers)
        assert bool(jnp.allclose(out_batch[b], ref_b, atol=1e-2, rtol=1e-2)), (b, out_batch[b], ref_b)
    assert bool(jnp.allclose(out_single, out_batch[0], atol=1e-5, rtol=1e-5))
    print("KERNEL_OK")
</pallas_src>

<mosaic_0001>
module attributes {stable_mosaic.version = 11 : i64} {
  func.func @_egnn_fused_kernel(%arg0: i32, %arg1: memref<1x8x3xf32, #tpu.memory_space<vmem>>, %arg2: memref<8x32xf32, #tpu.memory_space<vmem>>, %arg3: memref<672x32xf32, #tpu.memory_space<vmem>>, %arg4: memref<24x32xf32, #tpu.memory_space<vmem>>, %arg5: memref<64x1xf32, #tpu.memory_space<vmem>>, %arg6: memref<3xf32, #tpu.memory_space<smem>>, %arg7: memref<1x8x3xf32, #tpu.memory_space<vmem>>) attributes {dimension_semantics = [#tpu.dimension_semantics<parallel>], iteration_bounds = array<i64: 4>, scalar_prefetch = 0 : i64, scratch_operands = 0 : i64, tpu.core_type = #tpu.core_type<tc>, window_params = [{transform_indices = @transform_0, window_bounds = array<i64: 1, 8, 3>}, {pipeline_mode = #tpu.pipeline_mode<synchronous>, transform_indices = @transform_1, window_bounds = array<i64: 8, 32>}, {pipeline_mode = #tpu.pipeline_mode<synchronous>, transform_indices = @transform_2, window_bounds = array<i64: 672, 32>}, {pipeline_mode = #tpu.pipeline_mode<synchronous>, transform_indices = @transform_3, window_bounds = array<i64: 24, 32>}, {pipeline_mode = #tpu.pipeline_mode<synchronous>, transform_indices = @transform_4, window_bounds = array<i64: 64, 1>}, {transform_indices = @transform_5, window_bounds = array<i64: 3>}, {transform_indices = @transform_6, window_bounds = array<i64: 1, 8, 3>}]} {
    %c0 = arith.constant 0 : index
    %c0_0 = arith.constant 0 : index
    %c0_1 = arith.constant 0 : index
    %0 = vector.load %arg1[%c0, %c0_0, %c0_1] : memref<1x8x3xf32, #tpu.memory_space<vmem>>, vector<1x8x3xf32>
    %1 = vector.shape_cast %0 : vector<1x8x3xf32> to vector<8x3xf32>
    %c0_2 = arith.constant 0 : index
    %c0_3 = arith.constant 0 : index
    %2 = vector.load %arg2[%c0_2, %c0_3] : memref<8x32xf32, #tpu.memory_space<vmem>>, vector<8x32xf32>
    %c0_4 = arith.constant 0 : index
    %c0_5 = arith.constant 0 : index
    %3 = vector.load %arg5[%c0_4, %c0_5] : memref<64x1xf32, #tpu.memory_space<vmem>>, vector<64x1xf32>
    %c0_6 = arith.constant 0 : index
    %c0_7 = arith.constant 0 : index
    %4 = vector.load %arg3[%c0_6, %c0_7] : memref<672x32xf32, #tpu.memory_space<vmem>>, vector<32x32xf32>
    %c32 = arith.constant 32 : index
    %c0_8 = arith.constant 0 : index
    %5 = vector.load %arg3[%c32, %c0_8] : memref<672x32xf32, #tpu.memory_space<vmem>>, vector<32x32xf32>
    %c64 = arith.constant 64 : index
    %c0_9 = arith.constant 0 : index
    %6 = vector.load %arg3[%c64, %c0_9] : memref<672x32xf32, #tpu.memory_space<vmem>>, vector<32x32xf32>
    %c0_10 = arith.constant 0 : index
    %c0_11 = arith.constant 0 : index
    %7 = vector.load %arg4[%c0_10, %c0_11] : memref<24x32xf32, #tpu.memory_space<vmem>>, vector<1x32xf32>
    %c1 = arith.constant 1 : index
    %c0_12 = arith.constant 0 : index
    %8 = vector.load %arg4[%c1, %c0_12] : memref<24x32xf32, #tpu.memory_space<vmem>>, vector<1x32xf32>
    %c2 = arith.constant 2 : index
    %c0_13 = arith.constant 0 : index
    %9 = vector.load %arg4[%c2, %c0_13] : memref<24x32xf32, #tpu.memory_space<vmem>>, vector<1x32xf32>
    %c3 = arith.constant 3 : index
    %c0_14 = arith.constant 0 : index
    %10 = vector.load %arg4[%c3, %c0_14] : memref<24x32xf32, #tpu.memory_space<vmem>>, vector<1x32xf32>
    %c0_15 = arith.constant 0 : index
    %11 = memref.load %arg6[%c0_15] : memref<3xf32, #tpu.memory_space<smem>>
    %12 = tpu.concatenate %1, %1, %1, %1, %1, %1, %1, %1 in 0 : vector<8x3xf32>, vector<8x3xf32>, vector<8x3xf32>, vector<8x3xf32>, vector<8x3xf32>, vector<8x3xf32>, vector<8x3xf32>, vector<8x3xf32> -> vector<64x3xf32>
    %13 = vector.extract_strided_slice %1 {offsets = [0, 0], sizes = [1, 3], strides = [1, 1]} : vector<8x3xf32> to vector<1x3xf32>
    %14 = vector.shape_cast %13 : vector<1x3xf32> to vector<1x3xf32>
    %15 = vector.broadcast %14 : vector<1x3xf32> to vector<8x3xf32>
    %16 = vector.extract_strided_slice %1 {offsets = [1, 0], sizes = [1, 3], strides = [1, 1]} : vector<8x3xf32> to vector<1x3xf32>
    %17 = vector.shape_cast %16 : vector<1x3xf32> to vector<1x3xf32>
    %18 = vector.broadcast %17 : vector<1x3xf32> to vector<8x3xf32>
    %19 = vector.extract_strided_slice %1 {offsets = [2, 0], sizes = [1, 3], strides = [1, 1]} : vector<8x3xf32> to vector<1x3xf32>
    %20 = vector.shape_cast %19 : vector<1x3xf32> to vector<1x3xf32>
    %21 = vector.broadcast %20 : vector<1x3xf32> to vector<8x3xf32>
    %22 = vector.extract_strided_slice %1 {offsets = [3, 0], sizes = [1, 3], strides = [1, 1]} : vector<8x3xf32> to vector<1x3xf32>
    %23 = vector.shape_cast %22 : vector<1x3xf32> to vector<1x3xf32>
    %24 = vector.broadcast %23 : vector<1x3xf32> to vector<8x3xf32>
    %25 = vector.extract_strided_slice %1 {offsets = [4, 0], sizes = [1, 3], strides = [1, 1]} : vector<8x3xf32> to vector<1x3xf32>
    %26 = vector.shape_cast %25 : vector<1x3xf32> to vector<1x3xf32>
    %27 = vector.broadcast %26 : vector<1x3xf32> to vector<8x3xf32>
    %28 = vector.extract_strided_slice %1 {offsets = [5, 0], sizes = [1, 3], strides = [1, 1]} : vector<8x3xf32> to vector<1x3xf32>
    %29 = vector.shape_cast %28 : vector<1x3xf32> to vector<1x3xf32>
    %30 = vector.broadcast %29 : vector<1x3xf32> to vector<8x3xf32>
    %31 = vector.extract_strided_slice %1 {offsets = [6, 0], sizes = [1, 3], strides = [1, 1]} : vector<8x3xf32> to vector<1x3xf32>
    %32 = vector.shape_cast %31 : vector<1x3xf32> to vector<1x3xf32>
    %33 = vector.broadcast %32 : vector<1x3xf32> to vector<8x3xf32>
    %34 = vector.extract_strided_slice %1 {offsets = [7, 0], sizes = [1, 3], strides = [1, 1]} : vector<8x3xf32> to vector<1x3xf32>
    %35 = vector.shape_cast %34 : vector<1x3xf32> to vector<1x3xf32>
    %36 = vector.broadcast %35 : vector<1x3xf32> to vector<8x3xf32>
    %37 = tpu.concatenate %15, %18, %21, %24, %27, %30, %33, %36 in 0 : vector<8x3xf32>, vector<8x3xf32>, vector<8x3xf32>, vector<8x3xf32>, vector<8x3xf32>, vector<8x3xf32>, vector<8x3xf32>, vector<8x3xf32> -> vector<64x3xf32>
    %38 = arith.subf %12, %37 : vector<64x3xf32>
    %39 = arith.mulf %38, %38 : vector<64x3xf32>
    %cst = arith.constant dense<0.000000e+00> : vector<64xf32>
    %40 = vector.multi_reduction <add>, %39, %cst [1] : vector<64x3xf32> to vector<64xf32>
    %41 = vector.shape_cast %40 : vector<64xf32> to vector<64x1xf32>
    %cst_16 = arith.constant dense<0.000000e+00> : vector<8x32xf32>
    %42 = tpu.matmul %2, %4, %cst_16 {dimension_numbers = #tpu.dot_dimension_numbers<[1], [0], [0], [1], [0, 0, 1, 1], [], []>} : vector<8x32xf32>, vector<32x32xf32>, vector<8x32xf32> -> vector<8x32xf32>
    %cst_17 = arith.constant dense<0.000000e+00> : vector<8x32xf32>
    %43 = tpu.matmul %2, %5, %cst_17 {dimension_numbers = #tpu.dot_dimension_numbers<[1], [0], [0], [1], [0, 0, 1, 1], [], []>} : vector<8x32xf32>, vector<32x32xf32>, vector<8x32xf32> -> vector<8x32xf32>
    %44 = vector.extract_strided_slice %42 {offsets = [0, 0], sizes = [1, 32], strides = [1, 1]} : vector<8x32xf32> to vector<1x32xf32>
    %45 = vector.shape_cast %44 : vector<1x32xf32> to vector<1x32xf32>
    %46 = vector.broadcast %45 : vector<1x32xf32> to vector<8x32xf32>
    %47 = vector.extract_strided_slice %42 {offsets = [1, 0], sizes = [1, 32], strides = [1, 1]} : vector<8x32xf32> to vector<1x32xf32>
    %48 = vector.shape_cast %47 : vector<1x32xf32> to vector<1x32xf32>
    %49 = vector.broadcast %48 : vector<1x32xf32> to vector<8x32xf32>
    %50 = vector.extract_strided_slice %42 {offsets = [2, 0], sizes = [1, 32], strides = [1, 1]} : vector<8x32xf32> to vector<1x32xf32>
    %51 = vector.shape_cast %50 : vector<1x32xf32> to vector<1x32xf32>
    %52 = vector.broadcast %51 : vector<1x32xf32> to vector<8x32xf32>
    %53 = vector.extract_strided_slice %42 {offsets = [3, 0], sizes = [1, 32], strides = [1, 1]} : vector<8x32xf32> to vector<1x32xf32>
    %54 = vector.shape_cast %53 : vector<1x32xf32> to vector<1x32xf32>
    %55 = vector.broadcast %54 : vector<1x32xf32> to vector<8x32xf32>
    %56 = vector.extract_strided_slice %42 {offsets = [4, 0], sizes = [1, 32], strides = [1, 1]} : vector<8x32xf32> to vector<1x32xf32>
    %57 = vector.shape_cast %56 : vector<1x32xf32> to vector<1x32xf32>
    %58 = vector.broadcast %57 : vector<1x32xf32> to vector<8x32xf32>
    %59 = vector.extract_strided_slice %42 {offsets = [5, 0], sizes = [1, 32], strides = [1, 1]} : vector<8x32xf32> to vector<1x32xf32>
    %60 = vector.shape_cast %59 : vector<1x32xf32> to vector<1x32xf32>
    %61 = vector.broadcast %60 : vector<1x32xf32> to vector<8x32xf32>
    %62 = vector.extract_strided_slice %42 {offsets = [6, 0], sizes = [1, 32], strides = [1, 1]} : vector<8x32xf32> to vector<1x32xf32>
    %63 = vector.shape_cast %62 : vector<1x32xf32> to vector<1x32xf32>
    %64 = vector.broadcast %63 : vector<1x32xf32> to vector<8x32xf32>
    %65 = vector.extract_strided_slice %42 {offsets = [7, 0], sizes = [1, 32], strides = [1, 1]} : vector<8x32xf32> to vector<1x32xf32>
    %66 = vector.shape_cast %65 : vector<1x32xf32> to vector<1x32xf32>
    %67 = vector.broadcast %66 : vector<1x32xf32> to vector<8x32xf32>
    %68 = tpu.concatenate %46, %49, %52, %55, %58, %61, %64, %67 in 0 : vector<8x32xf32>, vector<8x32xf32>, vector<8x32xf32>, vector<8x32xf32>, vector<8x32xf32>, vector<8x32xf32>, vector<8x32xf32>, vector<8x32xf32> -> vector<64x32xf32>
    %69 = tpu.concatenate %43, %43, %43, %43, %43, %43, %43, %43 in 0 : vector<8x32xf32>, vector<8x32xf32>, vector<8x32xf32>, vector<8x32xf32>, vector<8x32xf32>, vector<8x32xf32>, vector<8x32xf32>, vector<8x32xf32> -> vector<64x32xf32>
    %70 = arith.addf %68, %69 : vector<64x32xf32>
    %71 = vector.broadcast %41 : vector<64x1xf32> to vector<64x32xf32>
    %72 = vector.broadcast %7 : vector<1x32xf32> to vector<64x32xf32>
    %73 = arith.mulf %71, %72 : vector<64x32xf32>
    %74 = arith.addf %70, %73 : vector<64x32xf32>
    %75 = vector.broadcast %8 : vector<1x32xf32> to vector<64x32xf32>
    %76 = arith.addf %74, %75 : vector<64x32xf32>
    %cst_18 = arith.constant 0.000000e+00 : f32
    %77 = vector.broadcast %cst_18 : f32 to vector<64x32xf32>
    %78 = arith.subf %77, %76 : vector<64x32xf32>
    %79 = math.exp %78 : vector<64x32xf32>
    %cst_19 = arith.constant 1.000000e+00 : f32
    %80 = vector.broadcast %cst_19 : f32 to vector<64x32xf32>
    %81 = arith.addf %80, %79 : vector<64x32xf32>
    %82 = tpu.reciprocal %81 {approx = true} : vector<64x32xf32> -> vector<64x32xf32>
    %83 = arith.mulf %76, %82 : vector<64x32xf32>
    %cst_20 = arith.constant dense<0.000000e+00> : vector<64x32xf32>
    %84 = tpu.matmul %83, %6, %cst_20 {dimension_numbers = #tpu.dot_dimension_numbers<[1], [0], [0], [1], [0, 0, 1, 1], [], []>} : vector<64x32xf32>, vector<32x32xf32>, vector<64x32xf32> -> vector<64x32xf32>
    %85 = vector.broadcast %9 : vector<1x32xf32> to vector<64x32xf32>
    %86 = arith.addf %84, %85 : vector<64x32xf32>
    %cst_21 = arith.constant 0.000000e+00 : f32
    %87 = vector.broadcast %cst_21 : f32 to vector<64x32xf32>
    %88 = arith.subf %87, %86 : vector<64x32xf32>
    %89 = math.exp %88 : vector<64x32xf32>
    %cst_22 = arith.constant 1.000000e+00 : f32
    %90 = vector.broadcast %cst_22 : f32 to vector<64x32xf32>
    %91 = arith.addf %90, %89 : vector<64x32xf32>
    %92 = tpu.reciprocal %91 {approx = true} : vector<64x32xf32> -> vector<64x32xf32>
    %93 = arith.mulf %86, %92 : vector<64x32xf32>
    %94 = vector.broadcast %10 : vector<1x32xf32> to vector<64x32xf32>
    %95 = arith.mulf %93, %94 : vector<64x32xf32>
    %cst_23 = arith.constant dense<0.000000e+00> : vector<64xf32>
    %96 = vector.multi_reduction <add>, %95, %cst_23 [1] : vector<64x32xf32> to vector<64xf32>
    %97 = vector.shape_cast %96 : vector<64xf32> to vector<64x1xf32>
    %98 = vector.broadcast %11 : f32 to vector<64x1xf32>
    %99 = arith.addf %97, %98 : vector<64x1xf32>
    %100 = math.sqrt %41 : vector<64x1xf32>
    %cst_24 = arith.constant 1.000000e+00 : f32
    %101 = vector.broadcast %cst_24 : f32 to vector<64x1xf32>
    %102 = arith.addf %100, %101 : vector<64x1xf32>
    %103 = tpu.reciprocal %102 {approx = true} : vector<64x1xf32> -> vector<64x1xf32>
    %104 = arith.mulf %99, %103 : vector<64x1xf32>
    %105 = vector.broadcast %104 : vector<64x1xf32> to vector<64x3xf32>
    %106 = arith.mulf %38, %105 : vector<64x3xf32>
    %107 = vector.shape_cast %106 : vector<64x3xf32> to vector<8x8x3xf32>
    %cst_25 = arith.constant dense<0.000000e+00> : vector<8x3xf32>
    %108 = vector.multi_reduction <add>, %107, %cst_25 [1] : vector<8x8x3xf32> to vector<8x3xf32>
    %109 = arith.addf %1, %108 : vector<8x3xf32>
    %c96 = arith.constant 96 : index
    %c0_26 = arith.constant 0 : index
    %110 = vector.load %arg3[%c96, %c0_26] : memref<672x32xf32, #tpu.memory_space<vmem>>, vector<32x32xf32>
    %c128 = arith.constant 128 : index
    %c0_27 = arith.constant 0 : index
    %111 = vector.load %arg3[%c128, %c0_27] : memref<672x32xf32, #tpu.memory_space<vmem>>, vector<32x32xf32>
    %c160 = arith.constant 160 : index
    %c0_28 = arith.constant 0 : index
    %112 = vector.load %arg3[%c160, %c0_28] : memref<672x32xf32, #tpu.memory_space<vmem>>, vector<32x32xf32>
    %c192 = arith.constant 192 : index
    %c0_29 = arith.constant 0 : index
    %113 = vector.load %arg3[%c192, %c0_29] : memref<672x32xf32, #tpu.memory_space<vmem>>, vector<32x32xf32>
    %c224 = arith.constant 224 : index
    %c0_30 = arith.constant 0 : index
    %114 = vector.load %arg3[%c224, %c0_30] : memref<672x32xf32, #tpu.memory_space<vmem>>, vector<32x32xf32>
    %c256 = arith.constant 256 : index
    %c0_31 = arith.constant 0 : index
    %115 = vector.load %arg3[%c256, %c0_31] : memref<672x32xf32, #tpu.memory_space<vmem>>, vector<32x32xf32>
    %c4 = arith.constant 4 : index
    %c0_32 = arith.constant 0 : index
    %116 = vector.load %arg4[%c4, %c0_32] : memref<24x32xf32, #tpu.memory_space<vmem>>, vector<1x32xf32>
    %c5 = arith.constant 5 : index
    %c0_33 = arith.constant 0 : index
    %117 = vector.load %arg4[%c5, %c0_33] : memref<24x32xf32, #tpu.memory_space<vmem>>, vector<1x32xf32>
    %c6 = arith.constant 6 : index
    %c0_34 = arith.constant 0 : index
    %118 = vector.load %arg4[%c6, %c0_34] : memref<24x32xf32, #tpu.memory_space<vmem>>, vector<1x32xf32>
    %c7 = arith.constant 7 : index
    %c0_35 = arith.constant 0 : index
    %119 = vector.load %arg4[%c7, %c0_35] : memref<24x32xf32, #tpu.memory_space<vmem>>, vector<1x32xf32>
    %c8 = arith.constant 8 : index
    %c0_36 = arith.constant 0 : index
    %120 = vector.load %arg4[%c8, %c0_36] : memref<24x32xf32, #tpu.memory_space<vmem>>, vector<1x32xf32>
    %c9 = arith.constant 9 : index
    %c0_37 = arith.constant 0 : index
    %121 = vector.load %arg4[%c9, %c0_37] : memref<24x32xf32, #tpu.memory_space<vmem>>, vector<1x32xf32>
    %cst_38 = arith.constant dense<0.000000e+00> : vector<8x32xf32>
    %122 = tpu.matmul %2, %110, %cst_38 {dimension_numbers = #tpu.dot_dimension_numbers<[1], [0], [0], [1], [0, 0, 1, 1], [], []>} : vector<8x32xf32>, vector<32x32xf32>, vector<8x32xf32> -> vector<8x32xf32>
    %cst_39 = arith.constant dense<0.000000e+00> : vector<8x32xf32>
    %123 = tpu.matmul %2, %111, %cst_39 {dimension_numbers = #tpu.dot_dimension_numbers<[1], [0], [0], [1], [0, 0, 1, 1], [], []>} : vector<8x32xf32>, vector<32x32xf32>, vector<8x32xf32> -> vector<8x32xf32>
    %124 = vector.extract_strided_slice %122 {offsets = [0, 0], sizes = [1, 32], strides = [1, 1]} : vector<8x32xf32> to vector<1x32xf32>
    %125 = vector.shape_cast %124 : vector<1x32xf32> to vector<1x32xf32>
    %126 = vector.broadcast %125 : vector<1x32xf32> to vector<8x32xf32>
    %127 = vector.extract_strided_slice %122 {offsets = [1, 0], sizes = [1, 32], strides = [1, 1]} : vector<8x32xf32> to vector<1x32xf32>
    %128 = vector.shape_cast %127 : vector<1x32xf32> to vector<1x32xf32>
    %129 = vector.broadcast %128 : vector<1x32xf32> to vector<8x32xf32>
    %130 = vector.extract_strided_slice %122 {offsets = [2, 0], sizes = [1, 32], strides = [1, 1]} : vector<8x32xf32> to vector<1x32xf32>
    %131 = vector.shape_cast %130 : vector<1x32xf32> to vector<1x32xf32>
    %132 = vector.broadcast %131 : vector<1x32xf32> to vector<8x32xf32>
    %133 = vector.extract_strided_slice %122 {offsets = [3, 0], sizes = [1, 32], strides = [1, 1]} : vector<8x32xf32> to vector<1x32xf32>
    %134 = vector.shape_cast %133 : vector<1x32xf32> to vector<1x32xf32>
    %135 = vector.broadcast %134 : vector<1x32xf32> to vector<8x32xf32>
    %136 = vector.extract_strided_slice %122 {offsets = [4, 0], sizes = [1, 32], strides = [1, 1]} : vector<8x32xf32> to vector<1x32xf32>
    %137 = vector.shape_cast %136 : vector<1x32xf32> to vector<1x32xf32>
    %138 = vector.broadcast %137 : vector<1x32xf32> to vector<8x32xf32>
    %139 = vector.extract_strided_slice %122 {offsets = [5, 0], sizes = [1, 32], strides = [1, 1]} : vector<8x32xf32> to vector<1x32xf32>
    %140 = vector.shape_cast %139 : vector<1x32xf32> to vector<1x32xf32>
    %141 = vector.broadcast %140 : vector<1x32xf32> to vector<8x32xf32>
    %142 = vector.extract_strided_slice %122 {offsets = [6, 0], sizes = [1, 32], strides = [1, 1]} : vector<8x32xf32> to vector<1x32xf32>
    %143 = vector.shape_cast %142 : vector<1x32xf32> to vector<1x32xf32>
    %144 = vector.broadcast %143 : vector<1x32xf32> to vector<8x32xf32>
    %145 = vector.extract_strided_slice %122 {offsets = [7, 0], sizes = [1, 32], strides = [1, 1]} : vector<8x32xf32> to vector<1x32xf32>
    %146 = vector.shape_cast %145 : vector<1x32xf32> to vector<1x32xf32>
    %147 = vector.broadcast %146 : vector<1x32xf32> to vector<8x32xf32>
    %148 = tpu.concatenate %126, %129, %132, %135, %138, %141, %144, %147 in 0 : vector<8x32xf32>, vector<8x32xf32>, vector<8x32xf32>, vector<8x32xf32>, vector<8x32xf32>, vector<8x32xf32>, vector<8x32xf32>, vector<8x32xf32> -> vector<64x32xf32>
    %149 = tpu.concatenate %123, %123, %123, %123, %123, %123, %123, %123 in 0 : vector<8x32xf32>, vector<8x32xf32>, vector<8x32xf32>, vector<8x32xf32>, vector<8x32xf32>, vector<8x32xf32>, vector<8x32xf32>, vector<8x32xf32> -> vector<64x32xf32>
    %150 = arith.addf %148, %149 : vector<64x32xf32>
    %151 = vector.broadcast %41 : vector<64x1xf32> to vector<64x32xf32>
    %152 = vector.broadcast %116 : vector<1x32xf32> to vector<64x32xf32>
    %153 = arith.mulf %151, %152 : vector<64x32xf32>
    %154 = arith.addf %150, %153 : vector<64x32xf32>
    %155 = vector.broadcast %117 : vector<1x32xf32> to vector<64x32xf32>
    %156 = arith.addf %154, %155 : vector<64x32xf32>
    %cst_40 = arith.constant 0.000000e+00 : f32
    %157 = vector.broadcast %cst_40 : f32 to vector<64x32xf32>
    %158 = arith.subf %157, %156 : vector<64x32xf32>
    %159 = math.exp %158 : vector<64x32xf32>
    %cst_41 = arith.constant 1.000000e+00 : f32
    %160 = vector.broadcast %cst_41 : f32 to vector<64x32xf32>
    %161 = arith.addf %160, %159 : vector<64x32xf32>
    %162 = tpu.reciprocal %161 {approx = true} : vector<64x32xf32> -> vector<64x32xf32>
    %163 = arith.mulf %156, %162 : vector<64x32xf32>
    %cst_42 = arith.constant dense<0.000000e+00> : vector<64x32xf32>
    %164 = tpu.matmul %163, %112, %cst_42 {dimension_numbers = #tpu.dot_dimension_numbers<[1], [0], [0], [1], [0, 0, 1, 1], [], []>} : vector<64x32xf32>, vector<32x32xf32>, vector<64x32xf32> -> vector<64x32xf32>
    %165 = vector.broadcast %118 : vector<1x32xf32> to vector<64x32xf32>
    %166 = arith.addf %164, %165 : vector<64x32xf32>
    %cst_43 = arith.constant 0.000000e+00 : f32
    %167 = vector.broadcast %cst_43 : f32 to vector<64x32xf32>
    %168 = arith.subf %167, %166 : vector<64x32xf32>
    %169 = math.exp %168 : vector<64x32xf32>
    %cst_44 = arith.constant 1.000000e+00 : f32
    %170 = vector.broadcast %cst_44 : f32 to vector<64x32xf32>
    %171 = arith.addf %170, %169 : vector<64x32xf32>
    %172 = tpu.reciprocal %171 {approx = true} : vector<64x32xf32> -> vector<64x32xf32>
    %173 = arith.mulf %166, %172 : vector<64x32xf32>
    %174 = vector.broadcast %119 : vector<1x32xf32> to vector<64x32xf32>
    %175 = arith.mulf %173, %174 : vector<64x32xf32>
    %cst_45 = arith.constant dense<0.000000e+00> : vector<64xf32>
    %176 = vector.multi_reduction <add>, %175, %cst_45 [1] : vector<64x32xf32> to vector<64xf32>
    %177 = vector.shape_cast %176 : vector<64xf32> to vector<64x1xf32>
    %cst_46 = arith.constant 0.000000e+00 : f32
    %178 = vector.broadcast %cst_46 : f32 to vector<64x1xf32>
    %179 = arith.subf %178, %177 : vector<64x1xf32>
    %180 = math.exp %179 : vector<64x1xf32>
    %cst_47 = arith.constant 1.000000e+00 : f32
    %181 = vector.broadcast %cst_47 : f32 to vector<64x1xf32>
    %182 = arith.addf %181, %180 : vector<64x1xf32>
    %183 = tpu.reciprocal %182 {approx = true} : vector<64x1xf32> -> vector<64x1xf32>
    %184 = arith.mulf %183, %3 : vector<64x1xf32>
    %185 = vector.broadcast %184 : vector<64x1xf32> to vector<64x32xf32>
    %186 = arith.mulf %173, %185 : vector<64x32xf32>
    %187 = vector.shape_cast %186 : vector<64x32xf32> to vector<8x8x32xf32>
    %cst_48 = arith.constant dense<0.000000e+00> : vector<8x32xf32>
    %188 = vector.multi_reduction <add>, %187, %cst_48 [1] : vector<8x8x32xf32> to vector<8x32xf32>
    %cst_49 = arith.constant dense<0.000000e+00> : vector<8x32xf32>
    %189 = tpu.matmul %2, %113, %cst_49 {dimension_numbers = #tpu.dot_dimension_numbers<[1], [0], [0], [1], [0, 0, 1, 1], [], []>} : vector<8x32xf32>, vector<32x32xf32>, vector<8x32xf32> -> vector<8x32xf32>
    %cst_50 = arith.constant dense<0.000000e+00> : vector<8x32xf32>
    %190 = tpu.matmul %188, %114, %cst_50 {dimension_numbers = #tpu.dot_dimension_numbers<[1], [0], [0], [1], [0, 0, 1, 1], [], []>} : vector<8x32xf32>, vector<32x32xf32>, vector<8x32xf32> -> vector<8x32xf32>
    %191 = arith.addf %189, %190 : vector<8x32xf32>
    %192 = vector.broadcast %120 : vector<1x32xf32> to vector<8x32xf32>
    %193 = arith.addf %191, %192 : vector<8x32xf32>
    %cst_51 = arith.constant 0.000000e+00 : f32
    %194 = vector.broadcast %cst_51 : f32 to vector<8x32xf32>
    %195 = arith.subf %194, %193 : vector<8x32xf32>
    %196 = math.exp %195 : vector<8x32xf32>
    %cst_52 = arith.constant 1.000000e+00 : f32
    %197 = vector.broadcast %cst_52 : f32 to vector<8x32xf32>
    %198 = arith.addf %197, %196 : vector<8x32xf32>
    %199 = tpu.reciprocal %198 {approx = true} : vector<8x32xf32> -> vector<8x32xf32>
    %200 = arith.mulf %193, %199 : vector<8x32xf32>
    %cst_53 = arith.constant dense<0.000000e+00> : vector<8x32xf32>
    %201 = tpu.matmul %200, %115, %cst_53 {dimension_numbers = #tpu.dot_dimension_numbers<[1], [0], [0], [1], [0, 0, 1, 1], [], []>} : vector<8x32xf32>, vector<32x32xf32>, vector<8x32xf32> -> vector<8x32xf32>
    %202 = vector.broadcast %121 : vector<1x32xf32> to vector<8x32xf32>
    %203 = arith.addf %201, %202 : vector<8x32xf32>
    %c288 = arith.constant 288 : index
    %c0_54 = arith.constant 0 : index
    %204 = vector.load %arg3[%c288, %c0_54] : memref<672x32xf32, #tpu.memory_space<vmem>>, vector<32x32xf32>
    %c320 = arith.constant 320 : index
    %c0_55 = arith.constant 0 : index
    %205 = vector.load %arg3[%c320, %c0_55] : memref<672x32xf32, #tpu.memory_space<vmem>>, vector<32x32xf32>
    %c352 = arith.constant 352 : index
    %c0_56 = arith.constant 0 : index
    %206 = vector.load %arg3[%c352, %c0_56] : memref<672x32xf32, #tpu.memory_space<vmem>>, vector<32x32xf32>
    %c10 = arith.constant 10 : index
    %c0_57 = arith.constant 0 : index
    %207 = vector.load %arg4[%c10, %c0_57] : memref<24x32xf32, #tpu.memory_space<vmem>>, vector<1x32xf32>
    %c11 = arith.constant 11 : index
    %c0_58 = arith.constant 0 : index
    %208 = vector.load %arg4[%c11, %c0_58] : memref<24x32xf32, #tpu.memory_space<vmem>>, vector<1x32xf32>
    %c12 = arith.constant 12 : index
    %c0_59 = arith.constant 0 : index
    %209 = vector.load %arg4[%c12, %c0_59] : memref<24x32xf32, #tpu.memory_space<vmem>>, vector<1x32xf32>
    %c13 = arith.constant 13 : index
    %c0_60 = arith.constant 0 : index
    %210 = vector.load %arg4[%c13, %c0_60] : memref<24x32xf32, #tpu.memory_space<vmem>>, vector<1x32xf32>
    %c1_61 = arith.constant 1 : index
    %211 = memref.load %arg6[%c1_61] : memref<3xf32, #tpu.memory_space<smem>>
    %212 = tpu.concatenate %109, %109, %109, %109, %109, %109, %109, %109 in 0 : vector<8x3xf32>, vector<8x3xf32>, vector<8x3xf32>, vector<8x3xf32>, vector<8x3xf32>, vector<8x3xf32>, vector<8x3xf32>, vector<8x3xf32> -> vector<64x3xf32>
    %213 = vector.extract_strided_slice %109 {offsets = [0, 0], sizes = [1, 3], strides = [1, 1]} : vector<8x3xf32> to vector<1x3xf32>
    %214 = vector.shape_cast %213 : vector<1x3xf32> to vector<1x3xf32>
    %215 = vector.broadcast %214 : vector<1x3xf32> to vector<8x3xf32>
    %216 = vector.extract_strided_slice %109 {offsets = [1, 0], sizes = [1, 3], strides = [1, 1]} : vector<8x3xf32> to vector<1x3xf32>
    %217 = vector.shape_cast %216 : vector<1x3xf32> to vector<1x3xf32>
    %218 = vector.broadcast %217 : vector<1x3xf32> to vector<8x3xf32>
    %219 = vector.extract_strided_slice %109 {offsets = [2, 0], sizes = [1, 3], strides = [1, 1]} : vector<8x3xf32> to vector<1x3xf32>
    %220 = vector.shape_cast %219 : vector<1x3xf32> to vector<1x3xf32>
    %221 = vector.broadcast %220 : vector<1x3xf32> to vector<8x3xf32>
    %222 = vector.extract_strided_slice %109 {offsets = [3, 0], sizes = [1, 3], strides = [1, 1]} : vector<8x3xf32> to vector<1x3xf32>
    %223 = vector.shape_cast %222 : vector<1x3xf32> to vector<1x3xf32>
    %224 = vector.broadcast %223 : vector<1x3xf32> to vector<8x3xf32>
    %225 = vector.extract_strided_slice %109 {offsets = [4, 0], sizes = [1, 3], strides = [1, 1]} : vector<8x3xf32> to vector<1x3xf32>
    %226 = vector.shape_cast %225 : vector<1x3xf32> to vector<1x3xf32>
    %227 = vector.broadcast %226 : vector<1x3xf32> to vector<8x3xf32>
    %228 = vector.extract_strided_slice %109 {offsets = [5, 0], sizes = [1, 3], strides = [1, 1]} : vector<8x3xf32> to vector<1x3xf32>
    %229 = vector.shape_cast %228 : vector<1x3xf32> to vector<1x3xf32>
    %230 = vector.broadcast %229 : vector<1x3xf32> to vector<8x3xf32>
    %231 = vector.extract_strided_slice %109 {offsets = [6, 0], sizes = [1, 3], strides = [1, 1]} : vector<8x3xf32> to vector<1x3xf32>
    %232 = vector.shape_cast %231 : vector<1x3xf32> to vector<1x3xf32>
    %233 = vector.broadcast %232 : vector<1x3xf32> to vector<8x3xf32>
    %234 = vector.extract_strided_slice %109 {offsets = [7, 0], sizes = [1, 3], strides = [1, 1]} : vector<8x3xf32> to vector<1x3xf32>
    %235 = vector.shape_cast %234 : vector<1x3xf32> to vector<1x3xf32>
    %236 = vector.broadcast %235 : vector<1x3xf32> to vector<8x3xf32>
    %237 = tpu.concatenate %215, %218, %221, %224, %227, %230, %233, %236 in 0 : vector<8x3xf32>, vector<8x3xf32>, vector<8x3xf32>, vector<8x3xf32>, vector<8x3xf32>, vector<8x3xf32>, vector<8x3xf32>, vector<8x3xf32> -> vector<64x3xf32>
    %238 = arith.subf %212, %237 : vector<64x3xf32>
    %239 = arith.mulf %238, %238 : vector<64x3xf32>
    %cst_62 = arith.constant dense<0.000000e+00> : vector<64xf32>
    %240 = vector.multi_reduction <add>, %239, %cst_62 [1] : vector<64x3xf32> to vector<64xf32>
    %241 = vector.shape_cast %240 : vector<64xf32> to vector<64x1xf32>
    %cst_63 = arith.constant dense<0.000000e+00> : vector<8x32xf32>
    %242 = tpu.matmul %203, %204, %cst_63 {dimension_numbers = #tpu.dot_dimension_numbers<[1], [0], [0], [1], [0, 0, 1, 1], [], []>} : vector<8x32xf32>, vector<32x32xf32>, vector<8x32xf32> -> vector<8x32xf32>
    %cst_64 = arith.constant dense<0.000000e+00> : vector<8x32xf32>
    %243 = tpu.matmul %203, %205, %cst_64 {dimension_numbers = #tpu.dot_dimension_numbers<[1], [0], [0], [1], [0, 0, 1, 1], [], []>} : vector<8x32xf32>, vector<32x32xf32>, vector<8x32xf32> -> vector<8x32xf32>
    %244 = vector.extract_strided_slice %242 {offsets = [0, 0], sizes = [1, 32], strides = [1, 1]} : vector<8x32xf32> to vector<1x32xf32>
    %245 = vector.shape_cast %244 : vector<1x32xf32> to vector<1x32xf32>
    %246 = vector.broadcast %245 : vector<1x32xf32> to vector<8x32xf32>
    %247 = vector.extract_strided_slice %242 {offsets = [1, 0], sizes = [1, 32], strides = [1, 1]} : vector<8x32xf32> to vector<1x32xf32>
    %248 = vector.shape_cast %247 : vector<1x32xf32> to vector<1x32xf32>
    %249 = vector.broadcast %248 : vector<1x32xf32> to vector<8x32xf32>
    %250 = vector.extract_strided_slice %242 {offsets = [2, 0], sizes = [1, 32], strides = [1, 1]} : vector<8x32xf32> to vector<1x32xf32>
    %251 = vector.shape_cast %250 : vector<1x32xf32> to vector<1x32xf32>
    %252 = vector.broadcast %251 : vector<1x32xf32> to vector<8x32xf32>
    %253 = vector.extract_strided_slice %242 {offsets = [3, 0], sizes = [1, 32], strides = [1, 1]} : vector<8x32xf32> to vector<1x32xf32>
    %254 = vector.shape_cast %253 : vector<1x32xf32> to vector<1x32xf32>
    %255 = vector.broadcast %254 : vector<1x32xf32> to vector<8x32xf32>
    %256 = vector.extract_strided_slice %242 {offsets = [4, 0], sizes = [1, 32], strides = [1, 1]} : vector<8x32xf32> to vector<1x32xf32>
    %257 = vector.shape_cast %256 : vector<1x32xf32> to vector<1x32xf32>
    %258 = vector.broadcast %257 : vector<1x32xf32> to vector<8x32xf32>
    %259 = vector.extract_strided_slice %242 {offsets = [5, 0], sizes = [1, 32], strides = [1, 1]} : vector<8x32xf32> to vector<1x32xf32>
    %260 = vector.shape_cast %259 : vector<1x32xf32> to vector<1x32xf32>
    %261 = vector.broadcast %260 : vector<1x32xf32> to vector<8x32xf32>
    %262 = vector.extract_strided_slice %242 {offsets = [6, 0], sizes = [1, 32], strides = [1, 1]} : vector<8x32xf32> to vector<1x32xf32>
    %263 = vector.shape_cast %262 : vector<1x32xf32> to vector<1x32xf32>
    %264 = vector.broadcast %263 : vector<1x32xf32> to vector<8x32xf32>
    %265 = vector.extract_strided_slice %242 {offsets = [7, 0], sizes = [1, 32], strides = [1, 1]} : vector<8x32xf32> to vector<1x32xf32>
    %266 = vector.shape_cast %265 : vector<1x32xf32> to vector<1x32xf32>
    %267 = vector.broadcast %266 : vector<1x32xf32> to vector<8x32xf32>
    %268 = tpu.concatenate %246, %249, %252, %255, %258, %261, %264, %267 in 0 : vector<8x32xf32>, vector<8x32xf32>, vector<8x32xf32>, vector<8x32xf32>, vector<8x32xf32>, vector<8x32xf32>, vector<8x32xf32>, vector<8x32xf32> -> vector<64x32xf32>
    %269 = tpu.concatenate %243, %243, %243, %243, %243, %243, %243, %243 in 0 : vector<8x32xf32>, vector<8x32xf32>, vector<8x32xf32>, vector<8x32xf32>, vector<8x32xf32>, vector<8x32xf32>, vector<8x32xf32>, vector<8x32xf32> -> vector<64x32xf32>
    %270 = arith.addf %268, %269 : vector<64x32xf32>
    %271 = vector.broadcast %241 : vector<64x1xf32> to vector<64x32xf32>
    %272 = vector.broadcast %207 : vector<1x32xf32> to vector<64x32xf32>
    %273 = arith.mulf %271, %272 : vector<64x32xf32>
    %274 = arith.addf %270, %273 : vector<64x32xf32>
    %275 = vector.broadcast %208 : vector<1x32xf32> to vector<64x32xf32>
    %276 = arith.addf %274, %275 : vector<64x32xf32>
    %cst_65 = arith.constant 0.000000e+00 : f32
    %277 = vector.broadcast %cst_65 : f32 to vector<64x32xf32>
    %278 = arith.subf %277, %276 : vector<64x32xf32>
    %279 = math.exp %278 : vector<64x32xf32>
    %cst_66 = arith.constant 1.000000e+00 : f32
    %280 = vector.broadcast %cst_66 : f32 to vector<64x32xf32>
    %281 = arith.addf %280, %279 : vector<64x32xf32>
    %282 = tpu.reciprocal %281 {approx = true} : vector<64x32xf32> -> vector<64x32xf32>
    %283 = arith.mulf %276, %282 : vector<64x32xf32>
    %cst_67 = arith.constant dense<0.000000e+00> : vector<64x32xf32>
    %284 = tpu.matmul %283, %206, %cst_67 {dimension_numbers = #tpu.dot_dimension_numbers<[1], [0], [0], [1], [0, 0, 1, 1], [], []>} : vector<64x32xf32>, vector<32x32xf32>, vector<64x32xf32> -> vector<64x32xf32>
    %285 = vector.broadcast %209 : vector<1x32xf32> to vector<64x32xf32>
    %286 = arith.addf %284, %285 : vector<64x32xf32>
    %cst_68 = arith.constant 0.000000e+00 : f32
    %287 = vector.broadcast %cst_68 : f32 to vector<64x32xf32>
    %288 = arith.subf %287, %286 : vector<64x32xf32>
    %289 = math.exp %288 : vector<64x32xf32>
    %cst_69 = arith.constant 1.000000e+00 : f32
    %290 = vector.broadcast %cst_69 : f32 to vector<64x32xf32>
    %291 = arith.addf %290, %289 : vector<64x32xf32>
    %292 = tpu.reciprocal %291 {approx = true} : vector<64x32xf32> -> vector<64x32xf32>
    %293 = arith.mulf %286, %292 : vector<64x32xf32>
    %294 = vector.broadcast %210 : vector<1x32xf32> to vector<64x32xf32>
    %295 = arith.mulf %293, %294 : vector<64x32xf32>
    %cst_70 = arith.constant dense<0.000000e+00> : vector<64xf32>
    %296 = vector.multi_reduction <add>, %295, %cst_70 [1] : vector<64x32xf32> to vector<64xf32>
    %297 = vector.shape_cast %296 : vector<64xf32> to vector<64x1xf32>
    %298 = vector.broadcast %211 : f32 to vector<64x1xf32>
    %299 = arith.addf %297, %298 : vector<64x1xf32>
    %300 = math.sqrt %241 : vector<64x1xf32>
    %cst_71 = arith.constant 1.000000e+00 : f32
    %301 = vector.broadcast %cst_71 : f32 to vector<64x1xf32>
    %302 = arith.addf %300, %301 : vector<64x1xf32>
    %303 = tpu.reciprocal %302 {approx = true} : vector<64x1xf32> -> vector<64x1xf32>
    %304 = arith.mulf %299, %303 : vector<64x1xf32>
    %305 = vector.broadcast %304 : vector<64x1xf32> to vector<64x3xf32>
    %306 = arith.mulf %238, %305 : vector<64x3xf32>
    %307 = vector.shape_cast %306 : vector<64x3xf32> to vector<8x8x3xf32>
    %cst_72 = arith.constant dense<0.000000e+00> : vector<8x3xf32>
    %308 = vector.multi_reduction <add>, %307, %cst_72 [1] : vector<8x8x3xf32> to vector<8x3xf32>
    %309 = arith.addf %109, %308 : vector<8x3xf32>
    %c384 = arith.constant 384 : index
    %c0_73 = arith.constant 0 : index
    %310 = vector.load %arg3[%c384, %c0_73] : memref<672x32xf32, #tpu.memory_space<vmem>>, vector<32x32xf32>
    %c416 = arith.constant 416 : index
    %c0_74 = arith.constant 0 : index
    %311 = vector.load %arg3[%c416, %c0_74] : memref<672x32xf32, #tpu.memory_space<vmem>>, vector<32x32xf32>
    %c448 = arith.constant 448 : index
    %c0_75 = arith.constant 0 : index
    %312 = vector.load %arg3[%c448, %c0_75] : memref<672x32xf32, #tpu.memory_space<vmem>>, vector<32x32xf32>
    %c480 = arith.constant 480 : index
    %c0_76 = arith.constant 0 : index
    %313 = vector.load %arg3[%c480, %c0_76] : memref<672x32xf32, #tpu.memory_space<vmem>>, vector<32x32xf32>
    %c512 = arith.constant 512 : index
    %c0_77 = arith.constant 0 : index
    %314 = vector.load %arg3[%c512, %c0_77] : memref<672x32xf32, #tpu.memory_space<vmem>>, vector<32x32xf32>
    %c544 = arith.constant 544 : index
    %c0_78 = arith.constant 0 : index
    %315 = vector.load %arg3[%c544, %c0_78] : memref<672x32xf32, #tpu.memory_space<vmem>>, vector<32x32xf32>
    %c14 = arith.constant 14 : index
    %c0_79 = arith.constant 0 : index
    %316 = vector.load %arg4[%c14, %c0_79] : memref<24x32xf32, #tpu.memory_space<vmem>>, vector<1x32xf32>
    %c15 = arith.constant 15 : index
    %c0_80 = arith.constant 0 : index
    %317 = vector.load %arg4[%c15, %c0_80] : memref<24x32xf32, #tpu.memory_space<vmem>>, vector<1x32xf32>
    %c16 = arith.constant 16 : index
    %c0_81 = arith.constant 0 : index
    %318 = vector.load %arg4[%c16, %c0_81] : memref<24x32xf32, #tpu.memory_space<vmem>>, vector<1x32xf32>
    %c17 = arith.constant 17 : index
    %c0_82 = arith.constant 0 : index
    %319 = vector.load %arg4[%c17, %c0_82] : memref<24x32xf32, #tpu.memory_space<vmem>>, vector<1x32xf32>
    %c18 = arith.constant 18 : index
    %c0_83 = arith.constant 0 : index
    %320 = vector.load %arg4[%c18, %c0_83] : memref<24x32xf32, #tpu.memory_space<vmem>>, vector<1x32xf32>
    %c19 = arith.constant 19 : index
    %c0_84 = arith.constant 0 : index
    %321 = vector.load %arg4[%c19, %c0_84] : memref<24x32xf32, #tpu.memory_space<vmem>>, vector<1x32xf32>
    %cst_85 = arith.constant dense<0.000000e+00> : vector<8x32xf32>
    %322 = tpu.matmul %203, %310, %cst_85 {dimension_numbers = #tpu.dot_dimension_numbers<[1], [0], [0], [1], [0, 0, 1, 1], [], []>} : vector<8x32xf32>, vector<32x32xf32>, vector<8x32xf32> -> vector<8x32xf32>
    %cst_86 = arith.constant dense<0.000000e+00> : vector<8x32xf32>
    %323 = tpu.matmul %203, %311, %cst_86 {dimension_numbers = #tpu.dot_dimension_numbers<[1], [0], [0], [1], [0, 0, 1, 1], [], []>} : vector<8x32xf32>, vector<32x32xf32>, vector<8x32xf32> -> vector<8x32xf32>
    %324 = vector.extract_strided_slice %322 {offsets = [0, 0], sizes = [1, 32], strides = [1, 1]} : vector<8x32xf32> to vector<1x32xf32>
    %325 = vector.shape_cast %324 : vector<1x32xf32> to vector<1x32xf32>
    %326 = vector.broadcast %325 : vector<1x32xf32> to vector<8x32xf32>
    %327 = vector.extract_strided_slice %322 {offsets = [1, 0], sizes = [1, 32], strides = [1, 1]} : vector<8x32xf32> to vector<1x32xf32>
    %328 = vector.shape_cast %327 : vector<1x32xf32> to vector<1x32xf32>
    %329 = vector.broadcast %328 : vector<1x32xf32> to vector<8x32xf32>
    %330 = vector.extract_strided_slice %322 {offsets = [2, 0], sizes = [1, 32], strides = [1, 1]} : vector<8x32xf32> to vector<1x32xf32>
    %331 = vector.shape_cast %330 : vector<1x32xf32> to vector<1x32xf32>
    %332 = vector.broadcast %331 : vector<1x32xf32> to vector<8x32xf32>
    %333 = vector.extract_strided_slice %322 {offsets = [3, 0], sizes = [1, 32], strides = [1, 1]} : vector<8x32xf32> to vector<1x32xf32>
    %334 = vector.shape_cast %333 : vector<1x32xf32> to vector<1x32xf32>
    %335 = vector.broadcast %334 : vector<1x32xf32> to vector<8x32xf32>
    %336 = vector.extract_strided_slice %322 {offsets = [4, 0], sizes = [1, 32], strides = [1, 1]} : vector<8x32xf32> to vector<1x32xf32>
    %337 = vector.shape_cast %336 : vector<1x32xf32> to vector<1x32xf32>
    %338 = vector.broadcast %337 : vector<1x32xf32> to vector<8x32xf32>
    %339 = vector.extract_strided_slice %322 {offsets = [5, 0], sizes = [1, 32], strides = [1, 1]} : vector<8x32xf32> to vector<1x32xf32>
    %340 = vector.shape_cast %339 : vector<1x32xf32> to vector<1x32xf32>
    %341 = vector.broadcast %340 : vector<1x32xf32> to vector<8x32xf32>
    %342 = vector.extract_strided_slice %322 {offsets = [6, 0], sizes = [1, 32], strides = [1, 1]} : vector<8x32xf32> to vector<1x32xf32>
    %343 = vector.shape_cast %342 : vector<1x32xf32> to vector<1x32xf32>
    %344 = vector.broadcast %343 : vector<1x32xf32> to vector<8x32xf32>
    %345 = vector.extract_strided_slice %322 {offsets = [7, 0], sizes = [1, 32], strides = [1, 1]} : vector<8x32xf32> to vector<1x32xf32>
    %346 = vector.shape_cast %345 : vector<1x32xf32> to vector<1x32xf32>
    %347 = vector.broadcast %346 : vector<1x32xf32> to vector<8x32xf32>
    %348 = tpu.concatenate %326, %329, %332, %335, %338, %341, %344, %347 in 0 : vector<8x32xf32>, vector<8x32xf32>, vector<8x32xf32>, vector<8x32xf32>, vector<8x32xf32>, vector<8x32xf32>, vector<8x32xf32>, vector<8x32xf32> -> vector<64x32xf32>
    %349 = tpu.concatenate %323, %323, %323, %323, %323, %323, %323, %323 in 0 : vector<8x32xf32>, vector<8x32xf32>, vector<8x32xf32>, vector<8x32xf32>, vector<8x32xf32>, vector<8x32xf32>, vector<8x32xf32>, vector<8x32xf32> -> vector<64x32xf32>
    %350 = arith.addf %348, %349 : vector<64x32xf32>
    %351 = vector.broadcast %241 : vector<64x1xf32> to vector<64x32xf32>
    %352 = vector.broadcast %316 : vector<1x32xf32> to vector<64x32xf32>
    %353 = arith.mulf %351, %352 : vector<64x32xf32>
    %354 = arith.addf %350, %353 : vector<64x32xf32>
    %355 = vector.broadcast %317 : vector<1x32xf32> to vector<64x32xf32>
    %356 = arith.addf %354, %355 : vector<64x32xf32>
    %cst_87 = arith.constant 0.000000e+00 : f32
    %357 = vector.broadcast %cst_87 : f32 to vector<64x32xf32>
    %358 = arith.subf %357, %356 : vector<64x32xf32>
    %359 = math.exp %358 : vector<64x32xf32>
    %cst_88 = arith.constant 1.000000e+00 : f32
    %360 = vector.broadcast %cst_88 : f32 to vector<64x32xf32>
    %361 = arith.addf %360, %359 : vector<64x32xf32>
    %362 = tpu.reciprocal %361 {approx = true} : vector<64x32xf32> -> vector<64x32xf32>
    %363 = arith.mulf %356, %362 : vector<64x32xf32>
    %cst_89 = arith.constant dense<0.000000e+00> : vector<64x32xf32>
    %364 = tpu.matmul %363, %312, %cst_89 {dimension_numbers = #tpu.dot_dimension_numbers<[1], [0], [0], [1], [0, 0, 1, 1], [], []>} : vector<64x32xf32>, vector<32x32xf32>, vector<64x32xf32> -> vector<64x32xf32>
    %365 = vector.broadcast %318 : vector<1x32xf32> to vector<64x32xf32>
    %366 = arith.addf %364, %365 : vector<64x32xf32>
    %cst_90 = arith.constant 0.000000e+00 : f32
    %367 = vector.broadcast %cst_90 : f32 to vector<64x32xf32>
    %368 = arith.subf %367, %366 : vector<64x32xf32>
    %369 = math.exp %368 : vector<64x32xf32>
    %cst_91 = arith.constant 1.000000e+00 : f32
    %370 = vector.broadcast %cst_91 : f32 to vector<64x32xf32>
    %371 = arith.addf %370, %369 : vector<64x32xf32>
    %372 = tpu.reciprocal %371 {approx = true} : vector<64x32xf32> -> vector<64x32xf32>
    %373 = arith.mulf %366, %372 : vector<64x32xf32>
    %374 = vector.broadcast %319 : vector<1x32xf32> to vector<64x32xf32>
    %375 = arith.mulf %373, %374 : vector<64x32xf32>
    %cst_92 = arith.constant dense<0.000000e+00> : vector<64xf32>
    %376 = vector.multi_reduction <add>, %375, %cst_92 [1] : vector<64x32xf32> to vector<64xf32>
    %377 = vector.shape_cast %376 : vector<64xf32> to vector<64x1xf32>
    %cst_93 = arith.constant 0.000000e+00 : f32
    %378 = vector.broadcast %cst_93 : f32 to vector<64x1xf32>
    %379 = arith.subf %378, %377 : vector<64x1xf32>
    %380 = math.exp %379 : vector<64x1xf32>
    %cst_94 = arith.constant 1.000000e+00 : f32
    %381 = vector.broadcast %cst_94 : f32 to vector<64x1xf32>
    %382 = arith.addf %381, %380 : vector<64x1xf32>
    %383 = tpu.reciprocal %382 {approx = true} : vector<64x1xf32> -> vector<64x1xf32>
    %384 = arith.mulf %383, %3 : vector<64x1xf32>
    %385 = vector.broadcast %384 : vector<64x1xf32> to vector<64x32xf32>
    %386 = arith.mulf %373, %385 : vector<64x32xf32>
    %387 = vector.shape_cast %386 : vector<64x32xf32> to vector<8x8x32xf32>
    %cst_95 = arith.constant dense<0.000000e+00> : vector<8x32xf32>
    %388 = vector.multi_reduction <add>, %387, %cst_95 [1] : vector<8x8x32xf32> to vector<8x32xf32>
    %cst_96 = arith.constant dense<0.000000e+00> : vector<8x32xf32>
    %389 = tpu.matmul %203, %313, %cst_96 {dimension_numbers = #tpu.dot_dimension_numbers<[1], [0], [0], [1], [0, 0, 1, 1], [], []>} : vector<8x32xf32>, vector<32x32xf32>, vector<8x32xf32> -> vector<8x32xf32>
    %cst_97 = arith.constant dense<0.000000e+00> : vector<8x32xf32>
    %390 = tpu.matmul %388, %314, %cst_97 {dimension_numbers = #tpu.dot_dimension_numbers<[1], [0], [0], [1], [0, 0, 1, 1], [], []>} : vector<8x32xf32>, vector<32x32xf32>, vector<8x32xf32> -> vector<8x32xf32>
    %391 = arith.addf %389, %390 : vector<8x32xf32>
    %392 = vector.broadcast %320 : vector<1x32xf32> to vector<8x32xf32>
    %393 = arith.addf %391, %392 : vector<8x32xf32>
    %cst_98 = arith.constant 0.000000e+00 : f32
    %394 = vector.broadcast %cst_98 : f32 to vector<8x32xf32>
    %395 = arith.subf %394, %393 : vector<8x32xf32>
    %396 = math.exp %395 : vector<8x32xf32>
    %cst_99 = arith.constant 1.000000e+00 : f32
    %397 = vector.broadcast %cst_99 : f32 to vector<8x32xf32>
    %398 = arith.addf %397, %396 : vector<8x32xf32>
    %399 = tpu.reciprocal %398 {approx = true} : vector<8x32xf32> -> vector<8x32xf32>
    %400 = arith.mulf %393, %399 : vector<8x32xf32>
    %cst_100 = arith.constant dense<0.000000e+00> : vector<8x32xf32>
    %401 = tpu.matmul %400, %315, %cst_100 {dimension_numbers = #tpu.dot_dimension_numbers<[1], [0], [0], [1], [0, 0, 1, 1], [], []>} : vector<8x32xf32>, vector<32x32xf32>, vector<8x32xf32> -> vector<8x32xf32>
    %402 = vector.broadcast %321 : vector<1x32xf32> to vector<8x32xf32>
    %403 = arith.addf %401, %402 : vector<8x32xf32>
    %c576 = arith.constant 576 : index
    %c0_101 = arith.constant 0 : index
    %404 = vector.load %arg3[%c576, %c0_101] : memref<672x32xf32, #tpu.memory_space<vmem>>, vector<32x32xf32>
    %c608 = arith.constant 608 : index
    %c0_102 = arith.constant 0 : index
    %405 = vector.load %arg3[%c608, %c0_102] : memref<672x32xf32, #tpu.memory_space<vmem>>, vector<32x32xf32>
    %c640 = arith.constant 640 : index
    %c0_103 = arith.constant 0 : index
    %406 = vector.load %arg3[%c640, %c0_103] : memref<672x32xf32, #tpu.memory_space<vmem>>, vector<32x32xf32>
    %c20 = arith.constant 20 : index
    %c0_104 = arith.constant 0 : index
    %407 = vector.load %arg4[%c20, %c0_104] : memref<24x32xf32, #tpu.memory_space<vmem>>, vector<1x32xf32>
    %c21 = arith.constant 21 : index
    %c0_105 = arith.constant 0 : index
    %408 = vector.load %arg4[%c21, %c0_105] : memref<24x32xf32, #tpu.memory_space<vmem>>, vector<1x32xf32>
    %c22 = arith.constant 22 : index
    %c0_106 = arith.constant 0 : index
    %409 = vector.load %arg4[%c22, %c0_106] : memref<24x32xf32, #tpu.memory_space<vmem>>, vector<1x32xf32>
    %c23 = arith.constant 23 : index
    %c0_107 = arith.constant 0 : index
    %410 = vector.load %arg4[%c23, %c0_107] : memref<24x32xf32, #tpu.memory_space<vmem>>, vector<1x32xf32>
    %c2_108 = arith.constant 2 : index
    %411 = memref.load %arg6[%c2_108] : memref<3xf32, #tpu.memory_space<smem>>
    %412 = tpu.concatenate %309, %309, %309, %309, %309, %309, %309, %309 in 0 : vector<8x3xf32>, vector<8x3xf32>, vector<8x3xf32>, vector<8x3xf32>, vector<8x3xf32>, vector<8x3xf32>, vector<8x3xf32>, vector<8x3xf32> -> vector<64x3xf32>
    %413 = vector.extract_strided_slice %309 {offsets = [0, 0], sizes = [1, 3], strides = [1, 1]} : vector<8x3xf32> to vector<1x3xf32>
    %414 = vector.shape_cast %413 : vector<1x3xf32> to vector<1x3xf32>
    %415 = vector.broadcast %414 : vector<1x3xf32> to vector<8x3xf32>
    %416 = vector.extract_strided_slice %309 {offsets = [1, 0], sizes = [1, 3], strides = [1, 1]} : vector<8x3xf32> to vector<1x3xf32>
    %417 = vector.shape_cast %416 : vector<1x3xf32> to vector<1x3xf32>
    %418 = vector.broadcast %417 : vector<1x3xf32> to vector<8x3xf32>
    %419 = vector.extract_strided_slice %309 {offsets = [2, 0], sizes = [1, 3], strides = [1, 1]} : vector<8x3xf32> to vector<1x3xf32>
    %420 = vector.shape_cast %419 : vector<1x3xf32> to vector<1x3xf32>
    %421 = vector.broadcast %420 : vector<1x3xf32> to vector<8x3xf32>
    %422 = vector.extract_strided_slice %309 {offsets = [3, 0], sizes = [1, 3], strides = [1, 1]} : vector<8x3xf32> to vector<1x3xf32>
    %423 = vector.shape_cast %422 : vector<1x3xf32> to vector<1x3xf32>
    %424 = vector.broadcast %423 : vector<1x3xf32> to vector<8x3xf32>
    %425 = vector.extract_strided_slice %309 {offsets = [4, 0], sizes = [1, 3], strides = [1, 1]} : vector<8x3xf32> to vector<1x3xf32>
    %426 = vector.shape_cast %425 : vector<1x3xf32> to vector<1x3xf32>
    %427 = vector.broadcast %426 : vector<1x3xf32> to vector<8x3xf32>
    %428 = vector.extract_strided_slice %309 {offsets = [5, 0], sizes = [1, 3], strides = [1, 1]} : vector<8x3xf32> to vector<1x3xf32>
    %429 = vector.shape_cast %428 : vector<1x3xf32> to vector<1x3xf32>
    %430 = vector.broadcast %429 : vector<1x3xf32> to vector<8x3xf32>
    %431 = vector.extract_strided_slice %309 {offsets = [6, 0], sizes = [1, 3], strides = [1, 1]} : vector<8x3xf32> to vector<1x3xf32>
    %432 = vector.shape_cast %431 : vector<1x3xf32> to vector<1x3xf32>
    %433 = vector.broadcast %432 : vector<1x3xf32> to vector<8x3xf32>
    %434 = vector.extract_strided_slice %309 {offsets = [7, 0], sizes = [1, 3], strides = [1, 1]} : vector<8x3xf32> to vector<1x3xf32>
    %435 = vector.shape_cast %434 : vector<1x3xf32> to vector<1x3xf32>
    %436 = vector.broadcast %435 : vector<1x3xf32> to vector<8x3xf32>
    %437 = tpu.concatenate %415, %418, %421, %424, %427, %430, %433, %436 in 0 : vector<8x3xf32>, vector<8x3xf32>, vector<8x3xf32>, vector<8x3xf32>, vector<8x3xf32>, vector<8x3xf32>, vector<8x3xf32>, vector<8x3xf32> -> vector<64x3xf32>
    %438 = arith.subf %412, %437 : vector<64x3xf32>
    %439 = arith.mulf %438, %438 : vector<64x3xf32>
    %cst_109 = arith.constant dense<0.000000e+00> : vector<64xf32>
    %440 = vector.multi_reduction <add>, %439, %cst_109 [1] : vector<64x3xf32> to vector<64xf32>
    %441 = vector.shape_cast %440 : vector<64xf32> to vector<64x1xf32>
    %cst_110 = arith.constant dense<0.000000e+00> : vector<8x32xf32>
    %442 = tpu.matmul %403, %404, %cst_110 {dimension_numbers = #tpu.dot_dimension_numbers<[1], [0], [0], [1], [0, 0, 1, 1], [], []>} : vector<8x32xf32>, vector<32x32xf32>, vector<8x32xf32> -> vector<8x32xf32>
    %cst_111 = arith.constant dense<0.000000e+00> : vector<8x32xf32>
    %443 = tpu.matmul %403, %405, %cst_111 {dimension_numbers = #tpu.dot_dimension_numbers<[1], [0], [0], [1], [0, 0, 1, 1], [], []>} : vector<8x32xf32>, vector<32x32xf32>, vector<8x32xf32> -> vector<8x32xf32>
    %444 = vector.extract_strided_slice %442 {offsets = [0, 0], sizes = [1, 32], strides = [1, 1]} : vector<8x32xf32> to vector<1x32xf32>
    %445 = vector.shape_cast %444 : vector<1x32xf32> to vector<1x32xf32>
    %446 = vector.broadcast %445 : vector<1x32xf32> to vector<8x32xf32>
    %447 = vector.extract_strided_slice %442 {offsets = [1, 0], sizes = [1, 32], strides = [1, 1]} : vector<8x32xf32> to vector<1x32xf32>
    %448 = vector.shape_cast %447 : vector<1x32xf32> to vector<1x32xf32>
    %449 = vector.broadcast %448 : vector<1x32xf32> to vector<8x32xf32>
    %450 = vector.extract_strided_slice %442 {offsets = [2, 0], sizes = [1, 32], strides = [1, 1]} : vector<8x32xf32> to vector<1x32xf32>
    %451 = vector.shape_cast %450 : vector<1x32xf32> to vector<1x32xf32>
    %452 = vector.broadcast %451 : vector<1x32xf32> to vector<8x32xf32>
    %453 = vector.extract_strided_slice %442 {offsets = [3, 0], sizes = [1, 32], strides = [1, 1]} : vector<8x32xf32> to vector<1x32xf32>
    %454 = vector.shape_cast %453 : vector<1x32xf32> to vector<1x32xf32>
    %455 = vector.broadcast %454 : vector<1x32xf32> to vector<8x32xf32>
    %456 = vector.extract_strided_slice %442 {offsets = [4, 0], sizes = [1, 32], strides = [1, 1]} : vector<8x32xf32> to vector<1x32xf32>
    %457 = vector.shape_cast %456 : vector<1x32xf32> to vector<1x32xf32>
    %458 = vector.broadcast %457 : vector<1x32xf32> to vector<8x32xf32>
    %459 = vector.extract_strided_slice %442 {offsets = [5, 0], sizes = [1, 32], strides = [1, 1]} : vector<8x32xf32> to vector<1x32xf32>
    %460 = vector.shape_cast %459 : vector<1x32xf32> to vector<1x32xf32>
    %461 = vector.broadcast %460 : vector<1x32xf32> to vector<8x32xf32>
    %462 = vector.extract_strided_slice %442 {offsets = [6, 0], sizes = [1, 32], strides = [1, 1]} : vector<8x32xf32> to vector<1x32xf32>
    %463 = vector.shape_cast %462 : vector<1x32xf32> to vector<1x32xf32>
    %464 = vector.broadcast %463 : vector<1x32xf32> to vector<8x32xf32>
    %465 = vector.extract_strided_slice %442 {offsets = [7, 0], sizes = [1, 32], strides = [1, 1]} : vector<8x32xf32> to vector<1x32xf32>
    %466 = vector.shape_cast %465 : vector<1x32xf32> to vector<1x32xf32>
    %467 = vector.broadcast %466 : vector<1x32xf32> to vector<8x32xf32>
    %468 = tpu.concatenate %446, %449, %452, %455, %458, %461, %464, %467 in 0 : vector<8x32xf32>, vector<8x32xf32>, vector<8x32xf32>, vector<8x32xf32>, vector<8x32xf32>, vector<8x32xf32>, vector<8x32xf32>, vector<8x32xf32> -> vector<64x32xf32>
    %469 = tpu.concatenate %443, %443, %443, %443, %443, %443, %443, %443 in 0 : vector<8x32xf32>, vector<8x32xf32>, vector<8x32xf32>, vector<8x32xf32>, vector<8x32xf32>, vector<8x32xf32>, vector<8x32xf32>, vector<8x32xf32> -> vector<64x32xf32>
    %470 = arith.addf %468, %469 : vector<64x32xf32>
    %471 = vector.broadcast %441 : vector<64x1xf32> to vector<64x32xf32>
    %472 = vector.broadcast %407 : vector<1x32xf32> to vector<64x32xf32>
    %473 = arith.mulf %471, %472 : vector<64x32xf32>
    %474 = arith.addf %470, %473 : vector<64x32xf32>
    %475 = vector.broadcast %408 : vector<1x32xf32> to vector<64x32xf32>
    %476 = arith.addf %474, %475 : vector<64x32xf32>
    %cst_112 = arith.constant 0.000000e+00 : f32
    %477 = vector.broadcast %cst_112 : f32 to vector<64x32xf32>
    %478 = arith.subf %477, %476 : vector<64x32xf32>
    %479 = math.exp %478 : vector<64x32xf32>
    %cst_113 = arith.constant 1.000000e+00 : f32
    %480 = vector.broadcast %cst_113 : f32 to vector<64x32xf32>
    %481 = arith.addf %480, %479 : vector<64x32xf32>
    %482 = tpu.reciprocal %481 {approx = true} : vector<64x32xf32> -> vector<64x32xf32>
    %483 = arith.mulf %476, %482 : vector<64x32xf32>
    %cst_114 = arith.constant dense<0.000000e+00> : vector<64x32xf32>
    %484 = tpu.matmul %483, %406, %cst_114 {dimension_numbers = #tpu.dot_dimension_numbers<[1], [0], [0], [1], [0, 0, 1, 1], [], []>} : vector<64x32xf32>, vector<32x32xf32>, vector<64x32xf32> -> vector<64x32xf32>
    %485 = vector.broadcast %409 : vector<1x32xf32> to vector<64x32xf32>
    %486 = arith.addf %484, %485 : vector<64x32xf32>
    %cst_115 = arith.constant 0.000000e+00 : f32
    %487 = vector.broadcast %cst_115 : f32 to vector<64x32xf32>
    %488 = arith.subf %487, %486 : vector<64x32xf32>
    %489 = math.exp %488 : vector<64x32xf32>
    %cst_116 = arith.constant 1.000000e+00 : f32
    %490 = vector.broadcast %cst_116 : f32 to vector<64x32xf32>
    %491 = arith.addf %490, %489 : vector<64x32xf32>
    %492 = tpu.reciprocal %491 {approx = true} : vector<64x32xf32> -> vector<64x32xf32>
    %493 = arith.mulf %486, %492 : vector<64x32xf32>
    %494 = vector.broadcast %410 : vector<1x32xf32> to vector<64x32xf32>
    %495 = arith.mulf %493, %494 : vector<64x32xf32>
    %cst_117 = arith.constant dense<0.000000e+00> : vector<64xf32>
    %496 = vector.multi_reduction <add>, %495, %cst_117 [1] : vector<64x32xf32> to vector<64xf32>
    %497 = vector.shape_cast %496 : vector<64xf32> to vector<64x1xf32>
    %498 = vector.broadcast %411 : f32 to vector<64x1xf32>
    %499 = arith.addf %497, %498 : vector<64x1xf32>
    %500 = math.sqrt %441 : vector<64x1xf32>
    %cst_118 = arith.constant 1.000000e+00 : f32
    %501 = vector.broadcast %cst_118 : f32 to vector<64x1xf32>
    %502 = arith.addf %500, %501 : vector<64x1xf32>
    %503 = tpu.reciprocal %502 {approx = true} : vector<64x1xf32> -> vector<64x1xf32>
    %504 = arith.mulf %499, %503 : vector<64x1xf32>
    %505 = vector.broadcast %504 : vector<64x1xf32> to vector<64x3xf32>
    %506 = arith.mulf %438, %505 : vector<64x3xf32>
    %507 = vector.shape_cast %506 : vector<64x3xf32> to vector<8x8x3xf32>
    %cst_119 = arith.constant dense<0.000000e+00> : vector<8x3xf32>
    %508 = vector.multi_reduction <add>, %507, %cst_119 [1] : vector<8x8x3xf32> to vector<8x3xf32>
    %509 = arith.addf %309, %508 : vector<8x3xf32>
    %510 = arith.cmpf one, %509, %509 : vector<8x3xf32>
    %cst_120 = arith.constant 1.000000e+00 : f32
    %cst_121 = arith.constant 0.000000e+00 : f32
    %511 = vector.broadcast %cst_120 : f32 to vector<8x3xf32>
    %512 = vector.broadcast %cst_121 : f32 to vector<8x3xf32>
    %513 = arith.select %510, %511, %512 : vector<8x3xi1>, vector<8x3xf32>
    %cst_122 = arith.constant dense<0xFF800000> : vector<8xf32>
    %514 = vector.multi_reduction <maximumf>, %513, %cst_122 [1] : vector<8x3xf32> to vector<8xf32>
    %515 = vector.shape_cast %514 : vector<8xf32> to vector<8x1xf32>
    %cst_123 = arith.constant dense<0xFF800000> : vector<1xf32>
    %516 = vector.multi_reduction <maximumf>, %515, %cst_123 [0] : vector<8x1xf32> to vector<1xf32>
    %517 = vector.shape_cast %516 : vector<1xf32> to vector<1x1xf32>
    %cst_124 = arith.constant 0.000000e+00 : f32
    %518 = vector.broadcast %cst_124 : f32 to vector<1x1xf32>
    %519 = arith.cmpf ogt, %517, %518 : vector<1x1xf32>
    %cst_125 = arith.constant 0.000000e+00 : f32
    %520 = vector.broadcast %cst_125 : f32 to vector<8x3xf32>
    %521 = vector.shape_cast %519 : vector<1x1xi1> to vector<1x1xi1>
    %522 = vector.broadcast %521 : vector<1x1xi1> to vector<8x3xi1>
    %523 = arith.select %522, %520, %509 : vector<8x3xi1>, vector<8x3xf32>
    %c0_126 = arith.constant 0 : index
    %c0_127 = arith.constant 0 : index
    %c0_128 = arith.constant 0 : index
    %524 = vector.load %arg7[%c0_126, %c0_127, %c0_128] : memref<1x8x3xf32, #tpu.memory_space<vmem>>, vector<1x8x3xf32>
    %525 = vector.shape_cast %524 : vector<1x8x3xf32> to vector<8x3xf32>
    %526 = vector.shape_cast %523 : vector<8x3xf32> to vector<1x8x3xf32>
    tpu.vector_store %arg7[%c0_126, %c0_127, %c0_128], %526 {strides = array<i32>} : memref<1x8x3xf32, #tpu.memory_space<vmem>>, vector<1x8x3xf32>,
    return
  }
  func.func @transform_0(%arg0: i32) -> (i32, i32, i32) {
    %c0_i32 = arith.constant 0 : i32
    %c0_i32_0 = arith.constant 0 : i32
    %c0_i32_1 = arith.constant 0 : i32
    return %arg0, %c0_i32, %c0_i32_0 : i32, i32, i32
  }
  func.func @transform_1(%arg0: i32) -> (i32, i32) {
    %c0_i32 = arith.constant 0 : i32
    %c0_i32_0 = arith.constant 0 : i32
    %c0_i32_1 = arith.constant 0 : i32
    return %c0_i32, %c0_i32_0 : i32, i32
  }
  func.func @transform_2(%arg0: i32) -> (i32, i32) {
    %c0_i32 = arith.constant 0 : i32
    %c0_i32_0 = arith.constant 0 : i32
    %c0_i32_1 = arith.constant 0 : i32
    return %c0_i32, %c0_i32_0 : i32, i32
  }
  func.func @transform_3(%arg0: i32) -> (i32, i32) {
    %c0_i32 = arith.constant 0 : i32
    %c0_i32_0 = arith.constant 0 : i32
    %c0_i32_1 = arith.constant 0 : i32
    return %c0_i32, %c0_i32_0 : i32, i32
  }
  func.func @transform_4(%arg0: i32) -> (i32, i32) {
    %c0_i32 = arith.constant 0 : i32
    %c0_i32_0 = arith.constant 0 : i32
    %c0_i32_1 = arith.constant 0 : i32
    return %c0_i32, %c0_i32_0 : i32, i32
  }
  func.func @transform_5(%arg0: i32) -> i32 {
    %c0_i32 = arith.constant 0 : i32
    %c0_i32_0 = arith.constant 0 : i32
    return %c0_i32 : i32
  }
  func.func @transform_6(%arg0: i32) -> (i32, i32, i32) {
    %c0_i32 = arith.constant 0 : i32
    %c0_i32_0 = arith.constant 0 : i32
    %c0_i32_1 = arith.constant 0 : i32
    return %arg0, %c0_i32, %c0_i32_0 : i32, i32, i32
  }
}

</mosaic_0001>

<bundles_post_ra>
// kernel: _lambda_.1
= control target key start
LH: loop header
LB: loop body
LE: loop exit
PB: predicated region body
PF: predicated region fallthrough
CT: control target
= control target key end

     0   :  { %11 = vsyncpa [#allocation3], 0  ;;  %s3810_s21 = smov 0   ;;  %s5408_s0 = inlined_call_operand.vmem [shape: f32[4,8,3], index: 0, kind: input, shape index: {}]   ;;  %s5409_s1 = inlined_call_operand.vmem [shape: f32[8,32], index: 1, kind: input, shape index: {}]   ;;  %s5410_s2 = inlined_call_operand.vmem [shape: f32[672,32], index: 2, kind: input, shape index: {}]   ;;  %s5411_s3 = inlined_call_operand.vmem [shape: f32[24,32], index: 3, kind: input, shape index: {}]   ;;  %s5412_s4 = inlined_call_operand.vmem [shape: f32[64,1], index: 4, kind: input, shape index: {}]   ;;  %s5413_s5 = inlined_call_operand.vmem [shape: f32[3], index: 5, kind: input, shape index: {}]   ;;  %s5414_s6 = inlined_call_operand.vmem [shape: f32[4,8,3], index: 6, kind: output, shape index: {}]  }
   0x1 LB: > { %s3122_s22 = sadd.s32 4294967295, %s3770_s21   ;;  %p3124_p0 = scmp.ge.s32.totalorder %s3770_s21, 1  ;;  %s3770_s21 = sphi %s3810_s21, %s17_s21  }
   0x2   : > { %p179_p1 = scmp.lt.s32.totalorder %s3770_s21, 5  ;;  %s203_s25 = sshll.u32 %s5413_s5, 4  ;;  %s204_s25 = int_to_ptr.vmem [resolvable:$true] %s203_s25 }
   0x3   : > { %p3207_p3 = scmp.eq.s32.totalorder %s3122_s22, 0  ;;  %s3772_s26 = smov [#allocation2]  }
   0x4   : > { %p180_p2 = pnand %p3124_p0, %p179_p1 }
   0x6   : > { %p3203_p4 = pneg %p180_p2  ;;  %223 = sbr.rel (%p180_p2) target bundleno = 2687 (0xa7f), region = 44 }
   0x8   : > { %p3204_p5 = pnand %p3207_p3, %p3203_p4 }
   0xa   : > { %3206 = dma.vmem_to_smem (!%p3204_p5), %s204_s25, 16, %s3772_s26, [#allocation3]  }
   0xb   : > { %3765 = dma.done.wait (%p3207_p3), [#allocation3], 16  }
   0xc   : > { %3767 = vsyncadd (%p3207_p3), [#allocation3], 4294967280 }
   0xd   : > { %230 = sfence }
   0xe   : > { %v274_v0 = vld [vmem:[%s5410_s2 + $0x18] sm:$0xff]  ;;  %v273_v1 = vld [vmem:[%s5410_s2 + $0x10] sm:$0xff]  ;;  %p253_p6 = scmp.lt.s32.totalorder %s3122_s22, 3  ;;  %v272_v4 = vld [vmem:[%s5410_s2 + $0x8] sm:$0xff]  ;;  %vm337_vm0 = vcmask 261120   ;;  %vm312_vm1 = vcmask 23552  }
   0xf   : > { %v278_v2 = vld [vmem:[%s5410_s2 + $0x38] sm:$0xff]  ;;  %353 = vmatpush.msra.mxu0 %v274_v0  ;;  %v277_v3 = vld [vmem:[%s5410_s2 + $0x30] sm:$0xff]  ;;  %v271_v5 = vld [vmem:[%s5410_s2] sm:$0xff]  ;;  %vm819_vm2 = vcmask 1041409   ;;  %vm821_vm3 = vcmask 1042434   ;;  %vm823_vm4 = vcmask 1043459  }
  0x10   : > { %373 = vmatpush.msra.mxu1 %v278_v2  ;;  %v276_v6 = vld [vmem:[%s5410_s2 + $0x28] sm:$0xff]  ;;  %s5416_s22 = smov (!%p253_p6, %s3122_s22), 3  ;;  %v3847_v7 = vld [vmem:[%s5409_s1] sm:$0xff]  ;;  %v282_v42 = vld [vmem:[%s5410_s2 + $0x58] sm:$0xff]  ;;  %vm825_vm5 = vcmask 1044484   ;;  %vm827_vm6 = vcmask 1045509  }
  0x11   : > { %354 = vmatpush.msra.mxu0 %v273_v1  ;;  %v275_v8 = vld [vmem:[%s5410_s2 + $0x20] sm:$0xff]  ;;  %s3129_s23 = sshll.u32 %s5416_s22, 3  ;;  %v281_v43 = vld [vmem:[%s5410_s2 + $0x50] sm:$0xff]  ;;  %3191 = vmatpush.msra.mxu2 %v282_v42  ;;  %v280_v44 = vld [vmem:[%s5410_s2 + $0x48] sm:$0xff]  ;;  %vm829_vm7 = vcmask 1046534   ;;  %vm831_vm8 = vcmask 1047559  }
  0x12   : > { %374 = vmatpush.msra.mxu1 %v277_v3  ;;  %s3858_s26 = scalar_lea.vmem %s5408_s0, %s3129_s23  ;;  %v279_v45 = vld [vmem:[%s5410_s2 + $0x40] sm:$0xff]  ;;  %v842_v57 = vld [vmem:[%s5410_s2 + $0x98] sm:$0xff]  ;;  %v837_v59 = vld [vmem:[%s5410_s2 + $0x70] sm:$0xff]  ;;  %s287_s29 = sld [smem:[#allocation2]] }
  0x13   : > { %355 = vmatpush.msra.mxu0 %v272_v4  ;;  %v261_v9 = vld [vmem:[%s3858_s26] sm:$0xff]  ;;  %3192 = vmatpush.msra.mxu2 %v281_v43  ;;  %v838_v58 = vld [vmem:[%s5410_s2 + $0x78] sm:$0xff]  ;;  %v841_v1 = vld [vmem:[%s5410_s2 + $0x90] sm:$0xff]  ;;  %s3154_s8 = sld [smem:[#allocation2 + $0x1]]  ;;  %s260_s14 = scalar_lea.vmem %s5414_s6, %s3129_s23 }
  0x14   : > { %375 = vmatpush.msra.mxu1 %v276_v6  ;;  %v292_v10 = vperm.slane %v261_v9, 4  ;;  %v290_v11 = vperm.slane %v261_v9, 2  ;;  %v288_v12 = vperm.slane %v261_v9, 0  ;;  %v293_v13 = vperm.slane %v261_v9, 5  ;;  %v3922_v47 = vld [vmem:[%s5411_s3] ss:$0 sm:$0xff]  ;;  %877 = vmatpush.msra.mxu3 %v838_v58 }
  0x15   : > { %356 = vmatpush.msra.mxu0 %v271_v5  ;;  %v291_v14 = vperm.slane %v261_v9, 3  ;;  %v289_v15 = vperm.slane %v261_v9, 1  ;;  %v295_v30 = vperm.slane %v261_v9, 7  ;;  %v294_v32 = vperm.slane %v261_v9, 6  ;;  %3193 = vmatpush.msra.mxu2 %v280_v44  ;;  %v3954_v63 = vld [vmem:[%s5411_s3 + $0x1] ss:$0 sm:$0xff] }
  0x16   : > { %376 = vmatpush.msra.mxu1 %v275_v8  ;;  %3131 = vmatmul.msk.f32.vlgmr.msra.gmra.mxu0 %vm337_vm0, %v3847_v7  ;;  %v3865_v16 = vsub.f32 %v261_v9, %v292_v10  ;;  %v3867_v17 = vsub.f32 %v261_v9, %v290_v11  ;;  %v3869_v18 = vsub.f32 %v261_v9, %v288_v12  ;;  %v836_v3 = vld [vmem:[%s5410_s2 + $0x68] sm:$0xff]  ;;  %v835_v10 = vld [vmem:[%s5410_s2 + $0x60] sm:$0xff]  ;;  %s3178_s11 = sld [smem:[#allocation2 + $0x2]] }
  0x17   : > { %3132 = vmatmul.msk.f32.vlgmr.msra.gmra.mxu1 %vm337_vm0, %v3847_v7  ;;  %v3871_v19 = vsub.f32 %v261_v9, %v293_v13  ;;  %v3879_v23 = vsub.f32 %v261_v9, %v291_v14  ;;  %v3881_v24 = vsub.f32 %v261_v9, %v289_v15  ;;  %v3894_v35 = vsub.f32 %v261_v9, %v295_v30  ;;  %v839_v30 = vld [vmem:[%s5410_s2 + $0x80] sm:$0xff] }
  0x18   : > { %v308_v20 = vmul.f32 %v3865_v16, %v3865_v16  ;;  %v306_v21 = vmul.f32 %v3867_v17, %v3867_v17  ;;  %v304_v22 = vmul.f32 %v3869_v18, %v3869_v18  ;;  %v3897_v37 = vsub.f32 %v261_v9, %v294_v32  ;;  %508 = vmatpush.msrb.mxu0 %v282_v42 }
  0x19   : > { %v309_v28 = vmul.f32 %v3871_v19, %v3871_v19  ;;  %v307_v29 = vmul.f32 %v3879_v23, %v3879_v23  ;;  %v305_v31 = vmul.f32 %v3881_v24, %v3881_v24  ;;  %v311_v38 = vmul.f32 %v3894_v35, %v3894_v35  ;;  %3194 = vmatpush.msra.mxu2 %v279_v45 }
  0x1a   : > { %v325_v25 = vsel %vm312_vm1, %v308_v20, 0.0  ;;  %v319_v26 = vsel %vm312_vm1, %v306_v21, 0.0  ;;  %v313_v27 = vsel %vm312_vm1, %v304_v22, 0.0  ;;  %v310_v39 = vmul.f32 %v3897_v37, %v3897_v37  ;;  %509 = vmatpush.msrb.mxu0 %v281_v43  ;;  %878 = vmatpush.msra.mxu3 %v837_v59 }
  0x1b   : > { %326 = vadd.xlane.f32.xlu2 %v325_v25  ;;  %320 = vadd.xlane.f32.xlu1 %v319_v26  ;;  %v328_v33 = vsel %vm312_vm1, %v309_v28, 0.0  ;;  %v322_v34 = vsel %vm312_vm1, %v307_v29, 0.0  ;;  %v316_v36 = vsel %vm312_vm1, %v305_v31, 0.0  ;;  %v334_v40 = vsel %vm312_vm1, %v311_v38, 0.0  ;;  %v840_v29 = vld [vmem:[%s5410_s2 + $0x88] sm:$0xff] }
  0x1c   : > { %314 = vadd.xlane.f32.xlu0 %v313_v27  ;;  %v331_v41 = vsel %vm312_vm1, %v310_v39, 0.0  ;;  %510 = vmatpush.msrb.mxu0 %v280_v44 }
  0x1d   : > { %879 = vmatpush.msra.mxu3 %v836_v3 }
  0x1e   : > { %511 = vmatpush.msrb.mxu0 %v279_v45 }
  0x1f   : > { %880 = vmatpush.msra.mxu3 %v835_v10 }
  0x20   : > { %897 = vmatpush.msra.mxu0 %v842_v57  ;;  %3141 = vmatmul.msk.f32.vlgmr.msra.gmra.mxu3 %vm337_vm0, %v3847_v7 }
  0x22   : > { %898 = vmatpush.msra.mxu0 %v841_v1 }
  0x23   : > { %329 = vadd.xlane.f32.xlu2 %v328_v33  ;;  %323 = vadd.xlane.f32.xlu1 %v322_v34 }
  0x24   : > { %317 = vadd.xlane.f32.xlu0 %v316_v36  ;;  %899 = vmatpush.msra.mxu0 %v840_v29 }
  0x26   : > { %900 = vmatpush.msra.mxu0 %v839_v30 }
  0x2b   : > { %335 = vadd.xlane.f32.xlu1 %v334_v40 }
  0x2c   : > { %332 = vadd.xlane.f32.xlu0 %v331_v41 }
  0x8e   : > { %v3917_v46 = vpop.xlane.xlu1 %320  ;;  %v3932_v52 = vpop.xlane.xlu2 %326 }
  0x8f   : > { %v3924_v48 = vpop.xlane.xlu0 %314  ;;  %v400_v51 = vmul.f32 %v3922_v47, %v3917_v46  ;;  %v402_v14 = vmul.f32 %v3922_v47, %v3932_v52  ;;  %vm658_vm15 = vcmp.eq.f32.partialorder %v3917_v46, inf }
  0x90   : > { %v398_v54 = vmul.f32 %v3922_v47, %v3924_v48  ;;  %vm634_vm11 = vcmp.eq.f32.partialorder %v3924_v48, inf  ;;  %vm636_vm13 = vcmp.eq.f32.partialorder %v3924_v48, 0.0 }
  0x93   : > { %v3926_v49 = vpop.f32.mrf.mxu0 }
  0x94   : > { %v3928_v50 = vpop.f32.mrf.mxu1  ;;  %v381_v53 = vperm.slane %v3926_v49, 0  ;;  %v383_v55 = vperm.slane %v3926_v49, 2  ;;  %v384_v56 = vperm.slane %v3926_v49, 3  ;;  %v382_v60 = vperm.slane %v3926_v49, 1 }
  0x95   : > { %v385_v61 = vperm.slane %v3926_v49, 4  ;;  %v386_v39 = vperm.slane %v3926_v49, 5  ;;  %v388_v10 = vperm.slane %v3926_v49, 7 }
  0x96   : > { %v389_v62 = vadd.f32 %v381_v53, %v3928_v50  ;;  %v391_v0 = vadd.f32 %v383_v55, %v3928_v50  ;;  %v3960_v2 = vpop.xlane.xlu1 %323  ;;  %v392_v4 = vadd.f32 %v384_v56, %v3928_v50  ;;  %v390_v11 = vadd.f32 %v382_v60, %v3928_v50  ;;  %v3995_v32 = vpop.xlane.xlu2 %329 }
  0x97   : > { %v3966_v5 = vpop.xlane.xlu0 %317  ;;  %v401_v9 = vmul.f32 %v3922_v47, %v3960_v2  ;;  %v393_v13 = vadd.f32 %v385_v61, %v3928_v50  ;;  %v403_v43 = vmul.f32 %v3922_v47, %v3995_v32  ;;  %v394_v44 = vadd.f32 %v386_v39, %v3928_v50  ;;  %v846_v39 = vld [vmem:[%s5410_s2 + $0xb8] sm:$0xff] }
  0x98   : > { %v406_v6 = vadd.f32 %v398_v54, %v389_v62  ;;  %v408_v8 = vadd.f32 %v400_v51, %v391_v0  ;;  %v399_v12 = vmul.f32 %v3922_v47, %v3966_v5  ;;  %v387_v54 = vperm.slane %v3926_v49, 6  ;;  %3195 = vmatpush.msrb.mxu2 %v846_v39  ;;  %1032 = vmatpush.msrb.mxu1 %v846_v39 }
  0x99   : > { %v409_v21 = vadd.f32 %v401_v9, %v392_v4  ;;  %v410_v31 = vadd.f32 %v402_v14, %v393_v13  ;;  %v411_v51 = vadd.f32 %v403_v43, %v394_v44  ;;  %v396_v29 = vadd.f32 %v388_v10, %v3928_v50 }
  0x9a   : > { %v415_v15 = vadd.f32 %v3954_v63, %v406_v6  ;;  %v417_v20 = vadd.f32 %v3954_v63, %v408_v8  ;;  %v407_v22 = vadd.f32 %v399_v12, %v390_v11  ;;  %v395_v1 = vadd.f32 %v387_v54, %v3928_v50 }
  0x9b   : > { %v3982_v27 = vadd.f32 %v3954_v63, %v409_v21  ;;  %v4001_v42 = vadd.f32 %v3954_v63, %v410_v31  ;;  %v420_v59 = vadd.f32 %v3954_v63, %v411_v51  ;;  %vm646_vm9 = vcmp.eq.f32.partialorder %v3966_v5, inf }
  0x9c   : > { %v423_v25 = vsub.f32 0.0, %v415_v15  ;;  %v425_v26 = vsub.f32 0.0, %v417_v20  ;;  %v3985_v28 = vadd.f32 %v3954_v63, %v407_v22  ;;  %vm648_vm10 = vcmp.eq.f32.partialorder %v3966_v5, 0.0 }
  0x9d   : > { %v426_v34 = vsub.f32 0.0, %v3982_v27  ;;  %v427_v45 = vsub.f32 0.0, %v4001_v42  ;;  %v428_v4 = vsub.f32 0.0, %v420_v59  ;;  %vm694_vm12 = vcmp.eq.f32.partialorder %v3995_v32, inf }
  0x9e   : > { %v431_v33 = vmul.f32 1.442695, %v423_v25  ;;  %v435_v36 = vmul.f32 1.442695, %v425_v26  ;;  %v424_v38 = vsub.f32 0.0, %v3985_v28  ;;  %v4014_v8 = vpop.xlane.xlu1 %335  ;;  %vm696_vm14 = vcmp.eq.f32.partialorder %v3995_v32, 0.0 }
  0x9f   : > { %v437_v41 = vmul.f32 1.442695, %v426_v34  ;;  %v4007_v53 = vpop.xlane.xlu0 %332  ;;  %v439_v58 = vmul.f32 1.442695, %v427_v45  ;;  %v441_v12 = vmul.f32 1.442695, %v428_v4  ;;  %v405_v14 = vmul.f32 %v3922_v47, %v4014_v8 }
  0xa0   : > { %v433_v40 = vmul.f32 1.442695, %v424_v38  ;;  %3247 = vpow2.f32 %v431_v33  ;;  %v404_v60 = vmul.f32 %v3922_v47, %v4007_v53 }
  0xa1   : > { %3249 = vpow2.f32 %v435_v36  ;;  %v413_v30 = vadd.f32 %v405_v14, %v396_v29 }
  0xa2   : > { %3251 = vpow2.f32 %v433_v40  ;;  %v412_v6 = vadd.f32 %v404_v60, %v395_v1 }
  0xa3   : > { %3253 = vpow2.f32 %v437_v41  ;;  %v422_v47 = vadd.f32 %v3954_v63, %v413_v30 }
  0xa4   : > { %v421_v13 = vadd.f32 %v3954_v63, %v412_v6 }
  0xa5   : > { %v430_v50 = vsub.f32 0.0, %v422_v47 }
  0xa6   : > { %v3248_v55 = vpop.eup %3247  ;;  %v429_v49 = vsub.f32 0.0, %v421_v13 }
  0xa7   : > { %v3250_v56 = vpop.eup %3249  ;;  %v447_v57 = vadd.f32 1.0, %v3248_v55  ;;  %v445_v41 = vmul.f32 1.442695, %v430_v50 }
  0xa8   : > { %v3252_v61 = vpop.eup %3251  ;;  %v449_v62 = vadd.f32 1.0, %v3250_v56  ;;  %v443_v36 = vmul.f32 1.442695, %v429_v49 }
  0xa9   : > { %v3254_v0 = vpop.eup %3253  ;;  %3255 = vrcp.f32 %v447_v57  ;;  %v448_v3 = vadd.f32 1.0, %v3252_v61  ;;  %v4048_v61 = vpop.f32.mrf.mxu3 }
  0xaa   : > { %3257 = vrcp.f32 %v449_v62  ;;  %v450_v9 = vadd.f32 1.0, %v3254_v0  ;;  %v4053_v62 = vld [vmem:[%s5411_s3 + $0x4] ss:$0 sm:$0xff]  ;;  %v905_v0 = vperm.slane %v4048_v61, 0  ;;  %v908_v1 = vperm.slane %v4048_v61, 3 }
  0xab   : > { %3259 = vpow2.f32 %v439_v58  ;;  %v909_v4 = vperm.slane %v4048_v61, 4  ;;  %v907_v6 = vperm.slane %v4048_v61, 2  ;;  %v923_v14 = vmul.f32 %v4053_v62, %v3966_v5 }
  0xac   : > { %3261 = vrcp.f32 %v448_v3  ;;  %v906_v3 = vperm.slane %v4048_v61, 1  ;;  %v926_v30 = vmul.f32 %v4053_v62, %v3932_v52 }
  0xad   : > { %3263 = vrcp.f32 %v450_v9  ;;  %v910_v9 = vperm.slane %v4048_v61, 5 }
  0xae   : > { %3265 = vpow2.f32 %v441_v12  ;;  %v922_v12 = vmul.f32 %v4053_v62, %v3924_v48 }
  0xaf   : > { %v3256_v11 = vpop.eup %3255 }
  0xb0   : > { %v3258_v21 = vpop.eup %3257  ;;  %v463_v22 = vmul.f32 %v3256_v11, %v415_v15  ;;  %v843_v11 = vld [vmem:[%s5410_s2 + $0xa0] sm:$0xff] }
  0xb1   : > { %v3260_v25 = vpop.eup %3259  ;;  %v465_v26 = vmul.f32 %v3258_v21, %v417_v20  ;;  %v924_v21 = vmul.f32 %v4053_v62, %v3917_v46 }
  0xb2   : > { %3133 = vmatmul.msk.f32.vlgmr.msrb.gmra.mxu0 %vm337_vm0, %v463_v22  ;;  %v451_v31 = vadd.f32 1.0, %v3260_v25  ;;  %v3262_v33 = vpop.eup %3261  ;;  %v3227_v25 = vld [vmem:[%s5411_s3 + $0x5] ss:$0 sm:$0xff] }
  0xb3   : > { %3135 = vmatmul.msk.f32.vlgmr.msra.gmra.mxu2 %vm337_vm0, %v465_v26  ;;  %v3264_v34 = vpop.eup %3263  ;;  %v464_v15 = vmul.f32 %v3262_v33, %v3985_v28 }
  0xb4   : > { %3267 = vrcp.f32 %v451_v31  ;;  %v3266_v38 = vpop.eup %3265  ;;  %v466_v20 = vmul.f32 %v3264_v34, %v3982_v27 }
  0xb5   : > { %3269 = vpow2.f32 %v443_v36  ;;  %v452_v40 = vadd.f32 1.0, %v3266_v38 }
  0xb7   : > { %3271 = vrcp.f32 %v452_v40 }
  0xb8   : > { %3273 = vpow2.f32 %v445_v41 }
  0xba   : > { %3134 = vmatmul.msk.f32.gmra.mxu0 %vm337_vm0, %v464_v15  ;;  %v3268_v63 = vpop.eup %3267 }
  0xbb   : > { %3136 = vmatmul.msk.f32.gmra.mxu2 %vm337_vm0, %v466_v20  ;;  %v3270_v28 = vpop.eup %3269  ;;  %v467_v43 = vmul.f32 %v3268_v63, %v4001_v42  ;;  %v927_v20 = vmul.f32 %v4053_v62, %v3995_v32 }
  0xbc   : > { %v453_v27 = vadd.f32 1.0, %v3270_v28  ;;  %v911_v28 = vperm.slane %v4048_v61, 6 }
  0xbd   : > { %v3272_v44 = vpop.eup %3271 }
  0xbe   : > { %3275 = vrcp.f32 %v453_v27  ;;  %v3274_v45 = vpop.eup %3273  ;;  %v468_v51 = vmul.f32 %v3272_v44, %v420_v59  ;;  %v844_v59 = vld [vmem:[%s5410_s2 + $0xa8] sm:$0xff] }
  0xbf   : > { %v454_v54 = vadd.f32 1.0, %v3274_v45 }
  0xc1   : > { %3277 = vrcp.f32 %v454_v54 }
  0xc2   : > { %3142 = vmatmul.msk.f32.vlgmr.msra.gmra.mxu0 %vm337_vm0, %v3847_v7  ;;  %v845_v7 = vld [vmem:[%s5410_s2 + $0xb0] sm:$0xff] }
  0xc3   : > { %3137 = vmatmul.msk.f32.gmra.mxu2 %vm337_vm0, %v467_v43  ;;  %1033 = vmatpush.msrb.mxu1 %v845_v7 }
  0xc4   : > { %v3276_v55 = vpop.eup %3275  ;;  %3196 = vmatpush.msrb.mxu2 %v845_v7 }
  0xc5   : > { %v469_v56 = vmul.f32 %v3276_v55, %v421_v13  ;;  %1034 = vmatpush.msrb.mxu1 %v844_v59  ;;  %v925_v13 = vmul.f32 %v4053_v62, %v3960_v2 }
  0xc6   : > { %3197 = vmatpush.msrb.mxu2 %v844_v59 }
  0xc7   : > { %v3278_v42 = vpop.eup %3277  ;;  %1035 = vmatpush.msrb.mxu1 %v843_v11 }
  0xc8   : > { %v470_v57 = vmul.f32 %v3278_v42, %v422_v47  ;;  %3198 = vmatpush.msrb.mxu2 %v843_v11 }
  0xcb   : > { %3138 = vmatmul.msk.f32.gmra.mxu2 %vm337_vm0, %v468_v51 }
  0xd3   : > { %3139 = vmatmul.msk.f32.gmra.mxu2 %vm337_vm0, %v469_v56 }
  0xdb   : > { %3140 = vmatmul.msk.f32.gmra.mxu2 %vm337_vm0, %v470_v57 }
 0x12f   : > { %v4041_v58 = vpop.f32.mrf.mxu0 }
 0x137   : > { %v4046_v60 = vpop.f32.mrf.mxu0 }
 0x13f   : > { %v902_v10 = vpop.f32.mrf.mxu0 }
 0x140   : > { %v913_v22 = vadd.f32 %v905_v0, %v902_v10  ;;  %v916_v26 = vadd.f32 %v908_v1, %v902_v10  ;;  %v914_v29 = vadd.f32 %v906_v3, %v902_v10  ;;  %v917_v49 = vadd.f32 %v909_v4, %v902_v10 }
 0x141   : > { %v915_v31 = vadd.f32 %v907_v6, %v902_v10  ;;  %v918_v33 = vadd.f32 %v910_v9, %v902_v10  ;;  %v919_v57 = vadd.f32 %v911_v28, %v902_v10  ;;  %v928_v0 = vmul.f32 %v4053_v62, %v4007_v53 }
 0x142   : > { %v930_v34 = vadd.f32 %v922_v12, %v913_v22  ;;  %v933_v36 = vadd.f32 %v925_v13, %v916_v26  ;;  %v931_v47 = vadd.f32 %v923_v14, %v914_v29  ;;  %v934_v15 = vadd.f32 %v926_v30, %v917_v49 }
 0x143   : > { %v932_v38 = vadd.f32 %v924_v21, %v915_v31  ;;  %v935_v41 = vadd.f32 %v927_v20, %v918_v33  ;;  %v936_v3 = vadd.f32 %v928_v0, %v919_v57  ;;  %v912_v4 = vperm.slane %v4048_v61, 7 }
 0x144   : > { %v939_v50 = vadd.f32 %v3227_v25, %v930_v34  ;;  %v942_v39 = vadd.f32 %v3227_v25, %v933_v36  ;;  %v4079_v40 = vadd.f32 %v3227_v25, %v931_v47  ;;  %v4081_v63 = vadd.f32 %v3227_v25, %v934_v15 }
 0x145   : > { %v4084_v44 = vadd.f32 %v3227_v25, %v932_v38  ;;  %v4088_v42 = vadd.f32 %v3227_v25, %v935_v41  ;;  %v945_v14 = vadd.f32 %v3227_v25, %v936_v3  ;;  %v920_v21 = vadd.f32 %v912_v4, %v902_v10  ;;  %v4109_v4 = vpop.f32.mrf.mxu2 }
 0x146   : > { %v947_v43 = vsub.f32 0.0, %v939_v50  ;;  %v950_v27 = vsub.f32 0.0, %v942_v39  ;;  %v948_v45 = vsub.f32 0.0, %v4079_v40  ;;  %v951_v51 = vsub.f32 0.0, %v4081_v63 }
 0x147   : > { %v949_v7 = vsub.f32 0.0, %v4084_v44  ;;  %v952_v1 = vsub.f32 0.0, %v4088_v42  ;;  %v929_v29 = vmul.f32 %v4053_v62, %v4014_v8  ;;  %v953_v61 = vsub.f32 0.0, %v945_v14 }
 0x148   : > { %v955_v54 = vmul.f32 1.442695, %v947_v43  ;;  %v961_v55 = vmul.f32 1.442695, %v950_v27  ;;  %v957_v56 = vmul.f32 1.442695, %v948_v45 }
 0x149   : > { %v963_v59 = vmul.f32 1.442695, %v951_v51  ;;  %v959_v6 = vmul.f32 1.442695, %v949_v7  ;;  %v965_v13 = vmul.f32 1.442695, %v952_v1  ;;  %v937_v31 = vadd.f32 %v929_v29, %v920_v21 }
 0x14a   : > { %3279 = vpow2.f32 %v955_v54  ;;  %v967_v47 = vmul.f32 1.442695, %v953_v61 }
 0x14b   : > { %3281 = vpow2.f32 %v961_v55  ;;  %v946_v15 = vadd.f32 %v3227_v25, %v937_v31 }
 0x14c   : > { %3283 = vpow2.f32 %v957_v56 }
 0x14d   : > { %3285 = vpow2.f32 %v963_v59  ;;  %v954_v28 = vsub.f32 0.0, %v946_v15 }
 0x14e   : > { %3287 = vpow2.f32 %v959_v6 }
 0x14f   : > { %v969_v51 = vmul.f32 1.442695, %v954_v28 }
 0x150   : > { %v3280_v9 = vpop.eup %3279 }
 0x151   : > { %v3282_v11 = vpop.eup %3281  ;;  %v971_v12 = vadd.f32 1.0, %v3280_v9 }
 0x152   : > { %v3284_v22 = vpop.eup %3283  ;;  %v974_v26 = vadd.f32 1.0, %v3282_v11  ;;  %v4122_v11 = vld [vmem:[%s5411_s3 + $0x6] ss:$0 sm:$0xff] }
 0x153   : > { %3289 = vrcp.f32 %v971_v12  ;;  %v3286_v49 = vpop.eup %3285  ;;  %v972_v30 = vadd.f32 1.0, %v3284_v22 }
 0x154   : > { %3291 = vrcp.f32 %v974_v26  ;;  %v975_v33 = vadd.f32 1.0, %v3286_v49  ;;  %v3288_v34 = vpop.eup %3287 }
 0x155   : > { %3293 = vpow2.f32 %v965_v13  ;;  %v973_v62 = vadd.f32 1.0, %v3288_v34 }
 0x156   : > { %3295 = vrcp.f32 %v972_v30 }
 0x157   : > { %3297 = vrcp.f32 %v975_v33 }
 0x158   : > { %3299 = vpow2.f32 %v967_v47 }
 0x159   : > { %v3290_v36 = vpop.eup %3289  ;;  %3301 = vrcp.f32 %v973_v62 }
 0x15a   : > { %v3292_v10 = vpop.eup %3291  ;;  %v987_v38 = vmul.f32 %v3290_v36, %v939_v50 }
 0x15b   : > { %v3294_v20 = vpop.eup %3293  ;;  %v990_v41 = vmul.f32 %v3292_v10, %v942_v39 }
 0x15c   : > { %3143 = vmatmul.msk.f32.vlgmr.msrb.gmra.mxu1 %vm337_vm0, %v987_v38  ;;  %v976_v43 = vadd.f32 1.0, %v3294_v20  ;;  %v3296_v27 = vpop.eup %3295 }
 0x15d   : > { %3146 = vmatmul.msk.f32.vlgmr.msrb.gmra.mxu2 %vm337_vm0, %v990_v41  ;;  %v3298_v45 = vpop.eup %3297  ;;  %v988_v54 = vmul.f32 %v3296_v27, %v4079_v40 }
 0x15e   : > { %3303 = vrcp.f32 %v976_v43  ;;  %v3300_v25 = vpop.eup %3299  ;;  %v991_v50 = vmul.f32 %v3298_v45, %v4081_v63 }
 0x15f   : > { %3305 = vpow2.f32 %v969_v51  ;;  %v977_v39 = vadd.f32 1.0, %v3300_v25  ;;  %v3302_v55 = vpop.eup %3301 }
 0x160   : > { %v989_v57 = vmul.f32 %v3302_v55, %v4084_v44  ;;  %v4111_v44 = vpop.f32.mrf.mxu2 }
 0x161   : > { %3307 = vrcp.f32 %v977_v39 }
 0x164   : > { %3144 = vmatmul.msk.f32.gmra.mxu1 %vm337_vm0, %v988_v54  ;;  %v3304_v56 = vpop.eup %3303  ;;  %v4134_v54 = vld [vmem:[%s5411_s3 + $0x7] ss:$0 sm:$0xff] }
 0x165   : > { %3147 = vmatmul.msk.f32.gmra.mxu2 %vm337_vm0, %v991_v50  ;;  %v3306_v7 = vpop.eup %3305  ;;  %v992_v59 = vmul.f32 %v3304_v56, %v4088_v42 }
 0x166   : > { %v978_v40 = vadd.f32 1.0, %v3306_v7 }
 0x167   : > { %v3308_v63 = vpop.eup %3307 }
 0x168   : > { %3309 = vrcp.f32 %v978_v40  ;;  %v993_v0 = vmul.f32 %v3308_v63, %v945_v14  ;;  %v4113_v6 = vpop.f32.mrf.mxu2 }
 0x16c   : > { %3145 = vmatmul.msk.f32.gmra.mxu1 %vm337_vm0, %v989_v57 }
 0x16d   : > { %3148 = vmatmul.msk.f32.gmra.mxu2 %vm337_vm0, %v992_v59 }
 0x16e   : > { %v3310_v1 = vpop.eup %3309 }
 0x16f   : > { %v994_v3 = vmul.f32 %v3310_v1, %v946_v15 }
 0x170   : > { %v4115_v42 = vpop.f32.mrf.mxu2 }
 0x175   : > { %3149 = vmatmul.msk.f32.gmra.mxu2 %vm337_vm0, %v993_v0 }
 0x178   : > { %v4117_v9 = vpop.f32.mrf.mxu2 }
 0x17d   : > { %3150 = vmatmul.msk.f32.gmra.mxu2 %vm337_vm0, %v994_v3 }
 0x180   : > { %v4124_v12 = vpop.f32.mrf.mxu2 }
 0x1d9   : > { %v1037_v13 = vpop.f32.mrf.mxu1 }
 0x1da   : > { %v1038_v14 = vadd.f32 %v4122_v11, %v1037_v13 }
 0x1dc   : > { %v1061_v21 = vsub.f32 0.0, %v1038_v14 }
 0x1de   : > { %v1069_v22 = vmul.f32 1.442695, %v1061_v21 }
 0x1e0   : > { %3311 = vpow2.f32 %v1069_v22  ;;  %v1046_v26 = vpop.f32.mrf.mxu2 }
 0x1e1   : > { %v1047_v29 = vadd.f32 %v4122_v11, %v1046_v26  ;;  %v1040_v49 = vpop.f32.mrf.mxu1 }
 0x1e2   : > { %v1041_v30 = vadd.f32 %v4122_v11, %v1040_v49 }
 0x1e3   : > { %v1064_v61 = vsub.f32 0.0, %v1047_v29 }
 0x1e4   : > { %v1062_v31 = vsub.f32 0.0, %v1041_v30 }
 0x1e5   : > { %v1075_v33 = vmul.f32 1.442695, %v1064_v61 }
 0x1e6   : > { %v3312_v34 = vpop.eup %3311  ;;  %v1071_v36 = vmul.f32 1.442695, %v1062_v31 }
 0x1e7   : > { %v1085_v47 = vadd.f32 1.0, %v3312_v34  ;;  %3313 = vpow2.f32 %v1075_v33 }
 0x1e8   : > { %3315 = vpow2.f32 %v1071_v36  ;;  %v1049_v15 = vpop.f32.mrf.mxu2 }
 0x1e9   : > { %3317 = vrcp.f32 %v1085_v47  ;;  %v1050_v10 = vadd.f32 %v4122_v11, %v1049_v15  ;;  %v1043_v38 = vpop.f32.mrf.mxu1 }
 0x1ea   : > { %v1044_v20 = vadd.f32 %v4122_v11, %v1043_v38 }
 0x1eb   : > { %v1065_v41 = vsub.f32 0.0, %v1050_v10 }
 0x1ec   : > { %v1063_v62 = vsub.f32 0.0, %v1044_v20 }
 0x1ed   : > { %v3314_v28 = vpop.eup %3313  ;;  %v1077_v43 = vmul.f32 1.442695, %v1065_v41 }
 0x1ee   : > { %v3316_v27 = vpop.eup %3315  ;;  %v1088_v45 = vadd.f32 1.0, %v3314_v28  ;;  %v1073_v51 = vmul.f32 1.442695, %v1063_v62 }
 0x1ef   : > { %v3318_v25 = vpop.eup %3317  ;;  %v1086_v50 = vadd.f32 1.0, %v3316_v27  ;;  %3319 = vpow2.f32 %v1077_v43 }
 0x1f0   : > { %v4136_v39 = vmul.f32 %v3318_v25, %v1038_v14  ;;  %3321 = vrcp.f32 %v1088_v45  ;;  %v1052_v55 = vpop.f32.mrf.mxu2 }
 0x1f1   : > { %3323 = vrcp.f32 %v1086_v50  ;;  %v1053_v56 = vadd.f32 %v4122_v11, %v1052_v55 }
 0x1f2   : > { %3325 = vpow2.f32 %v1073_v51  ;;  %v1110_v57 = vmul.f32 %v4134_v54, %v4136_v39 }
 0x1f3   : > { %v1066_v7 = vsub.f32 0.0, %v1053_v56 }
 0x1f4   : > { %v1118_v59 = vsel %vm337_vm0, %v1110_v57, 0.0 }
 0x1f5   : > { %v3320_v40 = vpop.eup %3319  ;;  %v1079_v63 = vmul.f32 1.442695, %v1066_v7  ;;  %1119 = vadd.xlane.f32.xlu2 %v1118_v59 }
 0x1f6   : > { %v3322_v0 = vpop.eup %3321  ;;  %v1089_v1 = vadd.f32 1.0, %v3320_v40 }
 0x1f7   : > { %v3324_v3 = vpop.eup %3323  ;;  %v4142_v13 = vmul.f32 %v3322_v0, %v1047_v29  ;;  %3327 = vpow2.f32 %v1079_v63 }
 0x1f8   : > { %v3326_v14 = vpop.eup %3325  ;;  %v4144_v21 = vmul.f32 %v3324_v3, %v1041_v30  ;;  %3329 = vrcp.f32 %v1089_v1  ;;  %v1055_v22 = vpop.f32.mrf.mxu2 }
 0x1f9   : > { %v1087_v26 = vadd.f32 1.0, %v3326_v14  ;;  %v1056_v49 = vadd.f32 %v4122_v11, %v1055_v22  ;;  %v1113_v61 = vmul.f32 %v4134_v54, %v4142_v13 }
 0x1fa   : > { %v1111_v31 = vmul.f32 %v4134_v54, %v4144_v21 }
 0x1fb   : > { %3331 = vrcp.f32 %v1087_v26  ;;  %v1067_v33 = vsub.f32 0.0, %v1056_v49  ;;  %v1127_v34 = vsel %vm337_vm0, %v1113_v61, 0.0 }
 0x1fc   : > { %v1121_v29 = vsel %vm337_vm0, %v1111_v31, 0.0 }
 0x1fd   : > { %v3328_v36 = vpop.eup %3327  ;;  %v1081_v30 = vmul.f32 1.442695, %v1067_v33  ;;  %1122 = vadd.xlane.f32.xlu0 %v1121_v29  ;;  %1128 = vadd.xlane.f32.xlu2 %v1127_v34  ;;  %v3773_v33 = vmov 0  }
 0x1fe   : > { %v3330_v47 = vpop.eup %3329  ;;  %v1090_v15 = vadd.f32 1.0, %v3328_v36  ;;  %3220 = vset.pattern.permute.xlu1 %v3773_v33  ;;  %3221 = vset.pattern.permute.xlu2 %v3773_v33 }
 0x1ff   : > { %v4153_v38 = vmul.f32 %v3330_v47, %v1050_v10  ;;  %3333 = vpow2.f32 %v1081_v30  ;;  %3222 = vset.pattern.permute.xlu0 %v3773_v33 }
 0x200   : > { %3335 = vrcp.f32 %v1090_v15  ;;  %v1058_v41 = vpop.f32.mrf.mxu2 }
 0x201   : > { %v3332_v62 = vpop.eup %3331  ;;  %v1059_v28 = vadd.f32 %v4122_v11, %v1058_v41  ;;  %v1114_v43 = vmul.f32 %v4134_v54, %v4153_v38 }
 0x202   : > { %v4158_v27 = vmul.f32 %v3332_v62, %v1044_v20 }
 0x203   : > { %v1068_v45 = vsub.f32 0.0, %v1059_v28  ;;  %v1130_v25 = vsel %vm337_vm0, %v1114_v43, 0.0 }
 0x204   : > { %v1112_v51 = vmul.f32 %v4134_v54, %v4158_v27 }
 0x205   : > { %v3334_v50 = vpop.eup %3333  ;;  %v1083_v10 = vmul.f32 1.442695, %v1068_v45  ;;  %1131 = vadd.xlane.f32.xlu0 %v1130_v25 }
 0x206   : > { %v3336_v55 = vpop.eup %3335  ;;  %v1091_v57 = vadd.f32 1.0, %v3334_v50  ;;  %v1124_v7 = vsel %vm337_vm0, %v1112_v51, 0.0  ;;  %v263_v51 = vld [vmem:[%s5412_s4] sm:$0xff] }
 0x207   : > { %v4164_v59 = vmul.f32 %v3336_v55, %v1053_v56  ;;  %3337 = vpow2.f32 %v1083_v10  ;;  %1125 = vadd.xlane.f32.xlu1 %v1124_v7 }
 0x208   : > { %3339 = vrcp.f32 %v1091_v57 }
 0x209   : > { %v1115_v11 = vmul.f32 %v4134_v54, %v4164_v59 }
 0x20b   : > { %v1133_v0 = vsel %vm337_vm0, %v1115_v11, 0.0 }
 0x20d   : > { %v3338_v20 = vpop.eup %3337 }
 0x20e   : > { %v3340_v40 = vpop.eup %3339  ;;  %v1092_v63 = vadd.f32 1.0, %v3338_v20 }
 0x20f   : > { %v4169_v1 = vmul.f32 %v3340_v40, %v1056_v49  ;;  %1134 = vadd.xlane.f32.xlu1 %v1133_v0 }
 0x210   : > { %3341 = vrcp.f32 %v1092_v63 }
 0x211   : > { %v1116_v3 = vmul.f32 %v4134_v54, %v4169_v1 }
 0x213   : > { %v1136_v56 = vsel %vm337_vm0, %v1116_v3, 0.0 }
 0x214   : > { %1137 = vadd.xlane.f32.xlu2 %v1136_v56 }
 0x216   : > { %v3342_v14 = vpop.eup %3341 }
 0x217   : > { %v4174_v22 = vmul.f32 %v3342_v14, %v1059_v28  ;;  %v264_v14 = vld [vmem:[%s5412_s4 + $0x8] sm:$0xff] }
 0x219   : > { %v1117_v26 = vmul.f32 %v4134_v54, %v4174_v22 }
 0x21b   : > { %v1139_v61 = vsel %vm337_vm0, %v1117_v26, 0.0 }
 0x21c   : > { %1140 = vadd.xlane.f32.xlu0 %v1139_v61 }
 0x268   : > { %v1120_v31 = vpop.xlane.xlu2 %1119 }
 0x269   : > { %v1142_v49 = vsub.f32 0.0, %v1120_v31 }
 0x26b   : > { %v1150_v29 = vmul.f32 1.442695, %v1142_v49 }
 0x26d   : > { %3343 = vpow2.f32 %v1150_v29 }
 0x270   : > { %v1129_v34 = vpop.xlane.xlu2 %1128  ;;  %v1123_v36 = vpop.xlane.xlu0 %1122 }
 0x271   : > { %v1145_v30 = vsub.f32 0.0, %v1129_v34  ;;  %v1143_v47 = vsub.f32 0.0, %v1123_v36 }
 0x273   : > { %v3344_v15 = vpop.eup %3343  ;;  %v1152_v41 = vmul.f32 1.442695, %v1143_v47  ;;  %v1156_v28 = vmul.f32 1.442695, %v1145_v30  ;;  %v267_v30 = vld [vmem:[%s5412_s4 + $0x20] sm:$0xff] }
 0x274   : > { %v1166_v62 = vadd.f32 1.0, %v3344_v15 }
 0x276   : > { %3345 = vrcp.f32 %v1166_v62  ;;  %v266_v62 = vld [vmem:[%s5412_s4 + $0x18] sm:$0xff] }
 0x277   : > { %3347 = vpow2.f32 %v1152_v41  ;;  %v265_v41 = vld [vmem:[%s5412_s4 + $0x10] sm:$0xff] }
 0x278   : > { %3349 = vpow2.f32 %v1156_v28  ;;  %v1132_v54 = vpop.xlane.xlu0 %1131 }
 0x279   : > { %v1146_v43 = vsub.f32 0.0, %v1132_v54 }
 0x27a   : > { %v1126_v45 = vpop.xlane.xlu1 %1125 }
 0x27b   : > { %v1144_v25 = vsub.f32 0.0, %v1126_v45  ;;  %v1158_v50 = vmul.f32 1.442695, %v1146_v43  ;;  %v4197_v45 = vld [vmem:[%s5411_s3 + $0x2] ss:$0 sm:$0xff] }
 0x27c   : > { %v3346_v10 = vpop.eup %3345 }
 0x27d   : > { %v3348_v55 = vpop.eup %3347  ;;  %v1154_v57 = vmul.f32 1.442695, %v1144_v25  ;;  %3351 = vpow2.f32 %v1158_v50  ;;  %v1182_v7 = vmul.f32 %v3346_v10, %v263_v51 }
 0x27e   : > { %v3350_v11 = vpop.eup %3349  ;;  %v1167_v20 = vadd.f32 1.0, %v3348_v55  ;;  %v517_v55 = vadd.f32 %v4197_v45, %v4046_v60  ;;  %v529_v60 = vadd.f32 %v4197_v45, %v4115_v42  ;;  %v270_v42 = vld [vmem:[%s5412_s4 + $0x38] sm:$0xff] }
 0x27f   : > { %3353 = vpow2.f32 %v1154_v57  ;;  %1192 = vperm.xlu1 %3220, %v1182_v7   ;;  %v1169_v40 = vadd.f32 1.0, %v3350_v11 }
 0x280   : > { %3355 = vrcp.f32 %v1167_v20 }
 0x281   : > { %3357 = vrcp.f32 %v1169_v40  ;;  %v538_v40 = vsub.f32 0.0, %v517_v55 }
 0x282   : > { %v1135_v63 = vpop.xlane.xlu1 %1134 }
 0x283   : > { %v3352_v0 = vpop.eup %3351  ;;  %v1147_v3 = vsub.f32 0.0, %v1135_v63  ;;  %v268_v63 = vld [vmem:[%s5412_s4 + $0x28] sm:$0xff] }
 0x284   : > { %v1170_v56 = vadd.f32 1.0, %v3352_v0 }
 0x285   : > { %v3354_v26 = vpop.eup %3353  ;;  %v1160_v61 = vmul.f32 1.442695, %v1147_v3 }
 0x286   : > { %v3356_v31 = vpop.eup %3355  ;;  %v1168_v49 = vadd.f32 1.0, %v3354_v26  ;;  %3359 = vrcp.f32 %v1170_v56  ;;  %v547_v56 = vmul.f32 1.442695, %v538_v40 }
 0x287   : > { %3361 = vpow2.f32 %v1160_v61  ;;  %v1138_v33 = vpop.xlane.xlu2 %1137  ;;  %v1183_v29 = vmul.f32 %v3356_v31, %v264_v14  ;;  %v3358_v47 = vpop.eup %3357  ;;  %v269_v14 = vld [vmem:[%s5412_s4 + $0x30] sm:$0xff] }
 0x288   : > { %3363 = vrcp.f32 %v1168_v49  ;;  %v1148_v34 = vsub.f32 0.0, %v1138_v33  ;;  %v1185_v10 = vmul.f32 %v3358_v47, %v266_v62  ;;  %v514_v49 = vadd.f32 %v4197_v45, %v4041_v58 }
 0x289   : > { %1197 = vperm.xlu2 %3221, %v1183_v29   ;;  %v542_v33 = vsub.f32 0.0, %v529_v60  ;;  %v523_v58 = vadd.f32 %v4197_v45, %v4111_v44 }
 0x28a   : > { %v1162_v36 = vmul.f32 1.442695, %v1148_v34  ;;  %v537_v34 = vsub.f32 0.0, %v514_v49 }
 0x28c   : > { %v3360_v15 = vpop.eup %3359  ;;  %3365 = vpow2.f32 %v1162_v36  ;;  %v555_v36 = vmul.f32 1.442695, %v542_v33 }
 0x28d   : > { %v3362_v28 = vpop.eup %3361  ;;  %v1186_v54 = vmul.f32 %v3360_v15, %v267_v30  ;;  %v520_v15 = vadd.f32 %v4197_v45, %v4109_v4  ;;  %v532_v4 = vadd.f32 %v4197_v45, %v4117_v9 }
 0x28e   : > { %v3364_v43 = vpop.eup %3363  ;;  %v1171_v51 = vadd.f32 1.0, %v3362_v28 }
 0x28f   : > { %v1141_v25 = vpop.xlane.xlu0 %1140  ;;  %v1184_v50 = vmul.f32 %v3364_v43, %v265_v41  ;;  %1212 = vperm.xlu1 %3220, %v1186_v54   ;;  %v545_v41 = vmul.f32 1.442695, %v537_v34  ;;  %v539_v54 = vsub.f32 0.0, %v520_v15  ;;  %v540_v43 = vsub.f32 0.0, %v523_v58 }
 0x290   : > { %3367 = vrcp.f32 %v1171_v51  ;;  %v1149_v57 = vsub.f32 0.0, %v1141_v25 }
 0x291   : > { %1202 = vperm.xlu0 %3222, %v1184_v50   ;;  %1207 = vperm.xlu2 %3221, %v1185_v10   ;;  %v549_v25 = vmul.f32 1.442695, %v539_v54  ;;  %v551_v50 = vmul.f32 1.442695, %v540_v43  ;;  %v526_v10 = vadd.f32 %v4197_v45, %v4113_v6  ;;  %v3230_v6 = vld [vmem:[%s5411_s3 + $0x3] ss:$0 sm:$0xff] }
 0x292   : > { %v3366_v7 = vpop.eup %3365  ;;  %v1164_v11 = vmul.f32 1.442695, %v1149_v57 }
 0x293   : > { %v1172_v20 = vadd.f32 1.0, %v3366_v7 }
 0x294   : > { %3369 = vpow2.f32 %v1164_v11  ;;  %v541_v11 = vsub.f32 0.0, %v526_v10 }
 0x295   : > { %3371 = vrcp.f32 %v1172_v20  ;;  %v543_v20 = vsub.f32 0.0, %v532_v4 }
 0x296   : > { %v3368_v0 = vpop.eup %3367  ;;  %3373 = vpow2.f32 %v547_v56 }
 0x297   : > { %v1187_v3 = vmul.f32 %v3368_v0, %v268_v63  ;;  %v553_v0 = vmul.f32 1.442695, %v541_v11 }
 0x299   : > { %1217 = vperm.xlu2 %3221, %v1187_v3   ;;  %v535_v3 = vadd.f32 %v4197_v45, %v4124_v12 }
 0x29a   : > { %v3370_v26 = vpop.eup %3369 }
 0x29b   : > { %v3372_v61 = vpop.eup %3371  ;;  %v1173_v31 = vadd.f32 1.0, %v3370_v26 }
 0x29c   : > { %v1188_v29 = vmul.f32 %v3372_v61, %v269_v14  ;;  %v3374_v30 = vpop.eup %3373  ;;  %v557_v14 = vmul.f32 1.442695, %v543_v20 }
 0x29d   : > { %3375 = vrcp.f32 %v1173_v31  ;;  %v562_v28 = vadd.f32 1.0, %v3374_v30  ;;  %v544_v31 = vsub.f32 0.0, %v535_v3 }
 0x29e   : > { %1222 = vperm.xlu1 %3220, %v1188_v29   ;;  %3377 = vpow2.f32 %v555_v36 }
 0x29f   : > { %3379 = vpow2.f32 %v545_v41  ;;  %v559_v45 = vmul.f32 1.442695, %v544_v31 }
 0x2a0   : > { %3381 = vrcp.f32 %v562_v28 }
 0x2a1   : > { %3383 = vpow2.f32 %v549_v25 }
 0x2a2   : > { %3385 = vpow2.f32 %v551_v50 }
 0x2a3   : > { %v3376_v47 = vpop.eup %3375 }
 0x2a4   : > { %v1189_v62 = vmul.f32 %v3376_v47, %v270_v42  ;;  %v3378_v51 = vpop.eup %3377 }
 0x2a5   : > { %v566_v57 = vadd.f32 1.0, %v3378_v51  ;;  %v3380_v7 = vpop.eup %3379 }
 0x2a6   : > { %1227 = vperm.xlu2 %3221, %v1189_v62   ;;  %v3382_v44 = vpop.eup %3381  ;;  %v561_v40 = vadd.f32 1.0, %v3380_v7 }
 0x2a7   : > { %3387 = vrcp.f32 %v566_v57  ;;  %v578_v63 = vmul.f32 %v3382_v44, %v517_v55  ;;  %v3384_v56 = vpop.eup %3383 }
 0x2a8   : > { %v3386_v9 = vpop.eup %3385  ;;  %3389 = vrcp.f32 %v561_v40  ;;  %v563_v33 = vadd.f32 1.0, %v3384_v56 }
 0x2a9   : > { %v587_v26 = vmul.f32 %v3230_v6, %v578_v63  ;;  %3391 = vpow2.f32 %v553_v0  ;;  %v564_v29 = vadd.f32 1.0, %v3386_v9 }
 0x2aa   : > { %3393 = vpow2.f32 %v557_v14 }
 0x2ab   : > { %v597_v34 = vsel %vm337_vm0, %v587_v26, 0.0  ;;  %3395 = vrcp.f32 %v563_v33 }
 0x2ac   : > { %3397 = vrcp.f32 %v564_v29 }
 0x2ad   : > { %v3388_v61 = vpop.eup %3387  ;;  %3399 = vpow2.f32 %v559_v45 }
 0x2ae   : > { %v582_v55 = vmul.f32 %v3388_v61, %v529_v60  ;;  %v3390_v12 = vpop.eup %3389 }
 0x2af   : > { %v3392_v36 = vpop.eup %3391  ;;  %v577_v47 = vmul.f32 %v3390_v12, %v514_v49 }
 0x2b0   : > { %v591_v42 = vmul.f32 %v3230_v6, %v582_v55  ;;  %v3394_v30 = vpop.eup %3393  ;;  %v565_v41 = vadd.f32 1.0, %v3392_v36 }
 0x2b1   : > { %v567_v62 = vadd.f32 1.0, %v3394_v30  ;;  %v3396_v54 = vpop.eup %3395  ;;  %v586_v43 = vmul.f32 %v3230_v6, %v577_v47 }
 0x2b2   : > { %v609_v28 = vsel %vm337_vm0, %v591_v42, 0.0  ;;  %v3398_v60 = vpop.eup %3397  ;;  %3401 = vrcp.f32 %v565_v41  ;;  %v579_v25 = vmul.f32 %v3396_v54, %v520_v15  ;;  %v854_v42 = vld [vmem:[%s5410_s2 + $0xf8] sm:$0xff] }
 0x2b3   : > { %v3400_v51 = vpop.eup %3399  ;;  %3403 = vrcp.f32 %v567_v62  ;;  %v580_v50 = vmul.f32 %v3398_v60, %v523_v58  ;;  %v594_v57 = vsel %vm337_vm0, %v586_v43, 0.0  ;;  %1323 = vmatpush.msrb.mxu3 %v854_v42 }
 0x2b4   : > { %v568_v7 = vadd.f32 1.0, %v3400_v51  ;;  %v588_v44 = vmul.f32 %v3230_v6, %v579_v25  ;;  %v851_v51 = vld [vmem:[%s5410_s2 + $0xe0] sm:$0xff]  ;;  %v849_v25 = vld [vmem:[%s5410_s2 + $0xd0] sm:$0xff] }
 0x2b5   : > { %v589_v11 = vmul.f32 %v3230_v6, %v580_v50  ;;  %v848_v50 = vld [vmem:[%s5410_s2 + $0xc8] sm:$0xff] }
 0x2b6   : > { %3405 = vrcp.f32 %v568_v7  ;;  %v600_v63 = vsel %vm337_vm0, %v588_v44, 0.0 }
 0x2b7   : > { %v603_v56 = vsel %vm337_vm0, %v589_v11, 0.0  ;;  %3407 = vrsqrt.f32 %v3966_v5  ;;  %v847_v11 = vld [vmem:[%s5410_s2 + $0xc0] sm:$0xff] }
 0x2b8   : > { %v3402_v49 = vpop.eup %3401  ;;  %3409 = vrsqrt.f32 %v3924_v48 }
 0x2b9   : > { %v3404_v20 = vpop.eup %3403  ;;  %v581_v40 = vmul.f32 %v3402_v49, %v526_v10  ;;  %3411 = vrsqrt.f32 %v3995_v32 }
 0x2ba   : > { %v583_v0 = vmul.f32 %v3404_v20, %v532_v4  ;;  %3413 = vrsqrt.f32 %v3917_v46 }
 0x2bb   : > { %598 = vadd.xlane.f32.xlu0 %v597_v34  ;;  %v590_v15 = vmul.f32 %v3230_v6, %v581_v40  ;;  %3415 = vrsqrt.f32 %v3960_v2 }
 0x2bc   : > { %v3406_v14 = vpop.eup %3405  ;;  %v592_v58 = vmul.f32 %v3230_v6, %v583_v0  ;;  %3417 = vrsqrt.f32 %v3932_v52 }
 0x2bd   : > { %v584_v9 = vmul.f32 %v3406_v14, %v535_v3  ;;  %v606_v26 = vsel %vm337_vm0, %v590_v15, 0.0  ;;  %v4254_v54 = vpop.eup %3407  ;;  %3419 = vrsqrt.f32 %v4007_v53 }
 0x2be   : > { %v612_v61 = vsel %vm337_vm0, %v592_v58, 0.0  ;;  %v640_v40 = vmul.f32 %v4254_v54, %v3966_v5  ;;  %v3735_v58 = vld [vmem:[%s5409_s1] sm:$0xff]  ;;  %3421 = vrsqrt.f32 %v4014_v8 }
 0x2bf   : > { %v593_v31 = vmul.f32 %v3230_v6, %v584_v9 }
 0x2c1   : > { %v615_v10 = vsel %vm337_vm0, %v593_v31, 0.0  ;;  %v641_v31 = vmul.f32 %v4254_v54, %v640_v40 }
 0x2c3   : > { %610 = vadd.xlane.f32.xlu0 %v609_v28 }
 0x2c8   : > { %595 = vadd.xlane.f32.xlu1 %v594_v57 }
 0x2cf   : > { %601 = vadd.xlane.f32.xlu2 %v600_v63 }
 0x2d0   : > { %604 = vadd.xlane.f32.xlu1 %v603_v56 }
 0x2d7   : > { %607 = vadd.xlane.f32.xlu2 %v606_v26 }
 0x2d8   : > { %613 = vadd.xlane.f32.xlu1 %v612_v61 }
 0x2df   : > { %616 = vadd.xlane.f32.xlu2 %v615_v10 }
 0x2e3   : > { %v1198_v33 = vpop.permute.xlu2 %1197 }
 0x2e4   : > { %v1231_v34 = vmul.f32 %v1198_v33, %v4144_v21  ;;  %v850_v21 = vld [vmem:[%s5410_s2 + $0xd8] sm:$0xff] }
 0x2e5   : > { %1343 = vmatpush.msrb.mxu0 %v850_v21 }
 0x2e6   : > { %v1245_v45 = vsel %vm337_vm0, %v1231_v34, 0.0  ;;  %v4284_v34 = vpop.eup %3409 }
 0x2e7   : > { %v1246_v30 = vrot.slane %v1245_v45, 4  ;;  %1344 = vmatpush.msrb.mxu0 %v849_v25 }
 0x2e9   : > { %v1247_v57 = vadd.f32 %v1246_v30, %v1245_v45  ;;  %1345 = vmatpush.msrb.mxu0 %v848_v50 }
 0x2eb   : > { %v1208_v4 = vpop.permute.xlu2 %1207  ;;  %1346 = vmatpush.msrb.mxu0 %v847_v11 }
 0x2ec   : > { %v1233_v36 = vmul.f32 %v1208_v4, %v4142_v13  ;;  %v852_v13 = vld [vmem:[%s5410_s2 + $0xe8] sm:$0xff]  ;;  %3152 = vmatmul.msk.f32.vlgmr.msrb.gmra.mxu0 %vm337_vm0, %v3735_v58 }
 0x2ee   : > { %v1259_v47 = vsel %vm337_vm0, %v1233_v36, 0.0  ;;  %v642_v36 = vmul.f32 0.5, %v641_v31 }
 0x2ef   : > { %v1260_v7 = vrot.slane %v1259_v47, 4 }
 0x2f1   : > { %v1193_v29 = vpop.permute.xlu1 %1192  ;;  %v1261_v15 = vadd.f32 %v1260_v7, %v1259_v47 }
 0x2f2   : > { %v1230_v55 = vmul.f32 %v1193_v29, %v4136_v39  ;;  %v853_v39 = vld [vmem:[%s5410_s2 + $0xf0] sm:$0xff] }
 0x2f3   : > { %v1218_v12 = vpop.permute.xlu2 %1217  ;;  %1324 = vmatpush.msrb.mxu3 %v853_v39  ;;  %v1262_v4 = vrot.slane %v1261_v15, 2 }
 0x2f4   : > { %v1238_v3 = vsel %vm337_vm0, %v1230_v55, 0.0  ;;  %v1235_v43 = vmul.f32 %v1218_v12, %v4164_v59 }
 0x2f5   : > { %v1239_v6 = vrot.slane %v1238_v3, 4  ;;  %1325 = vmatpush.msrb.mxu3 %v852_v13  ;;  %v1263_v39 = vadd.f32 %v1262_v4, %v1261_v15  ;;  %v628_v13 = vmul.f32 %v4284_v34, %v3924_v48 }
 0x2f6   : > { %v1273_v63 = vsel %vm337_vm0, %v1235_v43, 0.0  ;;  %v643_v43 = vsub.f32 1.5, %v642_v36 }
 0x2f7   : > { %v1240_v41 = vadd.f32 %v1239_v6, %v1238_v3  ;;  %1326 = vmatpush.msrb.mxu3 %v851_v51  ;;  %v1274_v26 = vrot.slane %v1273_v63, 4  ;;  %v1264_v50 = vrot.slane %v1263_v39, 1 }
 0x2f9   : > { %v1241_v20 = vrot.slane %v1240_v41, 2  ;;  %v1275_v3 = vadd.f32 %v1274_v26, %v1273_v63  ;;  %v1265_v63 = vadd.f32 %v1264_v50, %v1263_v39 }
 0x2fb   : > { %v1242_v9 = vadd.f32 %v1241_v20, %v1240_v41 }
 0x2fd   : > { %v1243_v12 = vrot.slane %v1242_v9, 1 }
 0x2ff   : > { %v1244_v41 = vadd.f32 %v1243_v12, %v1242_v9 }
 0x300   : > { %v1228_v62 = vpop.permute.xlu2 %1227 }
 0x301   : > { %v1213_v28 = vpop.permute.xlu1 %1212  ;;  %v1237_v59 = vmul.f32 %v1228_v62, %v4174_v22  ;;  %v1248_v22 = vrot.slane %v1247_v57, 2  ;;  %v1276_v62 = vrot.slane %v1275_v3, 2 }
 0x302   : > { %v1234_v60 = vmul.f32 %v1213_v28, %v4153_v38 }
 0x303   : > { %v1203_v44 = vpop.permute.xlu0 %1202  ;;  %v1287_v14 = vsel %vm337_vm0, %v1237_v59, 0.0  ;;  %v1249_v33 = vadd.f32 %v1248_v22, %v1247_v57  ;;  %v629_v22 = vmul.f32 %v4284_v34, %v628_v13 }
 0x304   : > { %v1266_v38 = vsel %vm337_vm0, %v1234_v60, 0.0  ;;  %v1232_v49 = vmul.f32 %v1203_v44, %v4158_v27  ;;  %v1288_v29 = vrot.slane %v1287_v14, 4  ;;  %v4292_v44 = vpop.eup %3411 }
 0x305   : > { %v1267_v0 = vrot.slane %v1266_v38, 4  ;;  %v1250_v42 = vrot.slane %v1249_v33, 1  ;;  %v4296_v11 = vpop.eup %3413 }
 0x306   : > { %v1252_v56 = vsel %vm337_vm0, %v1232_v49, 0.0  ;;  %v1289_v30 = vadd.f32 %v1288_v29, %v1287_v14  ;;  %v1277_v49 = vadd.f32 %v1276_v62, %v1275_v3  ;;  %v3416_v9 = vpop.eup %3415 }
 0x307   : > { %v1253_v27 = vrot.slane %v1252_v56, 4  ;;  %v1268_v10 = vadd.f32 %v1267_v0, %v1266_v38  ;;  %v1251_v25 = vadd.f32 %v1250_v42, %v1249_v33  ;;  %v652_v33 = vmul.f32 %v4296_v11, %v3917_v46  ;;  %v4312_v36 = vpop.eup %3417 }
 0x308   : > { %v1290_v57 = vrot.slane %v1289_v30, 2  ;;  %v1278_v14 = vrot.slane %v1277_v49, 1  ;;  %v664_v3 = vmul.f32 %v3416_v9, %v3960_v2 }
 0x309   : > { %v1254_v61 = vadd.f32 %v1253_v27, %v1252_v56  ;;  %v1269_v6 = vrot.slane %v1268_v10, 2  ;;  %v1302_v38 = vsel %vm819_vm2, %v1251_v25, %v1244_v41  ;;  %v644_v56 = vmul.f32 %v4254_v54, %v643_v43 }
 0x30a   : > { %v1291_v0 = vadd.f32 %v1290_v57, %v1289_v30  ;;  %v688_v27 = vmul.f32 %v4292_v44, %v3995_v32  ;;  %v1279_v12 = vadd.f32 %v1278_v14, %v1277_v49  ;;  %v4316_v30 = vpop.eup %3419  ;;  %v653_v41 = vmul.f32 %v4296_v11, %v652_v33 }
 0x30b   : > { %v1255_v55 = vrot.slane %v1254_v61, 2  ;;  %v1270_v60 = vadd.f32 %v1269_v6, %v1268_v10  ;;  %v645_v54 = vmul.f32 %v644_v56, %v3966_v5  ;;  %v630_v10 = vmul.f32 0.5, %v629_v22 }
 0x30c   : > { %v1292_v31 = vrot.slane %v1291_v0, 1  ;;  %v665_v43 = vmul.f32 %v3416_v9, %v664_v3  ;;  %v676_v25 = vmul.f32 %v4312_v36, %v3932_v52  ;;  %v654_v57 = vmul.f32 0.5, %v653_v41 }
 0x30d   : > { %v1256_v45 = vadd.f32 %v1255_v55, %v1254_v61  ;;  %v689_v55 = vmul.f32 %v4292_v44, %v688_v27  ;;  %v631_v39 = vsub.f32 1.5, %v630_v10  ;;  %v4339_v22 = vstv %s287_s29 }
 0x30e   : > { %v1293_v6 = vadd.f32 %v1292_v31, %v1291_v0  ;;  %v637_v14 = vand.u32 2147483648, %v3924_v48 }
 0x30f   : > { %v1257_v21 = vrot.slane %v1256_v45, 1  ;;  %v690_v13 = vmul.f32 0.5, %v689_v55 }
 0x310   : > { %v1223_v47 = vpop.permute.xlu1 %1222 }
 0x311   : > { %v1236_v28 = vmul.f32 %v1223_v47, %v4169_v1  ;;  %v1258_v51 = vadd.f32 %v1257_v21, %v1256_v45  ;;  %v1271_v1 = vrot.slane %v1270_v60, 1  ;;  %v647_v47 = vsel %vm646_vm9, %v3966_v5, %v645_v54 }
 0x312   : > { %v691_v50 = vsub.f32 1.5, %v690_v13  ;;  %v697_v54 = vand.u32 2147483648, %v3995_v32  ;;  %vm670_vm9 = vcmp.eq.f32.partialorder %v3960_v2, inf }
 0x313   : > { %v1280_v7 = vsel %vm337_vm0, %v1236_v28, 0.0  ;;  %v1303_v20 = vsel %vm821_vm3, %v1258_v51, %v1302_v38  ;;  %v1272_v26 = vadd.f32 %v1271_v1, %v1270_v60  ;;  %v649_v28 = vand.u32 2147483648, %v3966_v5 }
 0x314   : > { %v1281_v59 = vrot.slane %v1280_v7, 4  ;;  %v1304_v58 = vsel %vm823_vm4, %v1265_v63, %v1303_v20  ;;  %v632_v51 = vmul.f32 %v4284_v34, %v631_v39  ;;  %v677_v5 = vmul.f32 %v4312_v36, %v676_v25 }
 0x315   : > { %v1305_v29 = vsel %vm825_vm5, %v1272_v26, %v1304_v58  ;;  %v650_v60 = vsel %vm648_vm10, %v649_v28, %v647_v47  ;;  %v692_v1 = vmul.f32 %v4292_v44, %v691_v50  ;;  %v655_v20 = vsub.f32 1.5, %v654_v57 }
 0x316   : > { %v1282_v40 = vadd.f32 %v1281_v59, %v1280_v7  ;;  %v1306_v42 = vsel %vm827_vm6, %v1279_v12, %v1305_v29  ;;  %v666_v7 = vmul.f32 0.5, %v665_v43  ;;  %v700_v59 = vmul.f32 %v4316_v30, %v4007_v53 }
 0x317   : > { %v724_v38 = vadd.f32 1.0, %v650_v60  ;;  %v633_v49 = vmul.f32 %v632_v51, %v3924_v48  ;;  %v678_v56 = vmul.f32 0.5, %v677_v5  ;;  %v656_v27 = vmul.f32 %v4296_v11, %v655_v20 }
 0x318   : > { %v1283_v15 = vrot.slane %v1282_v40, 2  ;;  %v667_v34 = vsub.f32 1.5, %v666_v7  ;;  %v701_v63 = vmul.f32 %v4316_v30, %v700_v59  ;;  %vm660_vm10 = vcmp.eq.f32.partialorder %v3917_v46, 0.0 }
 0x319   : > { %3423 = vrcp.f32 %v724_v38  ;;  %v635_v0 = vsel %vm634_vm11, %v3924_v48, %v633_v49  ;;  %v679_v33 = vsub.f32 1.5, %v678_v56  ;;  %v657_v29 = vmul.f32 %v656_v27, %v3917_v46 }
 0x31a   : > { %v1284_v61 = vadd.f32 %v1283_v15, %v1282_v40  ;;  %v4334_v40 = vpop.eup %3421  ;;  %v693_v15 = vmul.f32 %v692_v1, %v3995_v32  ;;  %v668_v58 = vmul.f32 %v3416_v9, %v667_v34  ;;  %v702_v26 = vmul.f32 0.5, %v701_v63 }
 0x31b   : > { %v712_v44 = vmul.f32 %v4334_v40, %v4014_v8  ;;  %v638_v10 = vsel %vm636_vm13, %v637_v14, %v635_v0  ;;  %v659_v39 = vsel %vm658_vm15, %v3917_v46, %v657_v29  ;;  %vm672_vm11 = vcmp.eq.f32.partialorder %v3960_v2, 0.0 }
 0x31c   : > { %v1285_v4 = vrot.slane %v1284_v61, 1  ;;  %v695_v11 = vsel %vm694_vm12, %v3995_v32, %v693_v15  ;;  %v669_v48 = vmul.f32 %v668_v58, %v3960_v2  ;;  %v703_v12 = vsub.f32 1.5, %v702_v26 }
 0x31d   : > { %v713_v55 = vmul.f32 %v4334_v40, %v712_v44  ;;  %v723_v3 = vadd.f32 1.0, %v638_v10  ;;  %v680_v32 = vmul.f32 %v4312_v36, %v679_v33  ;;  %vm682_vm12 = vcmp.eq.f32.partialorder %v3932_v52, inf }
 0x31e   : > { %v1286_v45 = vadd.f32 %v1285_v4, %v1284_v61  ;;  %v671_v13 = vsel %vm670_vm9, %v3960_v2, %v669_v48  ;;  %v704_v41 = vmul.f32 %v4316_v30, %v703_v12  ;;  %vm706_vm13 = vcmp.eq.f32.partialorder %v4007_v53, inf }
 0x31f   : > { %v3424_v4 = vpop.eup %3423  ;;  %v714_v47 = vmul.f32 0.5, %v713_v55  ;;  %3425 = vrcp.f32 %v723_v3  ;;  %v681_v36 = vmul.f32 %v680_v32, %v3932_v52  ;;  %v685_v7 = vand.u32 2147483648, %v3932_v52 }
 0x320   : > { %v1307_v21 = vsel %vm829_vm7, %v1286_v45, %v1306_v42  ;;  %v661_v42 = vand.u32 2147483648, %v3917_v46  ;;  %v705_v51 = vmul.f32 %v704_v41, %v4007_v53  ;;  %v709_v38 = vand.u32 2147483648, %v4007_v53 }
 0x321   : > { %v1308_v62 = vsel %vm831_vm8, %v1293_v6, %v1307_v21  ;;  %v698_v6 = vsel %vm696_vm14, %v697_v54, %v695_v11  ;;  %v673_v21 = vand.u32 2147483648, %v3960_v2  ;;  %v715_v46 = vsub.f32 1.5, %v714_v47 }
 0x322   : > { %3151 = vmatmul.msk.f32.vlgmr.msrb.gmra.mxu3 %vm337_vm0, %v1308_v62  ;;  %v728_v62 = vadd.f32 1.0, %v698_v6  ;;  %v662_v28 = vsel %vm660_vm10, %v661_v42, %v659_v39  ;;  %v683_v57 = vsel %vm682_vm12, %v3932_v52, %v681_v36  ;;  %vm684_vm14 = vcmp.eq.f32.partialorder %v3932_v52, 0.0 }
 0x323   : > { %v674_v43 = vsel %vm672_vm11, %v673_v21, %v671_v13  ;;  %v725_v50 = vadd.f32 1.0, %v662_v28  ;;  %v716_v49 = vmul.f32 %v4334_v40, %v715_v46  ;;  %v707_v34 = vsel %vm706_vm13, %v4007_v53, %v705_v51 }
 0x324   : > { %3427 = vrcp.f32 %v728_v62  ;;  %v726_v30 = vadd.f32 1.0, %v674_v43  ;;  %vm708_vm15 = vcmp.eq.f32.partialorder %v4007_v53, 0.0  ;;  %v686_v0 = vsel %vm684_vm14, %v685_v7, %v683_v57 }
 0x325   : > { %v3426_v5 = vpop.eup %3425  ;;  %3429 = vrcp.f32 %v725_v50  ;;  %v710_v52 = vsel %vm708_vm15, %v709_v38, %v707_v34  ;;  %v717_v27 = vmul.f32 %v716_v49, %v4014_v8  ;;  %vm718_vm9 = vcmp.eq.f32.partialorder %v4014_v8, inf }
 0x326   : > { %3431 = vrcp.f32 %v726_v30  ;;  %v727_v26 = vadd.f32 1.0, %v686_v0  ;;  %v729_v54 = vadd.f32 1.0, %v710_v52  ;;  %v721_v10 = vand.u32 2147483648, %v4014_v8 }
 0x327   : > { %vm720_vm10 = vcmp.eq.f32.partialorder %v4014_v8, 0.0 }
 0x328   : > { %3433 = vrcp.f32 %v727_v26 }
 0x329   : > { %3435 = vrcp.f32 %v729_v54 }
 0x32a   : > { %v3428_v56 = vpop.eup %3427 }
 0x32b   : > { %v3430_v33 = vpop.eup %3429 }
 0x32c   : > { %v3432_v11 = vpop.eup %3431 }
 0x32e   : > { %v599_v61 = vpop.xlane.xlu0 %598  ;;  %v3434_v36 = vpop.eup %3433 }
 0x32f   : > { %v620_v31 = vadd.f32 %v4339_v22, %v599_v61 }
 0x331   : > { %v740_v9 = vmul.f32 %v3424_v4, %v620_v31  ;;  %v719_v4 = vsel %vm718_vm9, %v4014_v8, %v717_v27 }
 0x332   : > { %v722_v6 = vsel %vm720_vm10, %v721_v10, %v719_v4 }
 0x333   : > { %v748_v45 = vmul.f32 %v740_v9, %v3881_v24  ;;  %v730_v41 = vadd.f32 1.0, %v722_v6 }
 0x335   : > { %v762_v24 = vsel %vm312_vm1, %v748_v45, 0.0  ;;  %3437 = vrcp.f32 %v730_v41 }
 0x336   : > { %v763_v60 = vrot.slane %v762_v24, 4  ;;  %v611_v25 = vpop.xlane.xlu0 %610 }
 0x337   : > { %v624_v20 = vadd.f32 %v4339_v22, %v611_v25 }
 0x338   : > { %v764_v1 = vadd.f32 %v763_v60, %v762_v24  ;;  %v3436_v60 = vpop.eup %3435 }
 0x339   : > { %v744_v40 = vmul.f32 %v3428_v56, %v624_v20 }
 0x33a   : > { %v765_v44 = vrot.slane %v764_v1, 2 }
 0x33b   : > { %v596_v2 = vpop.xlane.xlu1 %595  ;;  %v752_v55 = vmul.f32 %v744_v40, %v3871_v19 }
 0x33c   : > { %v619_v59 = vadd.f32 %v4339_v22, %v596_v2  ;;  %v766_v29 = vadd.f32 %v765_v44, %v764_v1  ;;  %v3438_v44 = vpop.eup %3437 }
 0x33d   : > { %v790_v39 = vsel %vm312_vm1, %v752_v55, 0.0 }
 0x33e   : > { %v739_v63 = vmul.f32 %v3426_v5, %v619_v59  ;;  %v767_v32 = vrot.slane %v766_v29, 1  ;;  %v791_v43 = vrot.slane %v790_v39, 4 }
 0x340   : > { %v747_v15 = vmul.f32 %v739_v63, %v3869_v18  ;;  %v768_v51 = vadd.f32 %v767_v32, %v766_v29  ;;  %v792_v49 = vadd.f32 %v791_v43, %v790_v39 }
 0x342   : > { %v755_v14 = vsel %vm312_vm1, %v747_v15, 0.0  ;;  %v602_v58 = vpop.xlane.xlu2 %601  ;;  %v793_v40 = vrot.slane %v792_v49, 2 }
 0x343   : > { %v756_v61 = vrot.slane %v755_v14, 4  ;;  %v621_v53 = vadd.f32 %v4339_v22, %v602_v58  ;;  %v605_v31 = vpop.xlane.xlu1 %604 }
 0x344   : > { %v622_v18 = vadd.f32 %v4339_v22, %v605_v31  ;;  %v794_v54 = vadd.f32 %v793_v40, %v792_v49 }
 0x345   : > { %v757_v9 = vadd.f32 %v756_v61, %v755_v14  ;;  %v741_v48 = vmul.f32 %v3430_v33, %v621_v53 }
 0x346   : > { %v742_v12 = vmul.f32 %v3432_v11, %v622_v18  ;;  %v795_v55 = vrot.slane %v794_v54, 1 }
 0x347   : > { %v758_v3 = vrot.slane %v757_v9, 2  ;;  %v749_v45 = vmul.f32 %v741_v48, %v3867_v17 }
 0x348   : > { %v750_v42 = vmul.f32 %v742_v12, %v3879_v23  ;;  %v796_v6 = vadd.f32 %v795_v55, %v794_v54  ;;  %v1390_v55 = vld [vmem:[%s5410_s2 + $0x158] sm:$0xff] }
 0x349   : > { %v759_v21 = vadd.f32 %v758_v3, %v757_v9  ;;  %v769_v8 = vsel %vm312_vm1, %v749_v45, 0.0 }
 0x34a   : > { %v770_v47 = vrot.slane %v769_v8, 4  ;;  %v776_v19 = vsel %vm312_vm1, %v750_v42, 0.0  ;;  %v608_v13 = vpop.xlane.xlu2 %607 }
 0x34b   : > { %v760_v24 = vrot.slane %v759_v21, 1  ;;  %v777_v62 = vrot.slane %v776_v19, 4  ;;  %v623_v28 = vadd.f32 %v4339_v22, %v608_v13  ;;  %v614_v17 = vpop.xlane.xlu1 %613  ;;  %v3736_v13 = vld [vmem:[%s3858_s26] sm:$0xff] }
 0x34c   : > { %v771_v46 = vadd.f32 %v770_v47, %v769_v8  ;;  %v625_v23 = vadd.f32 %v4339_v22, %v614_v17 }
 0x34d   : > { %v761_v25 = vadd.f32 %v760_v24, %v759_v21  ;;  %v778_v50 = vadd.f32 %v777_v62, %v776_v19  ;;  %v743_v2 = vmul.f32 %v3434_v36, %v623_v28 }
 0x34e   : > { %v772_v30 = vrot.slane %v771_v46, 2  ;;  %v745_v57 = vmul.f32 %v3436_v60, %v625_v23 }
 0x34f   : > { %v820_v7 = vsel %vm819_vm2, %v768_v51, %v761_v25  ;;  %v779_v59 = vrot.slane %v778_v50, 2  ;;  %v751_v38 = vmul.f32 %v743_v2, %v3865_v16 }
 0x350   : > { %v773_v5 = vadd.f32 %v772_v30, %v771_v46  ;;  %v753_v1 = vmul.f32 %v745_v57, %v3897_v37 }
 0x351   : > { %v783_v20 = vsel %vm312_vm1, %v751_v38, 0.0  ;;  %v780_v34 = vadd.f32 %v779_v59, %v778_v50 }
 0x352   : > { %v784_v63 = vrot.slane %v783_v20, 4  ;;  %v797_v0 = vsel %vm312_vm1, %v753_v1, 0.0  ;;  %v617_v56 = vpop.xlane.xlu2 %616  ;;  %v774_v15 = vrot.slane %v773_v5, 1 }
 0x353   : > { %v798_v52 = vrot.slane %v797_v0, 4  ;;  %v626_v27 = vadd.f32 %v4339_v22, %v617_v56  ;;  %v781_v26 = vrot.slane %v780_v34, 1 }
 0x354   : > { %v785_v14 = vadd.f32 %v784_v63, %v783_v20  ;;  %v775_v53 = vadd.f32 %v774_v15, %v773_v5 }
 0x355   : > { %v799_v58 = vadd.f32 %v798_v52, %v797_v0  ;;  %v746_v16 = vmul.f32 %v3438_v44, %v626_v27  ;;  %v782_v4 = vadd.f32 %v781_v26, %v780_v34  ;;  %v856_v26 = vld [vmem:[%s5410_s2 + $0x108] sm:$0xff] }
 0x356   : > { %v786_v61 = vrot.slane %v785_v14, 2  ;;  %v822_v22 = vsel %vm821_vm3, %v775_v53, %v820_v7 }
 0x357   : > { %v800_v37 = vrot.slane %v799_v58, 2  ;;  %v754_v31 = vmul.f32 %v746_v16, %v3894_v35  ;;  %v824_v3 = vsel %vm823_vm4, %v782_v4, %v822_v22  ;;  %v857_v16 = vld [vmem:[%s5410_s2 + $0x110] sm:$0xff] }
 0x358   : > { %v787_v10 = vadd.f32 %v786_v61, %v785_v14  ;;  %v855_v61 = vld [vmem:[%s5410_s2 + $0x100] sm:$0xff] }
 0x359   : > { %v801_v33 = vadd.f32 %v800_v37, %v799_v58  ;;  %v804_v18 = vsel %vm312_vm1, %v754_v31, 0.0  ;;  %v858_v58 = vld [vmem:[%s5410_s2 + $0x118] sm:$0xff]  ;;  %v3231_v37 = vld [vmem:[%s5411_s3 + $0x8] ss:$0 sm:$0xff] }
 0x35a   : > { %v788_v11 = vrot.slane %v787_v10, 1  ;;  %v805_v29 = vrot.slane %v804_v18, 4  ;;  %1375 = vmatpush.msra.mxu3 %v858_v58 }
 0x35b   : > { %v802_v12 = vrot.slane %v801_v33, 1 }
 0x35c   : > { %v789_v9 = vadd.f32 %v788_v11, %v787_v10  ;;  %v806_v48 = vadd.f32 %v805_v29, %v804_v18  ;;  %1376 = vmatpush.msra.mxu3 %v857_v16 }
 0x35d   : > { %v803_v32 = vadd.f32 %v802_v12, %v801_v33  ;;  %v1389_v12 = vld [vmem:[%s5410_s2 + $0x150] sm:$0xff] }
 0x35e   : > { %v807_v45 = vrot.slane %v806_v48, 2  ;;  %v826_v35 = vsel %vm825_vm5, %v789_v9, %v824_v3  ;;  %1377 = vmatpush.msra.mxu3 %v856_v26  ;;  %v1386_v9 = vld [vmem:[%s5410_s2 + $0x138] sm:$0xff]  ;;  %v1385_v3 = vld [vmem:[%s5410_s2 + $0x130] sm:$0xff] }
 0x35f   : > { %v828_v39 = vsel %vm827_vm6, %v796_v6, %v826_v35  ;;  %1463 = vmatpush.msra.mxu0 %v1386_v9  ;;  %v1388_v35 = vld [vmem:[%s5410_s2 + $0x148] sm:$0xff] }
 0x360   : > { %v808_v42 = vadd.f32 %v807_v45, %v806_v48  ;;  %v830_v47 = vsel %vm829_vm7, %v803_v32, %v828_v39  ;;  %1378 = vmatpush.msra.mxu3 %v855_v61  ;;  %v1953_v48 = vld [vmem:[%s5410_s2 + $0x1f8] sm:$0xff]  ;;  %v1952_v45 = vld [vmem:[%s5410_s2 + $0x1f0] sm:$0xff]  ;;  %v1384_v6 = vld [vmem:[%s5410_s2 + $0x128] sm:$0xff] }
 0x361   : > { %2446 = vmatpush.msra.mxu1 %v1953_v48  ;;  %1464 = vmatpush.msra.mxu0 %v1385_v3  ;;  %v1387_v32 = vld [vmem:[%s5410_s2 + $0x140] sm:$0xff] }
 0x362   : > { %v809_v21 = vrot.slane %v808_v42, 1  ;;  %1483 = vmatpush.msrb.mxu3 %v1390_v55  ;;  %v1383_v39 = vld [vmem:[%s5410_s2 + $0x120] sm:$0xff] }
 0x363   : > { %2447 = vmatpush.msra.mxu1 %v1952_v45  ;;  %1465 = vmatpush.msra.mxu0 %v1384_v6  ;;  %v1946_v3 = vld [vmem:[%s5410_s2 + $0x1c0] sm:$0xff]  ;;  %v4632_v6 = vld [vmem:[%s5411_s3 + $0xe] ss:$0 sm:$0xff] }
 0x364   : > { %v810_v8 = vadd.f32 %v809_v21, %v808_v42  ;;  %1484 = vmatpush.msrb.mxu3 %v1389_v12  ;;  %v1951_v42 = vld [vmem:[%s5410_s2 + $0x1e8] sm:$0xff]  ;;  %v1950_v21 = vld [vmem:[%s5410_s2 + $0x1e0] sm:$0xff] }
 0x365   : > { %2448 = vmatpush.msra.mxu1 %v1951_v42  ;;  %1466 = vmatpush.msra.mxu0 %v1383_v39 }
 0x366   : > { %v832_v19 = vsel %vm831_vm8, %v810_v8, %v830_v47  ;;  %1485 = vmatpush.msrb.mxu3 %v1388_v35  ;;  %v1941_v8 = vld [vmem:[%s5410_s2 + $0x198] sm:$0xff]  ;;  %v1940_v47 = vld [vmem:[%s5410_s2 + $0x190] sm:$0xff] }
 0x367   : > { %v4412_v41 = vadd.f32 %v3736_v13, %v832_v19  ;;  %2449 = vmatpush.msra.mxu1 %v1950_v21  ;;  %v1939_v19 = vld [vmem:[%s5410_s2 + $0x188] sm:$0xff]  ;;  %v1938_v13 = vld [vmem:[%s5410_s2 + $0x180] sm:$0xff] }
 0x368   : > { %1486 = vmatpush.msrb.mxu3 %v1387_v32 }
 0x369   : > { %v1402_v24 = vperm.slane %v4412_v41, 2  ;;  %v1401_v62 = vperm.slane %v4412_v41, 1  ;;  %v1400_v28 = vperm.slane %v4412_v41, 0  ;;  %v1405_v17 = vperm.slane %v4412_v41, 5  ;;  %v1348_v53 = vpop.f32.mrf.mxu0 }
 0x36a   : > { %v1404_v23 = vperm.slane %v4412_v41, 4  ;;  %v1403_v60 = vperm.slane %v4412_v41, 3  ;;  %v1407_v1 = vperm.slane %v4412_v41, 7  ;;  %v1406_v34 = vperm.slane %v4412_v41, 6 }
 0x36b   : > { %v4419_v36 = vsub.f32 %v4412_v41, %v1402_v24  ;;  %v4422_v43 = vsub.f32 %v4412_v41, %v1401_v62  ;;  %v4425_v46 = vsub.f32 %v4412_v41, %v1400_v28  ;;  %v4436_v2 = vsub.f32 %v4412_v41, %v1405_v17  ;;  %v3232_v24 = vld [vmem:[%s5411_s3 + $0x9] ss:$0 sm:$0xff]  ;;  %v1945_v17 = vld [vmem:[%s5410_s2 + $0x1b8] sm:$0xff] }
 0x36c   : > { %v4442_v59 = vsub.f32 %v4412_v41, %v1404_v23  ;;  %v4445_v38 = vsub.f32 %v4412_v41, %v1403_v60  ;;  %v4458_v56 = vsub.f32 %v4412_v41, %v1407_v1  ;;  %v4462_v52 = vsub.f32 %v4412_v41, %v1406_v34  ;;  %v1944_v23 = vld [vmem:[%s5410_s2 + $0x1b0] sm:$0xff]  ;;  %v1943_v60 = vld [vmem:[%s5410_s2 + $0x1a8] sm:$0xff] }
 0x36d   : > { %v1418_v51 = vmul.f32 %v4419_v36, %v4419_v36  ;;  %v1417_v25 = vmul.f32 %v4422_v43, %v4422_v43  ;;  %v1416_v50 = vmul.f32 %v4425_v46, %v4425_v46  ;;  %v1421_v49 = vmul.f32 %v4436_v2, %v4436_v2 }
 0x36e   : > { %v1420_v5 = vmul.f32 %v4442_v59, %v4442_v59  ;;  %v1419_v20 = vmul.f32 %v4445_v38, %v4445_v38  ;;  %v1423_v27 = vmul.f32 %v4458_v56, %v4458_v56  ;;  %v1422_v44 = vmul.f32 %v4462_v52, %v4462_v52 }
 0x36f   : > { %v1430_v30 = vsel %vm312_vm1, %v1418_v51, 0.0  ;;  %v1427_v57 = vsel %vm312_vm1, %v1417_v25, 0.0  ;;  %v1424_v7 = vsel %vm312_vm1, %v1416_v50, 0.0  ;;  %v1439_v63 = vsel %vm312_vm1, %v1421_v49, 0.0  ;;  %v1942_v51 = vld [vmem:[%s5410_s2 + $0x1a0] sm:$0xff]  ;;  %v1394_v25 = vld [vmem:[%s5410_s2 + $0x178] sm:$0xff] }
 0x370   : > { %1431 = vadd.xlane.f32.xlu2 %v1430_v30  ;;  %1428 = vadd.xlane.f32.xlu1 %v1427_v57  ;;  %v1436_v0 = vsel %vm312_vm1, %v1420_v5, 0.0  ;;  %v1433_v15 = vsel %vm312_vm1, %v1419_v20, 0.0  ;;  %v1445_v40 = vsel %vm312_vm1, %v1423_v27, 0.0  ;;  %v1442_v14 = vsel %vm312_vm1, %v1422_v44, 0.0  ;;  %v1393_v50 = vld [vmem:[%s5410_s2 + $0x170] sm:$0xff]  ;;  %v1392_v30 = vld [vmem:[%s5410_s2 + $0x168] sm:$0xff] }
 0x371   : > { %1425 = vadd.xlane.f32.xlu0 %v1424_v7  ;;  %1618 = vmatpush.msrb.mxu0 %v1394_v25  ;;  %v1391_v57 = vld [vmem:[%s5410_s2 + $0x160] sm:$0xff]  ;;  %v4571_v49 = vld [vmem:[%s5411_s3 + $0xa] ss:$0 sm:$0xff] }
 0x373   : > { %1619 = vmatpush.msrb.mxu0 %v1393_v50  ;;  %v4657_v50 = vld [vmem:[%s5411_s3 + $0xf] ss:$0 sm:$0xff] }
 0x375   : > { %1620 = vmatpush.msrb.mxu0 %v1392_v30 }
 0x377   : > { %1621 = vmatpush.msrb.mxu0 %v1391_v57 }
 0x378   : > { %1440 = vadd.xlane.f32.xlu2 %v1439_v63  ;;  %1437 = vadd.xlane.f32.xlu1 %v1436_v0 }
 0x379   : > { %1434 = vadd.xlane.f32.xlu0 %v1433_v15 }
 0x380   : > { %1446 = vadd.xlane.f32.xlu1 %v1445_v40 }
 0x381   : > { %1443 = vadd.xlane.f32.xlu0 %v1442_v14  ;;  %v4592_v14 = vld [vmem:[%s5411_s3 + $0xb] ss:$0 sm:$0xff] }
 0x3a5   : > { %v1328_v31 = vpop.f32.mrf.mxu3 }
 0x3a6   : > { %v1349_v54 = vadd.f32 %v1348_v53, %v1328_v31 }
 0x3a8   : > { %v1352_v10 = vadd.f32 %v3231_v37, %v1349_v54  ;;  %v1949_v54 = vld [vmem:[%s5410_s2 + $0x1d8] sm:$0xff] }
 0x3aa   : > { %v1353_v33 = vsub.f32 0.0, %v1352_v10 }
 0x3ac   : > { %v1354_v18 = vmul.f32 1.442695, %v1353_v33 }
 0x3ae   : > { %3439 = vpow2.f32 %v1354_v18 }
 0x3b4   : > { %v3440_v4 = vpop.eup %3439 }
 0x3b5   : > { %v1356_v11 = vadd.f32 1.0, %v3440_v4 }
 0x3b7   : > { %3441 = vrcp.f32 %v1356_v11 }
 0x3bd   : > { %v3442_v29 = vpop.eup %3441 }
 0x3be   : > { %v1358_v22 = vmul.f32 %v3442_v29, %v1352_v10  ;;  %v1948_v10 = vld [vmem:[%s5410_s2 + $0x1d0] sm:$0xff] }
 0x3c0   : > { %3153 = vmatmul.msk.f32.vlgmr.msra.gmra.mxu3 %vm337_vm0, %v1358_v22  ;;  %v1947_v22 = vld [vmem:[%s5410_s2 + $0x1c8] sm:$0xff] }
 0x3c1   : > { %1980 = vmatpush.msra.mxu3 %v1941_v8 }
 0x3c3   : > { %1981 = vmatpush.msra.mxu3 %v1940_v47 }
 0x3c5   : > { %1982 = vmatpush.msra.mxu3 %v1939_v19 }
 0x3c7   : > { %1983 = vmatpush.msra.mxu3 %v1938_v13 }
 0x3e3   : > { %v4573_v5 = vpop.xlane.xlu1 %1428  ;;  %v4580_v0 = vpop.xlane.xlu2 %1431 }
 0x3e4   : > { %v4575_v1 = vpop.xlane.xlu0 %1425  ;;  %v1509_v27 = vmul.f32 %v4571_v49, %v4573_v5  ;;  %v1510_v53 = vmul.f32 %v4571_v49, %v4580_v0  ;;  %vm1756_vm14 = vcmp.eq.f32.partialorder %v4573_v5, inf  ;;  %vm1758_vm9 = vcmp.eq.f32.partialorder %v4573_v5, 0.0 }
 0x3e5   : > { %v1508_v40 = vmul.f32 %v4571_v49, %v4575_v1  ;;  %vm1744_vm11 = vcmp.eq.f32.partialorder %v4575_v1, inf  ;;  %vm1746_vm12 = vcmp.eq.f32.partialorder %v4575_v1, 0.0  ;;  %vm1768_vm10 = vcmp.eq.f32.partialorder %v4580_v0, inf }
 0x3eb   : > { %v4634_v32 = vpop.xlane.xlu1 %1437 }
 0x3ec   : > { %v4611_v4 = vpop.xlane.xlu0 %1434 }
 0x3ed   : > { %v1511_v35 = vmul.f32 %v4571_v49, %v4611_v4  ;;  %vm1780_vm13 = vcmp.eq.f32.partialorder %v4611_v4, inf  ;;  %vm1782_vm15 = vcmp.eq.f32.partialorder %v4611_v4, 0.0 }
 0x443   : > { %v1380_v62 = vpop.f32.mrf.mxu3 }
 0x444   : > { %v1381_v28 = vadd.f32 %v3232_v24, %v1380_v62  ;;  %v2025_v62 = vmul.f32 %v4632_v6, %v4575_v1 }
 0x446   : > { %3155 = vmatmul.msk.f32.vlgmr.msra.gmra.mxu0 %vm337_vm0, %v1381_v28  ;;  %3156 = vmatmul.msk.f32.vlgmr.msrb.gmra.mxu3 %vm337_vm0, %v1381_v28 }
 0x447   : > { %3176 = vmatmul.msk.f32.vlgmr.msra.gmra.mxu1 %vm337_vm0, %v1381_v28  ;;  %2000 = vmatpush.msrb.mxu3 %v1945_v17  ;;  %v2026_v17 = vmul.f32 %v4632_v6, %v4573_v5 }
 0x449   : > { %2001 = vmatpush.msrb.mxu3 %v1944_v23  ;;  %v1512_v23 = vmul.f32 %v4571_v49, %v4634_v32 }
 0x44b   : > { %2002 = vmatpush.msrb.mxu3 %v1943_v60 }
 0x44d   : > { %2003 = vmatpush.msrb.mxu3 %v1942_v51 }
 0x44e   : > { %3165 = vmatmul.msk.f32.vlgmr.msra.gmra.mxu3 %vm337_vm0, %v1381_v28 }
 0x44f   : > { %2135 = vmatpush.msra.mxu3 %v1949_v54 }
 0x451   : > { %2136 = vmatpush.msra.mxu3 %v1948_v10  ;;  %v4671_v10 = vpop.xlane.xlu2 %1440 }
 0x453   : > { %2137 = vmatpush.msra.mxu3 %v1947_v22 }
 0x455   : > { %2138 = vmatpush.msra.mxu3 %v1946_v3 }
 0x456   : > { %3166 = vmatmul.msk.f32.vlgmr.msrb.gmra.mxu3 %vm337_vm0, %v1381_v28 }
 0x4c3   : > { %v4566_v7 = vpop.f32.mrf.mxu0 }
 0x4c4   : > { %v1491_v20 = vperm.slane %v4566_v7, 0  ;;  %v1492_v34 = vperm.slane %v4566_v7, 1  ;;  %v1493_v63 = vperm.slane %v4566_v7, 2  ;;  %v1494_v18 = vperm.slane %v4566_v7, 3 }
 0x4c5   : > { %v1495_v21 = vperm.slane %v4566_v7, 4  ;;  %v1496_v54 = vperm.slane %v4566_v7, 5 }
 0x4c9   : > { %v4582_v15 = vpop.f32.mrf.mxu3 }
 0x4ca   : > { %v1499_v44 = vadd.f32 %v1491_v20, %v4582_v15  ;;  %v1500_v58 = vadd.f32 %v1492_v34, %v4582_v15  ;;  %v1501_v16 = vadd.f32 %v1493_v63, %v4582_v15  ;;  %v1502_v9 = vadd.f32 %v1494_v18, %v4582_v15 }
 0x4cb   : > { %v1503_v19 = vadd.f32 %v1495_v21, %v4582_v15 }
 0x4cc   : > { %v1516_v26 = vadd.f32 %v1508_v40, %v1499_v44  ;;  %v1517_v61 = vadd.f32 %v1509_v27, %v1500_v58  ;;  %v1518_v33 = vadd.f32 %v1510_v53, %v1501_v16  ;;  %v1519_v42 = vadd.f32 %v1511_v35, %v1502_v9 }
 0x4cd   : > { %v1520_v44 = vadd.f32 %v1512_v23, %v1503_v19  ;;  %v2027_v40 = vmul.f32 %v4632_v6, %v4580_v0  ;;  %v1504_v9 = vadd.f32 %v1496_v54, %v4582_v15  ;;  %v2028_v19 = vmul.f32 %v4632_v6, %v4611_v4 }
 0x4ce   : > { %v4599_v37 = vadd.f32 %v4592_v14, %v1516_v26  ;;  %v4602_v31 = vadd.f32 %v4592_v14, %v1517_v61  ;;  %v4625_v45 = vadd.f32 %v4592_v14, %v1518_v33  ;;  %v4647_v28 = vadd.f32 %v4592_v14, %v1519_v42 }
 0x4d0   : > { %v1533_v11 = vsub.f32 0.0, %v4599_v37  ;;  %v1534_v29 = vsub.f32 0.0, %v4602_v31  ;;  %v1535_v39 = vsub.f32 0.0, %v4625_v45  ;;  %v1536_v58 = vsub.f32 0.0, %v4647_v28 }
 0x4d1   : > { %v4618_v55 = vpop.f32.mrf.mxu3 }
 0x4d2   : > { %v1541_v48 = vmul.f32 1.442695, %v1533_v11  ;;  %v1543_v12 = vmul.f32 1.442695, %v1534_v29  ;;  %v2008_v8 = vperm.slane %v4618_v55, 0  ;;  %v2009_v47 = vperm.slane %v4618_v55, 1 }
 0x4d3   : > { %v2010_v13 = vperm.slane %v4618_v55, 2  ;;  %v1545_v51 = vmul.f32 1.442695, %v1535_v39  ;;  %v4676_v11 = vadd.f32 %v4592_v14, %v1520_v44  ;;  %v2011_v29 = vperm.slane %v4618_v55, 3 }
 0x4d4   : > { %3443 = vpow2.f32 %v1541_v48  ;;  %v1547_v22 = vmul.f32 1.442695, %v1536_v58  ;;  %v1513_v39 = vmul.f32 %v4571_v49, %v4671_v10 }
 0x4d5   : > { %3445 = vpow2.f32 %v1543_v12 }
 0x4d9   : > { %v4642_v24 = vpop.f32.mrf.mxu3 }
 0x4da   : > { %v3444_v60 = vpop.eup %3443  ;;  %v2016_v25 = vadd.f32 %v2008_v8, %v4642_v24  ;;  %v2017_v30 = vadd.f32 %v2009_v47, %v4642_v24  ;;  %v2018_v57 = vadd.f32 %v2010_v13, %v4642_v24  ;;  %v2019_v35 = vadd.f32 %v2011_v29, %v4642_v24 }
 0x4db   : > { %v1557_v20 = vadd.f32 1.0, %v3444_v60  ;;  %v3446_v34 = vpop.eup %3445  ;;  %v1537_v47 = vsub.f32 0.0, %v4676_v11  ;;  %v1521_v13 = vadd.f32 %v1513_v39, %v1504_v9  ;;  %v1497_v60 = vperm.slane %v4566_v7, 6 }
 0x4dc   : > { %v2033_v63 = vadd.f32 %v2025_v62, %v2016_v25  ;;  %v2034_v27 = vadd.f32 %v2026_v17, %v2017_v30  ;;  %v2035_v61 = vadd.f32 %v2027_v40, %v2018_v57  ;;  %v1558_v53 = vadd.f32 1.0, %v3446_v34 }
 0x4dd   : > { %3447 = vrcp.f32 %v1557_v20  ;;  %v2036_v17 = vadd.f32 %v2028_v19, %v2019_v35  ;;  %v2012_v25 = vperm.slane %v4618_v55, 4  ;;  %v4697_v57 = vadd.f32 %v4592_v14, %v1521_v13 }
 0x4de   : > { %3449 = vpow2.f32 %v1545_v51  ;;  %v4665_v16 = vadd.f32 %v4657_v50, %v2033_v63  ;;  %v4668_v26 = vadd.f32 %v4657_v50, %v2034_v27  ;;  %v4681_v3 = vadd.f32 %v4657_v50, %v2035_v61  ;;  %v4693_v51 = vpop.xlane.xlu0 %1443 }
 0x4df   : > { %3451 = vrcp.f32 %v1558_v53  ;;  %v1505_v20 = vadd.f32 %v1497_v60, %v4582_v15  ;;  %v4701_v27 = vadd.f32 %v4657_v50, %v2036_v17  ;;  %v2020_v44 = vadd.f32 %v2012_v25, %v4642_v24 }
 0x4e0   : > { %v2050_v33 = vsub.f32 0.0, %v4665_v16  ;;  %v2051_v18 = vsub.f32 0.0, %v4668_v26  ;;  %v2052_v62 = vsub.f32 0.0, %v4681_v3  ;;  %v1514_v61 = vmul.f32 %v4571_v49, %v4693_v51 }
 0x4e1   : > { %v2053_v9 = vsub.f32 0.0, %v4701_v27  ;;  %v1498_v35 = vperm.slane %v4566_v7, 7 }
 0x4e2   : > { %v2058_v48 = vmul.f32 1.442695, %v2050_v33  ;;  %v2060_v12 = vmul.f32 1.442695, %v2051_v18  ;;  %v2062_v63 = vmul.f32 1.442695, %v2052_v62  ;;  %v2029_v33 = vmul.f32 %v4632_v6, %v4634_v32 }
 0x4e3   : > { %v3448_v42 = vpop.eup %3447  ;;  %v1538_v18 = vsub.f32 0.0, %v4697_v57  ;;  %v1522_v29 = vadd.f32 %v1514_v61, %v1505_v20  ;;  %v2064_v13 = vmul.f32 1.442695, %v2053_v9 }
 0x4e4   : > { %v3450_v21 = vpop.eup %3449  ;;  %v1573_v8 = vmul.f32 %v3448_v42, %v4599_v37  ;;  %3453 = vpow2.f32 %v2058_v48  ;;  %v1549_v37 = vmul.f32 1.442695, %v1537_v47  ;;  %v2037_v48 = vadd.f32 %v2029_v33, %v2020_v44  ;;  %v4713_v42 = vpop.xlane.xlu1 %1446 }
 0x4e5   : > { %3455 = vpow2.f32 %v1547_v22  ;;  %v1559_v23 = vadd.f32 1.0, %v3450_v21  ;;  %v3452_v30 = vpop.eup %3451  ;;  %v1551_v21 = vmul.f32 1.442695, %v1538_v18  ;;  %v1506_v47 = vadd.f32 %v1498_v35, %v4582_v15 }
 0x4e6   : > { %3157 = vmatmul.msk.f32.vlgmr.msrb.gmra.mxu0 %vm337_vm0, %v1573_v8  ;;  %3457 = vpow2.f32 %v2060_v12  ;;  %v1574_v54 = vmul.f32 %v3452_v30, %v4602_v31  ;;  %v2013_v31 = vperm.slane %v4618_v55, 5  ;;  %v4717_v8 = vadd.f32 %v4592_v14, %v1522_v29 }
 0x4e7   : > { %3459 = vrcp.f32 %v1559_v23  ;;  %v4721_v62 = vadd.f32 %v4657_v50, %v2037_v48  ;;  %v1515_v23 = vmul.f32 %v4571_v49, %v4713_v42  ;;  %v2030_v15 = vmul.f32 %v4632_v6, %v4671_v10 }
 0x4e8   : > { %3461 = vpow2.f32 %v1549_v37  ;;  %v2021_v17 = vadd.f32 %v2013_v31, %v4642_v24  ;;  %v1539_v30 = vsub.f32 0.0, %v4717_v8  ;;  %v2031_v48 = vmul.f32 %v4632_v6, %v4693_v51 }
 0x4e9   : > { %v1523_v20 = vadd.f32 %v1515_v23, %v1506_v47  ;;  %v2054_v49 = vsub.f32 0.0, %v4721_v62 }
 0x4ea   : > { %v3454_v34 = vpop.eup %3453 }
 0x4eb   : > { %v3456_v40 = vpop.eup %3455  ;;  %v2074_v58 = vadd.f32 1.0, %v3454_v34  ;;  %v4736_v61 = vadd.f32 %v4592_v14, %v1523_v20 }
 0x4ec   : > { %v3458_v53 = vpop.eup %3457  ;;  %v1560_v22 = vadd.f32 1.0, %v3456_v40 }
 0x4ed   : > { %3463 = vrcp.f32 %v2074_v58  ;;  %v2075_v12 = vadd.f32 1.0, %v3458_v53  ;;  %v3460_v39 = vpop.eup %3459  ;;  %v1553_v58 = vmul.f32 1.442695, %v1539_v30  ;;  %v2066_v53 = vmul.f32 1.442695, %v2054_v49 }
 0x4ee   : > { %3158 = vmatmul.msk.f32.gmra.mxu0 %vm337_vm0, %v1574_v54  ;;  %3465 = vpow2.f32 %v2062_v63  ;;  %v3462_v19 = vpop.eup %3461  ;;  %v1575_v37 = vmul.f32 %v3460_v39, %v4625_v45  ;;  %v2038_v63 = vadd.f32 %v2030_v15, %v2021_v17  ;;  %v1540_v14 = vsub.f32 0.0, %v4736_v61 }
 0x4ef   : > { %3467 = vrcp.f32 %v1560_v22  ;;  %v1561_v34 = vadd.f32 1.0, %v3462_v19 }
 0x4f0   : > { %3469 = vrcp.f32 %v2075_v12  ;;  %v4739_v54 = vadd.f32 %v4657_v50, %v2038_v63  ;;  %v1555_v47 = vmul.f32 1.442695, %v1540_v14 }
 0x4f1   : > { %3471 = vpow2.f32 %v1551_v21 }
 0x4f2   : > { %3473 = vpow2.f32 %v2064_v13  ;;  %v2055_v35 = vsub.f32 0.0, %v4739_v54 }
 0x4f3   : > { %v3464_v7 = vpop.eup %3463  ;;  %3475 = vrcp.f32 %v1561_v34 }
 0x4f4   : > { %v3466_v60 = vpop.eup %3465  ;;  %v2090_v25 = vmul.f32 %v3464_v7, %v4665_v16  ;;  %v2014_v16 = vperm.slane %v4618_v55, 6  ;;  %v2068_v19 = vmul.f32 1.442695, %v2055_v35 }
 0x4f5   : > { %v2076_v44 = vadd.f32 1.0, %v3466_v60  ;;  %v3468_v45 = vpop.eup %3467 }
 0x4f6   : > { %3159 = vmatmul.msk.f32.gmra.mxu0 %vm337_vm0, %v1575_v37  ;;  %3167 = vmatmul.msk.f32.vlgmr.msra.gmra.mxu3 %vm337_vm0, %v2090_v25  ;;  %v3470_v40 = vpop.eup %3469  ;;  %v2022_v33 = vadd.f32 %v2014_v16, %v4642_v24  ;;  %v1576_v22 = vmul.f32 %v3468_v45, %v4647_v28  ;;  %v2015_v28 = vperm.slane %v4618_v55, 7  ;;  %v2032_v25 = vmul.f32 %v4632_v6, %v4713_v42 }
 0x4f7   : > { %v3472_v18 = vpop.eup %3471  ;;  %3477 = vrcp.f32 %v2076_v44  ;;  %v2091_v9 = vmul.f32 %v3470_v40, %v4668_v26 }
 0x4f8   : > { %v3474_v29 = vpop.eup %3473  ;;  %3479 = vpow2.f32 %v1553_v58  ;;  %v1562_v12 = vadd.f32 1.0, %v3472_v18  ;;  %v2039_v31 = vadd.f32 %v2031_v48, %v2022_v33  ;;  %v2023_v17 = vadd.f32 %v2015_v28, %v4642_v24 }
 0x4f9   : > { %3481 = vpow2.f32 %v2066_v53  ;;  %v2077_v39 = vadd.f32 1.0, %v3474_v29  ;;  %v3476_v21 = vpop.eup %3475 }
 0x4fa   : > { %3483 = vrcp.f32 %v1562_v12  ;;  %v2048_v13 = vadd.f32 %v4657_v50, %v2039_v31  ;;  %v1577_v60 = vmul.f32 %v3476_v21, %v4676_v11  ;;  %v2040_v30 = vadd.f32 %v2032_v25, %v2023_v17 }
 0x4fb   : > { %3485 = vrcp.f32 %v2077_v39 }
 0x4fc   : > { %3487 = vpow2.f32 %v1555_v47  ;;  %v2056_v15 = vsub.f32 0.0, %v2048_v13  ;;  %v2049_v11 = vadd.f32 %v4657_v50, %v2040_v30 }
 0x4fd   : > { %v3478_v26 = vpop.eup %3477  ;;  %3489 = vpow2.f32 %v2068_v19 }
 0x4fe   : > { %3160 = vmatmul.msk.f32.gmra.mxu0 %vm337_vm0, %v1576_v22  ;;  %3168 = vmatmul.msk.f32.gmra.mxu3 %vm337_vm0, %v2091_v9  ;;  %v3480_v7 = vpop.eup %3479  ;;  %v2092_v37 = vmul.f32 %v3478_v26, %v4681_v3  ;;  %v2070_v49 = vmul.f32 1.442695, %v2056_v15  ;;  %v2057_v16 = vsub.f32 0.0, %v2049_v11  ;;  %v4785_v15 = vld [vmem:[%s5411_s3 + $0x11] ss:$0 sm:$0xff] }
 0x4ff   : > { %v3482_v23 = vpop.eup %3481  ;;  %v1563_v55 = vadd.f32 1.0, %v3480_v7 }
 0x500   : > { %v2078_v24 = vadd.f32 1.0, %v3482_v23  ;;  %v3484_v20 = vpop.eup %3483  ;;  %v2072_v33 = vmul.f32 1.442695, %v2057_v16 }
 0x501   : > { %v3486_v34 = vpop.eup %3485  ;;  %3491 = vrcp.f32 %v1563_v55  ;;  %v1578_v6 = vmul.f32 %v3484_v20, %v4697_v57 }
 0x502   : > { %v3488_v3 = vpop.eup %3487  ;;  %3493 = vrcp.f32 %v2078_v24  ;;  %v2093_v44 = vmul.f32 %v3486_v34, %v4701_v27 }
 0x503   : > { %v3490_v63 = vpop.eup %3489  ;;  %v1564_v45 = vadd.f32 1.0, %v3488_v3  ;;  %3495 = vpow2.f32 %v2070_v49 }
 0x504   : > { %v2079_v40 = vadd.f32 1.0, %v3490_v63 }
 0x505   : > { %3497 = vrcp.f32 %v1564_v45 }
 0x506   : > { %3161 = vmatmul.msk.f32.gmra.mxu0 %vm337_vm0, %v1577_v60  ;;  %3169 = vmatmul.msk.f32.gmra.mxu3 %vm337_vm0, %v2092_v37  ;;  %3499 = vrcp.f32 %v2079_v40 }
 0x507   : > { %v3492_v58 = vpop.eup %3491  ;;  %3501 = vpow2.f32 %v2072_v33 }
 0x508   : > { %v3494_v53 = vpop.eup %3493  ;;  %v1579_v18 = vmul.f32 %v3492_v58, %v4717_v8 }
 0x509   : > { %v3496_v50 = vpop.eup %3495  ;;  %v2094_v57 = vmul.f32 %v3494_v53, %v4721_v62 }
 0x50a   : > { %v2080_v27 = vadd.f32 1.0, %v3496_v50 }
 0x50b   : > { %v3498_v29 = vpop.eup %3497 }
 0x50c   : > { %v3500_v22 = vpop.eup %3499  ;;  %3503 = vrcp.f32 %v2080_v27  ;;  %v1580_v48 = vmul.f32 %v3498_v29, %v4736_v61  ;;  %v4777_v61 = vld [vmem:[%s5411_s3 + $0x10] ss:$0 sm:$0xff] }
 0x50d   : > { %v3502_v9 = vpop.eup %3501  ;;  %v2095_v14 = vmul.f32 %v3500_v22, %v4739_v54 }
 0x50e   : > { %3162 = vmatmul.msk.f32.gmra.mxu0 %vm337_vm0, %v1578_v6  ;;  %3170 = vmatmul.msk.f32.gmra.mxu3 %vm337_vm0, %v2093_v44  ;;  %v2081_v8 = vadd.f32 1.0, %v3502_v9 }
 0x510   : > { %3505 = vrcp.f32 %v2081_v8 }
 0x512   : > { %v3504_v62 = vpop.eup %3503 }
 0x513   : > { %v2096_v12 = vmul.f32 %v3504_v62, %v2048_v13 }
 0x516   : > { %3163 = vmatmul.msk.f32.gmra.mxu0 %vm337_vm0, %v1579_v18  ;;  %3171 = vmatmul.msk.f32.gmra.mxu3 %vm337_vm0, %v2094_v57  ;;  %v3506_v35 = vpop.eup %3505 }
 0x517   : > { %v2097_v31 = vmul.f32 %v3506_v35, %v2049_v11 }
 0x51e   : > { %3164 = vmatmul.msk.f32.gmra.mxu0 %vm337_vm0, %v1580_v48  ;;  %3172 = vmatmul.msk.f32.gmra.mxu3 %vm337_vm0, %v2095_v14 }
 0x526   : > { %3173 = vmatmul.msk.f32.gmra.mxu3 %vm337_vm0, %v2096_v12 }
 0x52e   : > { %3174 = vmatmul.msk.f32.gmra.mxu3 %vm337_vm0, %v2097_v31 }
 0x579   : > { %v2140_v54 = vpop.f32.mrf.mxu3 }
 0x57a   : > { %v2141_v39 = vadd.f32 %v4777_v61, %v2140_v54 }
 0x57c   : > { %v2164_v21 = vsub.f32 0.0, %v2141_v39 }
 0x57e   : > { %v2172_v28 = vmul.f32 1.442695, %v2164_v21 }
 0x580   : > { %3507 = vpow2.f32 %v2172_v28 }
 0x581   : > { %v2143_v26 = vpop.f32.mrf.mxu3 }
 0x582   : > { %v2144_v47 = vadd.f32 %v4777_v61, %v2143_v26 }
 0x584   : > { %v2165_v19 = vsub.f32 0.0, %v2144_v47 }
 0x586   : > { %v3508_v13 = vpop.eup %3507  ;;  %v2174_v17 = vmul.f32 1.442695, %v2165_v19 }
 0x587   : > { %v2188_v7 = vadd.f32 1.0, %v3508_v13 }
 0x588   : > { %3509 = vpow2.f32 %v2174_v17 }
 0x589   : > { %3511 = vrcp.f32 %v2188_v7  ;;  %v2146_v23 = vpop.f32.mrf.mxu3 }
 0x58a   : > { %v2147_v60 = vadd.f32 %v4777_v61, %v2146_v23 }
 0x58c   : > { %v2166_v37 = vsub.f32 0.0, %v2147_v60 }
 0x58e   : > { %v3510_v25 = vpop.eup %3509  ;;  %v2176_v55 = vmul.f32 1.442695, %v2166_v37 }
 0x58f   : > { %v3512_v30 = vpop.eup %3511  ;;  %v2189_v24 = vadd.f32 1.0, %v3510_v25 }
 0x590   : > { %v4787_v20 = vmul.f32 %v3512_v30, %v2141_v39  ;;  %3513 = vpow2.f32 %v2176_v55 }
 0x591   : > { %3515 = vrcp.f32 %v2189_v24  ;;  %v2149_v34 = vpop.f32.mrf.mxu3 }
 0x592   : > { %v2150_v49 = vadd.f32 %v4777_v61, %v2149_v34  ;;  %v2213_v11 = vmul.f32 %v4785_v15, %v4787_v20 }
 0x594   : > { %v2167_v3 = vsub.f32 0.0, %v2150_v49  ;;  %v2221_v63 = vsel %vm337_vm0, %v2213_v11, 0.0 }
 0x595   : > { %2222 = vadd.xlane.f32.xlu2 %v2221_v63 }
 0x596   : > { %v3514_v6 = vpop.eup %3513  ;;  %v2178_v44 = vmul.f32 1.442695, %v2167_v3 }
 0x597   : > { %v3516_v45 = vpop.eup %3515  ;;  %v2190_v16 = vadd.f32 1.0, %v3514_v6 }
 0x598   : > { %v4793_v40 = vmul.f32 %v3516_v45, %v2144_v47  ;;  %3517 = vpow2.f32 %v2178_v44 }
 0x599   : > { %3519 = vrcp.f32 %v2190_v16  ;;  %v2152_v58 = vpop.f32.mrf.mxu3 }
 0x59a   : > { %v2153_v53 = vadd.f32 %v4777_v61, %v2152_v58  ;;  %v2214_v33 = vmul.f32 %v4785_v15, %v4793_v40 }
 0x59c   : > { %v2168_v50 = vsub.f32 0.0, %v2153_v53  ;;  %v2224_v18 = vsel %vm337_vm0, %v2214_v33, 0.0 }
 0x59d   : > { %2225 = vadd.xlane.f32.xlu0 %v2224_v18 }
 0x59e   : > { %v3518_v57 = vpop.eup %3517  ;;  %v2180_v27 = vmul.f32 1.442695, %v2168_v50 }
 0x59f   : > { %v3520_v29 = vpop.eup %3519  ;;  %v2191_v22 = vadd.f32 1.0, %v3518_v57 }
 0x5a0   : > { %v4799_v9 = vmul.f32 %v3520_v29, %v2147_v60  ;;  %3521 = vpow2.f32 %v2180_v27 }
 0x5a1   : > { %3523 = vrcp.f32 %v2191_v22  ;;  %v2155_v48 = vpop.f32.mrf.mxu3 }
 0x5a2   : > { %v2156_v14 = vadd.f32 %v4777_v61, %v2155_v48  ;;  %v2215_v8 = vmul.f32 %v4785_v15, %v4799_v9 }
 0x5a4   : > { %v2169_v62 = vsub.f32 0.0, %v2156_v14  ;;  %v2227_v12 = vsel %vm337_vm0, %v2215_v8, 0.0 }
 0x5a5   : > { %2228 = vadd.xlane.f32.xlu1 %v2227_v12 }
 0x5a6   : > { %v3522_v35 = vpop.eup %3521  ;;  %v2182_v31 = vmul.f32 1.442695, %v2169_v62 }
 0x5a7   : > { %v3524_v54 = vpop.eup %3523  ;;  %v2192_v39 = vadd.f32 1.0, %v3522_v35 }
 0x5a8   : > { %v4805_v21 = vmul.f32 %v3524_v54, %v2150_v49  ;;  %3525 = vpow2.f32 %v2182_v31  ;;  %v4832_v54 = vpop.f32.mrf.mxu0 }
 0x5a9   : > { %3527 = vrcp.f32 %v2192_v39  ;;  %v2158_v28 = vpop.f32.mrf.mxu3 }
 0x5aa   : > { %v2159_v26 = vadd.f32 %v4777_v61, %v2158_v28  ;;  %v2216_v47 = vmul.f32 %v4785_v15, %v4805_v21 }
 0x5ac   : > { %v2170_v19 = vsub.f32 0.0, %v2159_v26  ;;  %v2230_v13 = vsel %vm337_vm0, %v2216_v47, 0.0 }
 0x5ad   : > { %2231 = vadd.xlane.f32.xlu2 %v2230_v13  ;;  %v3737_v13 = vld [vmem:[%s5412_s4] sm:$0xff] }
 0x5ae   : > { %v3526_v17 = vpop.eup %3525  ;;  %v2184_v7 = vmul.f32 1.442695, %v2170_v19 }
 0x5af   : > { %v3528_v23 = vpop.eup %3527  ;;  %v2193_v60 = vadd.f32 1.0, %v3526_v17 }
 0x5b0   : > { %v4811_v37 = vmul.f32 %v3528_v23, %v2153_v53  ;;  %3529 = vpow2.f32 %v2184_v7  ;;  %v4837_v7 = vpop.f32.mrf.mxu0 }
 0x5b1   : > { %3531 = vrcp.f32 %v2193_v60  ;;  %v2161_v25 = vpop.f32.mrf.mxu3 }
 0x5b2   : > { %v2162_v55 = vadd.f32 %v4777_v61, %v2161_v25  ;;  %v2217_v30 = vmul.f32 %v4785_v15, %v4811_v37 }
 0x5b4   : > { %v2171_v24 = vsub.f32 0.0, %v2162_v55  ;;  %v2233_v34 = vsel %vm337_vm0, %v2217_v30, 0.0 }
 0x5b5   : > { %2234 = vadd.xlane.f32.xlu0 %v2233_v34  ;;  %v3738_v34 = vld [vmem:[%s5412_s4 + $0x8] sm:$0xff] }
 0x5b6   : > { %v3530_v49 = vpop.eup %3529  ;;  %v2186_v11 = vmul.f32 1.442695, %v2171_v24 }
 0x5b7   : > { %v3532_v3 = vpop.eup %3531  ;;  %v2194_v63 = vadd.f32 1.0, %v3530_v49 }
 0x5b8   : > { %v4817_v6 = vmul.f32 %v3532_v3, %v2156_v14  ;;  %3533 = vpow2.f32 %v2186_v11  ;;  %v4842_v3 = vpop.f32.mrf.mxu0 }
 0x5b9   : > { %3535 = vrcp.f32 %v2194_v63 }
 0x5ba   : > { %v2218_v44 = vmul.f32 %v4785_v15, %v4817_v6 }
 0x5bc   : > { %v2236_v61 = vsel %vm337_vm0, %v2218_v44, 0.0 }
 0x5bd   : > { %2237 = vadd.xlane.f32.xlu1 %v2236_v61 }
 0x5be   : > { %v3534_v45 = vpop.eup %3533 }
 0x5bf   : > { %v3536_v16 = vpop.eup %3535  ;;  %v2195_v58 = vadd.f32 1.0, %v3534_v45 }
 0x5c0   : > { %v4822_v53 = vmul.f32 %v3536_v16, %v2159_v26 }
 0x5c1   : > { %3537 = vrcp.f32 %v2195_v58  ;;  %v3739_v58 = vld [vmem:[%s5412_s4 + $0x10] sm:$0xff] }
 0x5c2   : > { %v2219_v33 = vmul.f32 %v4785_v15, %v4822_v53 }
 0x5c4   : > { %v2239_v50 = vsel %vm337_vm0, %v2219_v33, 0.0 }
 0x5c5   : > { %2240 = vadd.xlane.f32.xlu2 %v2239_v50 }
 0x5c7   : > { %v3538_v18 = vpop.eup %3537 }
 0x5c8   : > { %v4827_v57 = vmul.f32 %v3538_v18, %v2162_v55 }
 0x5ca   : > { %v2220_v27 = vmul.f32 %v4785_v15, %v4827_v57 }
 0x5cc   : > { %v2242_v29 = vsel %vm337_vm0, %v2220_v27, 0.0 }
 0x5cd   : > { %2243 = vadd.xlane.f32.xlu0 %v2242_v29  ;;  %v1632_v29 = vpop.f32.mrf.mxu0 }
 0x608   : > { %v2223_v22 = vpop.xlane.xlu2 %2222 }
 0x609   : > { %v2245_v48 = vsub.f32 0.0, %v2223_v22 }
 0x60b   : > { %v2253_v14 = vmul.f32 1.442695, %v2245_v48 }
 0x60d   : > { %3539 = vpow2.f32 %v2253_v14 }
 0x610   : > { %v2226_v8 = vpop.xlane.xlu0 %2225 }
 0x611   : > { %v2246_v62 = vsub.f32 0.0, %v2226_v8  ;;  %v3740_v8 = vld [vmem:[%s5412_s4 + $0x18] sm:$0xff] }
 0x613   : > { %v3540_v12 = vpop.eup %3539  ;;  %v2255_v35 = vmul.f32 1.442695, %v2246_v62 }
 0x614   : > { %v2269_v31 = vadd.f32 1.0, %v3540_v12 }
 0x615   : > { %3541 = vpow2.f32 %v2255_v35 }
 0x616   : > { %3543 = vrcp.f32 %v2269_v31 }
 0x618   : > { %v2229_v39 = vpop.xlane.xlu1 %2228 }
 0x619   : > { %v2247_v28 = vsub.f32 0.0, %v2229_v39 }
 0x61b   : > { %v3542_v26 = vpop.eup %3541  ;;  %v2257_v15 = vmul.f32 1.442695, %v2247_v28 }
 0x61c   : > { %v3544_v47 = vpop.eup %3543  ;;  %v2270_v19 = vadd.f32 1.0, %v3542_v26 }
 0x61d   : > { %3545 = vpow2.f32 %v2257_v15  ;;  %v2285_v17 = vmul.f32 %v3737_v13, %v3544_v47  ;;  %v1635_v15 = vpop.f32.mrf.mxu0  ;;  %v3741_v47 = vld [vmem:[%s5412_s4 + $0x20] sm:$0xff] }
 0x61e   : > { %3547 = vrcp.f32 %v2270_v19 }
 0x61f   : > { %2295 = vperm.xlu1 %3220, %v2285_v17   ;;  %v3237_v17 = vld [vmem:[%s5411_s3 + $0xc] ss:$0 sm:$0xff] }
 0x620   : > { %v2232_v23 = vpop.xlane.xlu2 %2231 }
 0x621   : > { %v2248_v60 = vsub.f32 0.0, %v2232_v23 }
 0x623   : > { %v3546_v25 = vpop.eup %3545  ;;  %v2259_v55 = vmul.f32 1.442695, %v2248_v60 }
 0x624   : > { %v3548_v30 = vpop.eup %3547  ;;  %v2271_v24 = vadd.f32 1.0, %v3546_v25 }
 0x625   : > { %3549 = vpow2.f32 %v2259_v55  ;;  %v2286_v49 = vmul.f32 %v3738_v34, %v3548_v30  ;;  %v3742_v34 = vld [vmem:[%s5412_s4 + $0x28] sm:$0xff] }
 0x626   : > { %3551 = vrcp.f32 %v2271_v24  ;;  %v1624_v24 = vadd.f32 %v3237_v17, %v4832_v54  ;;  %v3743_v54 = vld [vmem:[%s5412_s4 + $0x30] sm:$0xff] }
 0x627   : > { %2300 = vperm.xlu2 %3221, %v2286_v49  }
 0x628   : > { %v2235_v11 = vpop.xlane.xlu0 %2234 }
 0x629   : > { %v2249_v63 = vsub.f32 0.0, %v2235_v11  ;;  %v1638_v11 = vpop.f32.mrf.mxu0 }
 0x62b   : > { %v3550_v44 = vpop.eup %3549  ;;  %v2261_v61 = vmul.f32 1.442695, %v2249_v63  ;;  %v1647_v63 = vsub.f32 0.0, %v1624_v24 }
 0x62c   : > { %v3552_v45 = vpop.eup %3551  ;;  %v2272_v16 = vadd.f32 1.0, %v3550_v44 }
 0x62d   : > { %3553 = vpow2.f32 %v2261_v61  ;;  %v2287_v33 = vmul.f32 %v3739_v58, %v3552_v45  ;;  %v4860_v58 = vadd.f32 %v3237_v17, %v1632_v29  ;;  %v4871_v29 = vadd.f32 %v3237_v17, %v4842_v3 }
 0x62e   : > { %3555 = vrcp.f32 %v2272_v16  ;;  %v1655_v16 = vmul.f32 1.442695, %v1647_v63 }
 0x62f   : > { %2305 = vperm.xlu0 %3222, %v2287_v33  }
 0x630   : > { %v2238_v50 = vpop.xlane.xlu1 %2237 }
 0x631   : > { %v2250_v18 = vsub.f32 0.0, %v2238_v50  ;;  %v4866_v50 = vadd.f32 %v3237_v17, %v4837_v7  ;;  %v3744_v7 = vld [vmem:[%s5412_s4 + $0x38] sm:$0xff] }
 0x633   : > { %v3554_v27 = vpop.eup %3553  ;;  %v2263_v22 = vmul.f32 1.442695, %v2250_v18  ;;  %v1650_v18 = vsub.f32 0.0, %v4860_v58 }
 0x634   : > { %v3556_v48 = vpop.eup %3555  ;;  %v2273_v14 = vadd.f32 1.0, %v3554_v27  ;;  %v1641_v27 = vpop.f32.mrf.mxu0 }
 0x635   : > { %3557 = vpow2.f32 %v2263_v22  ;;  %v2288_v62 = vmul.f32 %v3740_v8, %v3556_v48  ;;  %v1648_v22 = vsub.f32 0.0, %v4866_v50  ;;  %v4873_v8 = vadd.f32 %v3237_v17, %v1641_v27 }
 0x636   : > { %3559 = vrcp.f32 %v2273_v14  ;;  %v1661_v14 = vmul.f32 1.442695, %v1650_v18 }
 0x637   : > { %2310 = vperm.xlu1 %3220, %v2288_v62  }
 0x638   : > { %v2241_v12 = vpop.xlane.xlu2 %2240 }
 0x639   : > { %v2251_v35 = vsub.f32 0.0, %v2241_v12  ;;  %v1657_v12 = vmul.f32 1.442695, %v1648_v22 }
 0x63b   : > { %v3558_v31 = vpop.eup %3557  ;;  %v2265_v39 = vmul.f32 1.442695, %v2251_v35  ;;  %v4878_v35 = vadd.f32 %v3237_v17, %v1635_v15 }
 0x63c   : > { %v3560_v28 = vpop.eup %3559  ;;  %v2274_v26 = vadd.f32 1.0, %v3558_v31 }
 0x63d   : > { %3561 = vpow2.f32 %v2265_v39  ;;  %v2289_v19 = vmul.f32 %v3741_v47, %v3560_v28  ;;  %v1649_v39 = vsub.f32 0.0, %v4871_v29  ;;  %v1653_v28 = vsub.f32 0.0, %v4873_v8  ;;  %v1644_v47 = vpop.f32.mrf.mxu0 }
 0x63e   : > { %3563 = vrcp.f32 %v2274_v26  ;;  %v1651_v26 = vsub.f32 0.0, %v4878_v35  ;;  %v1645_v15 = vadd.f32 %v3237_v17, %v1644_v47 }
 0x63f   : > { %2315 = vperm.xlu0 %3222, %v2289_v19   ;;  %v1659_v19 = vmul.f32 1.442695, %v1649_v39 }
 0x640   : > { %v2244_v13 = vpop.xlane.xlu0 %2243 }
 0x641   : > { %v2252_v23 = vsub.f32 0.0, %v2244_v13  ;;  %v4883_v13 = vadd.f32 %v3237_v17, %v1638_v11  ;;  %v3240_v17 = vld [vmem:[%s5411_s3 + $0xd] ss:$0 sm:$0xff] }
 0x643   : > { %v3562_v60 = vpop.eup %3561  ;;  %v2267_v25 = vmul.f32 1.442695, %v2252_v23  ;;  %v1667_v23 = vmul.f32 1.442695, %v1653_v28 }
 0x644   : > { %v3564_v55 = vpop.eup %3563  ;;  %v2275_v30 = vadd.f32 1.0, %v3562_v60  ;;  %v1663_v60 = vmul.f32 1.442695, %v1651_v26 }
 0x645   : > { %3565 = vpow2.f32 %v2267_v25  ;;  %v2290_v49 = vmul.f32 %v3742_v34, %v3564_v55 }
 0x646   : > { %3567 = vrcp.f32 %v2275_v30  ;;  %v1652_v30 = vsub.f32 0.0, %v4883_v13 }
 0x647   : > { %2320 = vperm.xlu2 %3221, %v2290_v49   ;;  %v1654_v49 = vsub.f32 0.0, %v1645_v15 }
 0x649   : > { %v1669_v11 = vmul.f32 1.442695, %v1654_v49 }
 0x64b   : > { %v3566_v44 = vpop.eup %3565 }
 0x64c   : > { %v3568_v61 = vpop.eup %3567  ;;  %v2276_v45 = vadd.f32 1.0, %v3566_v44 }
 0x64d   : > { %v2291_v33 = vmul.f32 %v3743_v54, %v3568_v61  ;;  %v1665_v61 = vmul.f32 1.442695, %v1652_v30 }
 0x64e   : > { %3569 = vrcp.f32 %v2276_v45 }
 0x64f   : > { %2325 = vperm.xlu1 %3220, %v2291_v33   ;;  %3571 = vpow2.f32 %v1655_v16 }
 0x650   : > { %3573 = vpow2.f32 %v1661_v14 }
 0x651   : > { %3575 = vpow2.f32 %v1657_v12 }
 0x654   : > { %v3570_v48 = vpop.eup %3569 }
 0x655   : > { %v2292_v62 = vmul.f32 %v3744_v7, %v3570_v48  ;;  %v3572_v31 = vpop.eup %3571 }
 0x656   : > { %v1671_v3 = vadd.f32 1.0, %v3572_v31  ;;  %v3574_v25 = vpop.eup %3573 }
 0x657   : > { %2330 = vperm.xlu0 %3222, %v2292_v62   ;;  %v3576_v55 = vpop.eup %3575  ;;  %v1674_v34 = vadd.f32 1.0, %v3574_v25 }
 0x658   : > { %3577 = vrcp.f32 %v1671_v3  ;;  %v1672_v63 = vadd.f32 1.0, %v3576_v55 }
 0x659   : > { %3579 = vpow2.f32 %v1659_v19 }
 0x65a   : > { %3581 = vpow2.f32 %v1667_v23 }
 0x65b   : > { %3583 = vpow2.f32 %v1663_v60 }
 0x65c   : > { %3585 = vrcp.f32 %v1674_v34 }
 0x65d   : > { %3587 = vrcp.f32 %v1672_v63 }
 0x65e   : > { %v3578_v44 = vpop.eup %3577  ;;  %3589 = vpow2.f32 %v1665_v61 }
 0x65f   : > { %v3580_v45 = vpop.eup %3579  ;;  %v1687_v54 = vmul.f32 %v3578_v44, %v1624_v24  ;;  %3591 = vpow2.f32 %v1669_v11 }
 0x660   : > { %v3582_v16 = vpop.eup %3581  ;;  %v1673_v18 = vadd.f32 1.0, %v3580_v45 }
 0x661   : > { %v3584_v33 = vpop.eup %3583  ;;  %v1677_v27 = vadd.f32 1.0, %v3582_v16  ;;  %v1696_v48 = vmul.f32 %v3240_v17, %v1687_v54 }
 0x662   : > { %v1675_v22 = vadd.f32 1.0, %v3584_v33  ;;  %v3586_v14 = vpop.eup %3585  ;;  %3593 = vrcp.f32 %v1673_v18 }
 0x663   : > { %v3588_v7 = vpop.eup %3587  ;;  %3595 = vrcp.f32 %v1677_v27  ;;  %v1690_v12 = vmul.f32 %v3586_v14, %v4860_v58  ;;  %v1704_v24 = vsel %vm337_vm0, %v1696_v48, 0.0 }
 0x664   : > { %v3590_v62 = vpop.eup %3589  ;;  %3597 = vrcp.f32 %v1675_v22  ;;  %v1688_v39 = vmul.f32 %v3588_v7, %v4866_v50 }
 0x665   : > { %v3592_v31 = vpop.eup %3591  ;;  %v1676_v28 = vadd.f32 1.0, %v3590_v62  ;;  %v1699_v47 = vmul.f32 %v3240_v17, %v1690_v12 }
 0x666   : > { %v1678_v26 = vadd.f32 1.0, %v3592_v31  ;;  %v1697_v23 = vmul.f32 %v3240_v17, %v1688_v39 }
 0x667   : > { %3599 = vrcp.f32 %v1676_v28  ;;  %v1713_v58 = vsel %vm337_vm0, %v1699_v47, 0.0  ;;  %v1954_v47 = vld [vmem:[%s5410_s2 + $0x200] sm:$0xff] }
 0x668   : > { %v3594_v3 = vpop.eup %3593  ;;  %3601 = vrcp.f32 %v1678_v26  ;;  %v1707_v50 = vsel %vm337_vm0, %v1697_v23, 0.0 }
 0x669   : > { %v3596_v19 = vpop.eup %3595  ;;  %v1689_v55 = vmul.f32 %v3594_v3, %v4871_v29  ;;  %3603 = vrsqrt.f32 %v4575_v1 }
 0x66a   : > { %v3598_v60 = vpop.eup %3597  ;;  %v1693_v25 = vmul.f32 %v3596_v19, %v4873_v8  ;;  %3605 = vrsqrt.f32 %v4611_v4 }
 0x66b   : > { %v1691_v30 = vmul.f32 %v3598_v60, %v4878_v35  ;;  %v1698_v44 = vmul.f32 %v3240_v17, %v1689_v55  ;;  %3607 = vrsqrt.f32 %v4573_v5 }
 0x66c   : > { %v1702_v34 = vmul.f32 %v3240_v17, %v1693_v25  ;;  %3609 = vrsqrt.f32 %v4580_v0 }
 0x66d   : > { %v3600_v49 = vpop.eup %3599  ;;  %v1700_v63 = vmul.f32 %v3240_v17, %v1691_v30  ;;  %v1710_v29 = vsel %vm337_vm0, %v1698_v44, 0.0  ;;  %3611 = vrsqrt.f32 %v4693_v51 }
 0x66e   : > { %v3602_v61 = vpop.eup %3601  ;;  %v1722_v45 = vsel %vm337_vm0, %v1702_v34, 0.0  ;;  %v1692_v8 = vmul.f32 %v3600_v49, %v4883_v13  ;;  %v1957_v13 = vld [vmem:[%s5410_s2 + $0x218] sm:$0xff]  ;;  %3613 = vrsqrt.f32 %v4634_v32 }
 0x66f   : > { %v1694_v11 = vmul.f32 %v3602_v61, %v1645_v15  ;;  %v1716_v16 = vsel %vm337_vm0, %v1700_v63, 0.0  ;;  %v1956_v15 = vld [vmem:[%s5410_s2 + $0x210] sm:$0xff]  ;;  %2426 = vmatpush.msra.mxu2 %v1957_v13  ;;  %v4923_v19 = vpop.eup %3603  ;;  %3615 = vrsqrt.f32 %v4671_v10 }
 0x670   : > { %1705 = vadd.xlane.f32.xlu2 %v1704_v24  ;;  %v1701_v54 = vmul.f32 %v3240_v17, %v1692_v8  ;;  %v4936_v61 = vpop.eup %3605  ;;  %3617 = vrsqrt.f32 %v4713_v42 }
 0x671   : > { %v1703_v35 = vmul.f32 %v3240_v17, %v1694_v11  ;;  %2427 = vmatpush.msra.mxu2 %v1956_v15  ;;  %v1955_v17 = vld [vmem:[%s5410_s2 + $0x208] sm:$0xff] }
 0x672   : > { %v1719_v18 = vsel %vm337_vm0, %v1701_v54, 0.0 }
 0x673   : > { %v1725_v33 = vsel %vm337_vm0, %v1703_v35, 0.0  ;;  %2428 = vmatpush.msra.mxu2 %v1955_v17  ;;  %v4939_v35 = vpop.eup %3607 }
 0x675   : > { %2429 = vmatpush.msra.mxu2 %v1954_v47 }
 0x678   : > { %1714 = vadd.xlane.f32.xlu2 %v1713_v58  ;;  %v1738_v58 = vmul.f32 %v4923_v19, %v4575_v1 }
 0x679   : > { %1708 = vadd.xlane.f32.xlu1 %v1707_v50 }
 0x67a   : > { %v1739_v44 = vmul.f32 %v4923_v19, %v1738_v58 }
 0x680   : > { %1723 = vadd.xlane.f32.xlu2 %v1722_v45 }
 0x681   : > { %1717 = vadd.xlane.f32.xlu1 %v1716_v16  ;;  %1711 = vadd.xlane.f32.xlu0 %v1710_v29  ;;  %v2301_v48 = vpop.permute.xlu2 %2300 }
 0x682   : > { %v2334_v24 = vmul.f32 %v2301_v48, %v4793_v40 }
 0x689   : > { %1726 = vadd.xlane.f32.xlu1 %v1725_v33  ;;  %1720 = vadd.xlane.f32.xlu0 %v1719_v18  ;;  %v1740_v18 = vmul.f32 0.5, %v1739_v44 }
 0x691   : > { %v2296_v27 = vpop.permute.xlu1 %2295 }
 0x692   : > { %v2333_v7 = vmul.f32 %v2296_v27, %v4787_v20  ;;  %v2348_v20 = vsel %vm337_vm0, %v2334_v24, 0.0  ;;  %v1774_v27 = vmul.f32 %v4936_v61, %v4611_v4 }
 0x693   : > { %v2349_v60 = vrot.slane %v2348_v20, 4 }
 0x694   : > { %v2341_v28 = vsel %vm337_vm0, %v2333_v7, 0.0  ;;  %v1750_v7 = vmul.f32 %v4939_v35, %v4573_v5 }
 0x695   : > { %v2342_v40 = vrot.slane %v2341_v28, 4  ;;  %v2350_v49 = vadd.f32 %v2349_v60, %v2348_v20 }
 0x697   : > { %v2343_v30 = vadd.f32 %v2342_v40, %v2341_v28  ;;  %v2351_v54 = vrot.slane %v2350_v49, 2  ;;  %v1775_v28 = vmul.f32 %v4936_v61, %v1774_v27 }
 0x699   : > { %v2344_v45 = vrot.slane %v2343_v30, 2 }
 0x6a1   : > { %v2306_v22 = vpop.permute.xlu0 %2305  ;;  %v2321_v3 = vpop.permute.xlu2 %2320 }
 0x6a2   : > { %v2335_v12 = vmul.f32 %v2306_v22, %v4799_v9  ;;  %v2345_v22 = vadd.f32 %v2344_v45, %v2343_v30 }
 0x6a4   : > { %v2355_v26 = vsel %vm337_vm0, %v2335_v12, 0.0 }
 0x6a5   : > { %v2356_v23 = vrot.slane %v2355_v26, 4 }
 0x6a7   : > { %v2357_v34 = vadd.f32 %v2356_v23, %v2355_v26  ;;  %v1751_v23 = vmul.f32 %v4939_v35, %v1750_v7 }
 0x6a9   : > { %v2311_v14 = vpop.permute.xlu1 %2310  ;;  %v2358_v16 = vrot.slane %v2357_v34, 2 }
 0x6aa   : > { %v2336_v31 = vmul.f32 %v2311_v14, %v4805_v21  ;;  %v4946_v14 = vpop.eup %3609 }
 0x6ab   : > { %v4953_v40 = vpop.eup %3611 }
 0x6ac   : > { %v2362_v9 = vsel %vm337_vm0, %v2336_v31, 0.0  ;;  %v1741_v31 = vsub.f32 1.5, %v1740_v18  ;;  %v4958_v60 = vpop.eup %3613 }
 0x6ad   : > { %v2363_v25 = vrot.slane %v2362_v9, 4 }
 0x6af   : > { %v2364_v63 = vadd.f32 %v2363_v25, %v2362_v9  ;;  %v1762_v9 = vmul.f32 %v4946_v14, %v4580_v0 }
 0x6b1   : > { %v2316_v62 = vpop.permute.xlu0 %2315  ;;  %v2365_v33 = vrot.slane %v2364_v63, 2 }
 0x6b2   : > { %v2337_v39 = vmul.f32 %v2316_v62, %v4811_v37  ;;  %v2338_v37 = vmul.f32 %v2321_v3, %v4817_v6  ;;  %v2352_v62 = vadd.f32 %v2351_v54, %v2350_v49  ;;  %v2346_v3 = vrot.slane %v2345_v22, 1 }
 0x6b3   : > { %v2366_v12 = vadd.f32 %v2365_v33, %v2364_v63  ;;  %v1776_v49 = vmul.f32 0.5, %v1775_v28  ;;  %v4968_v33 = vpop.eup %3615 }
 0x6b4   : > { %v2369_v21 = vsel %vm337_vm0, %v2337_v39, 0.0  ;;  %v2376_v50 = vsel %vm337_vm0, %v2338_v37, 0.0  ;;  %v2353_v25 = vrot.slane %v2352_v62, 1  ;;  %v2347_v63 = vadd.f32 %v2346_v3, %v2345_v22  ;;  %v4971_v22 = vpop.eup %3617 }
 0x6b5   : > { %v2370_v55 = vrot.slane %v2369_v21, 4  ;;  %v2377_v8 = vrot.slane %v2376_v50, 4  ;;  %v2367_v58 = vrot.slane %v2366_v12, 1  ;;  %v1777_v27 = vsub.f32 1.5, %v1776_v49 }
 0x6b7   : > { %v2371_v6 = vadd.f32 %v2370_v55, %v2369_v21  ;;  %v2378_v48 = vadd.f32 %v2377_v8, %v2376_v50  ;;  %v1742_v55 = vmul.f32 %v4923_v19, %v1741_v31  ;;  %v1752_v8 = vmul.f32 0.5, %v1751_v23 }
 0x6b8   : > { %v1763_v19 = vmul.f32 %v4946_v14, %v1762_v9 }
 0x6b9   : > { %v2372_v13 = vrot.slane %v2371_v6, 2  ;;  %v2379_v26 = vrot.slane %v2378_v48, 2 }
 0x6ba   : > { %v1764_v28 = vmul.f32 0.5, %v1763_v19 }
 0x6bb   : > { %v2373_v39 = vadd.f32 %v2372_v13, %v2371_v6  ;;  %v2380_v44 = vadd.f32 %v2379_v26, %v2378_v48 }
 0x6bd   : > { %v2374_v30 = vrot.slane %v2373_v39, 1 }
 0x6bf   : > { %v2375_v18 = vadd.f32 %v2374_v30, %v2373_v39  ;;  %v1798_v30 = vmul.f32 %v4968_v33, %v4671_v10 }
 0x6c1   : > { %v2326_v11 = vpop.permute.xlu1 %2325 }
 0x6c2   : > { %v2339_v29 = vmul.f32 %v2326_v11, %v4822_v53  ;;  %v2359_v53 = vadd.f32 %v2358_v16, %v2357_v34  ;;  %v1786_v11 = vmul.f32 %v4958_v60, %v4634_v32  ;;  %v2354_v16 = vadd.f32 %v2353_v25, %v2352_v62 }
 0x6c3   : > { %v1747_v25 = vand.u32 2147483648, %v4575_v1 }
 0x6c4   : > { %v2383_v15 = vsel %vm337_vm0, %v2339_v29, 0.0  ;;  %v2360_v21 = vrot.slane %v2359_v53, 1  ;;  %v2368_v29 = vadd.f32 %v2367_v58, %v2366_v12  ;;  %v2405_v48 = vsel %vm819_vm2, %v2354_v16, %v2347_v63 }
 0x6c5   : > { %v2384_v17 = vrot.slane %v2383_v15, 4  ;;  %v1753_v12 = vsub.f32 1.5, %v1752_v8 }
 0x6c6   : > { %v2361_v45 = vadd.f32 %v2360_v21, %v2359_v53 }
 0x6c7   : > { %v2385_v24 = vadd.f32 %v2384_v17, %v2383_v15  ;;  %v1743_v15 = vmul.f32 %v1742_v55, %v4575_v1  ;;  %v2381_v17 = vrot.slane %v2380_v44, 1  ;;  %v1754_v58 = vmul.f32 %v4939_v35, %v1753_v12 }
 0x6c8   : > { %v2406_v62 = vsel %vm821_vm3, %v2361_v45, %v2405_v48  ;;  %v1759_v48 = vand.u32 2147483648, %v4573_v5 }
 0x6c9   : > { %v2386_v47 = vrot.slane %v2385_v24, 2  ;;  %v2331_v20 = vpop.permute.xlu0 %2330  ;;  %v2407_v31 = vsel %vm823_vm4, %v2368_v29, %v2406_v62  ;;  %v2382_v9 = vadd.f32 %v2381_v17, %v2380_v44  ;;  %v1765_v44 = vsub.f32 1.5, %v1764_v28 }
 0x6ca   : > { %v2340_v37 = vmul.f32 %v2331_v20, %v4827_v57  ;;  %v1810_v57 = vmul.f32 %v4953_v40, %v4693_v51  ;;  %v2408_v3 = vsel %vm825_vm5, %v2375_v18, %v2407_v31  ;;  %v1822_v20 = vmul.f32 %v4971_v22, %v4713_v42 }
 0x6cb   : > { %v2387_v50 = vadd.f32 %v2386_v47, %v2385_v24  ;;  %v1787_v24 = vmul.f32 %v4958_v60, %v1786_v11  ;;  %v1745_v47 = vsel %vm1744_vm11, %v4575_v1, %v1743_v15  ;;  %v1755_v45 = vmul.f32 %v1754_v58, %v4573_v5 }
 0x6cc   : > { %v2390_v34 = vsel %vm337_vm0, %v2340_v37, 0.0  ;;  %v1811_v7 = vmul.f32 %v4953_v40, %v1810_v57  ;;  %v1778_v37 = vmul.f32 %v4936_v61, %v1777_v27  ;;  %v1748_v63 = vsel %vm1746_vm12, %v1747_v25, %v1745_v47 }
 0x6cd   : > { %v2391_v6 = vrot.slane %v2390_v34, 4  ;;  %v2388_v13 = vrot.slane %v2387_v50, 1  ;;  %v1788_v55 = vmul.f32 0.5, %v1787_v24  ;;  %v1823_v35 = vmul.f32 %v4971_v22, %v1822_v20 }
 0x6ce   : > { %v1812_v23 = vmul.f32 0.5, %v1811_v7  ;;  %v1799_v11 = vmul.f32 %v4968_v33, %v1798_v30  ;;  %v1833_v1 = vadd.f32 1.0, %v1748_v63  ;;  %v1766_v16 = vmul.f32 %v4946_v14, %v1765_v44 }
 0x6cf   : > { %v2392_v54 = vadd.f32 %v2391_v6, %v2390_v34  ;;  %v2389_v26 = vadd.f32 %v2388_v13, %v2387_v50  ;;  %v2409_v50 = vsel %vm827_vm6, %v2382_v9, %v2408_v3  ;;  %v1779_v6 = vmul.f32 %v1778_v37, %v4611_v4 }
 0x6d0   : > { %v1813_v57 = vsub.f32 1.5, %v1812_v23  ;;  %v1789_v8 = vsub.f32 1.5, %v1788_v55  ;;  %v1824_v19 = vmul.f32 0.5, %v1823_v35  ;;  %v1783_v18 = vand.u32 2147483648, %v4611_v4 }
 0x6d1   : > { %v2393_v53 = vrot.slane %v2392_v54, 2  ;;  %v2410_v49 = vsel %vm829_vm7, %v2389_v26, %v2409_v50  ;;  %v1781_v29 = vsel %vm1780_vm13, %v4611_v4, %v1779_v6  ;;  %v1757_v13 = vsel %vm1756_vm14, %v4573_v5, %v1755_v45 }
 0x6d2   : > { %v1790_v15 = vmul.f32 %v4958_v60, %v1789_v8  ;;  %v1800_v27 = vmul.f32 0.5, %v1799_v11  ;;  %3619 = vrcp.f32 %v1833_v1  ;;  %v1784_v14 = vsel %vm1782_vm15, %v1783_v18, %v1781_v29 }
 0x6d3   : > { %v2394_v39 = vadd.f32 %v2393_v53, %v2392_v54  ;;  %v1814_v54 = vmul.f32 %v4953_v40, %v1813_v57  ;;  %v1767_v17 = vmul.f32 %v1766_v16, %v4580_v0  ;;  %v5009_v53 = vstv %s3154_s8 }
 0x6d4   : > { %v1760_v40 = vsel %vm1758_vm9, %v1759_v48, %v1757_v13  ;;  %v1825_v62 = vsub.f32 1.5, %v1824_v19  ;;  %v1791_v12 = vmul.f32 %v1790_v15, %v4634_v32  ;;  %v1801_v60 = vsub.f32 1.5, %v1800_v27 }
 0x6d5   : > { %v2395_v21 = vrot.slane %v2394_v39, 1  ;;  %v1815_v7 = vmul.f32 %v1814_v54, %v4693_v51  ;;  %v1836_v31 = vadd.f32 1.0, %v1784_v14  ;;  %vm1770_vm11 = vcmp.eq.f32.partialorder %v4580_v0, 0.0 }
 0x6d6   : > { %v1834_v5 = vadd.f32 1.0, %v1760_v40  ;;  %vm1816_vm12 = vcmp.eq.f32.partialorder %v4693_v51, inf  ;;  %vm1792_vm13 = vcmp.eq.f32.partialorder %v4634_v32, inf  ;;  %v1771_v26 = vand.u32 2147483648, %v4580_v0 }
 0x6d7   : > { %v2396_v34 = vadd.f32 %v2395_v21, %v2394_v39  ;;  %v1769_v39 = vsel %vm1768_vm10, %v4580_v0, %v1767_v17  ;;  %v1817_v3 = vsel %vm1816_vm12, %v4693_v51, %v1815_v7  ;;  %v1826_v47 = vmul.f32 %v4971_v22, %v1825_v62 }
 0x6d8   : > { %v3620_v28 = vpop.eup %3619  ;;  %v1819_v9 = vand.u32 2147483648, %v4693_v51  ;;  %v1793_v21 = vsel %vm1792_vm13, %v4634_v32, %v1791_v12  ;;  %v1802_v37 = vmul.f32 %v4968_v33, %v1801_v60  ;;  %3621 = vrcp.f32 %v1836_v31 }
 0x6d9   : > { %v2411_v61 = vsel %vm831_vm8, %v2396_v34, %v2410_v49  ;;  %vm1818_vm14 = vcmp.eq.f32.partialorder %v4693_v51, 0.0  ;;  %v1795_v23 = vand.u32 2147483648, %v4634_v32  ;;  %v1772_v25 = vsel %vm1770_vm11, %v1771_v26, %v1769_v39 }
 0x6da   : > { %3175 = vmatmul.msk.f32.vlgmr.msra.gmra.mxu2 %vm337_vm0, %v2411_v61  ;;  %3623 = vrcp.f32 %v1834_v5  ;;  %v1820_v55 = vsel %vm1818_vm14, %v1819_v9, %v1817_v3  ;;  %vm1794_vm15 = vcmp.eq.f32.partialorder %v4634_v32, 0.0  ;;  %v1827_v30 = vmul.f32 %v1826_v47, %v4713_v42 }
 0x6db   : > { %v1796_v22 = vsel %vm1794_vm15, %v1795_v23, %v1793_v21  ;;  %v1835_v33 = vadd.f32 1.0, %v1772_v25  ;;  %v1803_v50 = vmul.f32 %v1802_v37, %v4671_v10  ;;  %v1839_v63 = vadd.f32 1.0, %v1820_v55 }
 0x6dc   : > { %v1837_v61 = vadd.f32 1.0, %v1796_v22  ;;  %vm1828_vm9 = vcmp.eq.f32.partialorder %v4713_v42, inf  ;;  %v1831_v57 = vand.u32 2147483648, %v4713_v42  ;;  %vm1804_vm10 = vcmp.eq.f32.partialorder %v4671_v10, inf }
 0x6dd   : > { %v1829_v6 = vsel %vm1828_vm9, %v4713_v42, %v1827_v30  ;;  %3625 = vrcp.f32 %v1835_v33  ;;  %v1805_v11 = vsel %vm1804_vm10, %v4671_v10, %v1803_v50  ;;  %vm1830_vm11 = vcmp.eq.f32.partialorder %v4713_v42, 0.0 }
 0x6de   : > { %3627 = vrcp.f32 %v1839_v63  ;;  %v1807_v16 = vand.u32 2147483648, %v4671_v10  ;;  %v1832_v54 = vsel %vm1830_vm11, %v1831_v57, %v1829_v6  ;;  %vm1806_vm12 = vcmp.eq.f32.partialorder %v4671_v10, 0.0 }
 0x6df   : > { %3629 = vrcp.f32 %v1837_v61  ;;  %v1840_v17 = vadd.f32 1.0, %v1832_v54 }
 0x6e0   : > { %v1808_v18 = vsel %vm1806_vm12, %v1807_v16, %v1805_v11 }
 0x6e1   : > { %v1838_v12 = vadd.f32 1.0, %v1808_v18  ;;  %3631 = vrcp.f32 %v1840_v17 }
 0x6e3   : > { %v1706_v24 = vpop.xlane.xlu2 %1705  ;;  %3633 = vrcp.f32 %v1838_v12 }
 0x6e4   : > { %v1729_v4 = vadd.f32 %v5009_v53, %v1706_v24 }
 0x6e6   : > { %v1849_v20 = vmul.f32 %v3620_v28, %v1729_v4 }
 0x6e8   : > { %v1857_v58 = vmul.f32 %v1849_v20, %v4425_v46  ;;  %v3622_v46 = vpop.eup %3621 }
 0x6e9   : > { %v3624_v35 = vpop.eup %3623 }
 0x6ea   : > { %v1865_v34 = vsel %vm312_vm1, %v1857_v58, 0.0  ;;  %v3626_v42 = vpop.eup %3625 }
 0x6eb   : > { %v1866_v51 = vrot.slane %v1865_v34, 4  ;;  %v1715_v49 = vpop.xlane.xlu2 %1714  ;;  %v3628_v60 = vpop.eup %3627 }
 0x6ec   : > { %v1732_v0 = vadd.f32 %v5009_v53, %v1715_v49  ;;  %v1709_v44 = vpop.xlane.xlu1 %1708  ;;  %v3630_v24 = vpop.eup %3629 }
 0x6ed   : > { %v1730_v32 = vadd.f32 %v5009_v53, %v1709_v44  ;;  %v1867_v45 = vadd.f32 %v1866_v51, %v1865_v34  ;;  %v3632_v51 = vpop.eup %3631 }
 0x6ee   : > { %v1852_v8 = vmul.f32 %v3622_v46, %v1732_v0  ;;  %v3634_v49 = vpop.eup %3633 }
 0x6ef   : > { %v1850_v1 = vmul.f32 %v3624_v35, %v1730_v32  ;;  %v1868_v13 = vrot.slane %v1867_v45, 2 }
 0x6f0   : > { %v1860_v29 = vmul.f32 %v1852_v8, %v4445_v38 }
 0x6f1   : > { %v1858_v19 = vmul.f32 %v1850_v1, %v4422_v43  ;;  %v1869_v31 = vadd.f32 %v1868_v13, %v1867_v45 }
 0x6f2   : > { %v1886_v15 = vsel %vm312_vm1, %v1860_v29, 0.0 }
 0x6f3   : > { %v1887_v27 = vrot.slane %v1886_v15, 4  ;;  %v1872_v48 = vsel %vm312_vm1, %v1858_v19, 0.0  ;;  %v1724_v14 = vpop.xlane.xlu2 %1723  ;;  %v1870_v21 = vrot.slane %v1869_v31, 1 }
 0x6f4   : > { %v1873_v40 = vrot.slane %v1872_v48, 4  ;;  %v1735_v7 = vadd.f32 %v5009_v53, %v1724_v14  ;;  %v1718_v38 = vpop.xlane.xlu1 %1717  ;;  %v1712_v62 = vpop.xlane.xlu0 %1711 }
 0x6f5   : > { %v1733_v10 = vadd.f32 %v5009_v53, %v1718_v38  ;;  %v1731_v43 = vadd.f32 %v5009_v53, %v1712_v62  ;;  %v1888_v39 = vadd.f32 %v1887_v27, %v1886_v15  ;;  %v1871_v63 = vadd.f32 %v1870_v21, %v1869_v31 }
 0x6f6   : > { %v1874_v4 = vadd.f32 %v1873_v40, %v1872_v48  ;;  %v1855_v5 = vmul.f32 %v3628_v60, %v1735_v7 }
 0x6f7   : > { %v1853_v28 = vmul.f32 %v3630_v24, %v1733_v10  ;;  %v1851_v3 = vmul.f32 %v3626_v42, %v1731_v43  ;;  %v1889_v25 = vrot.slane %v1888_v39, 2 }
 0x6f8   : > { %v1875_v26 = vrot.slane %v1874_v4, 2  ;;  %v1863_v47 = vmul.f32 %v1855_v5, %v4462_v52 }
 0x6f9   : > { %v1861_v20 = vmul.f32 %v1853_v28, %v4442_v59  ;;  %v1859_v9 = vmul.f32 %v1851_v3, %v4419_v36  ;;  %v1890_v46 = vadd.f32 %v1889_v25, %v1888_v39 }
 0x6fa   : > { %v1876_v37 = vadd.f32 %v1875_v26, %v1874_v4  ;;  %v1907_v23 = vsel %vm312_vm1, %v1863_v47, 0.0 }
 0x6fb   : > { %v1908_v58 = vrot.slane %v1907_v23, 4  ;;  %v1893_v55 = vsel %vm312_vm1, %v1861_v20, 0.0  ;;  %v1879_v22 = vsel %vm312_vm1, %v1859_v9, 0.0 }
 0x6fc   : > { %v1877_v30 = vrot.slane %v1876_v37, 1  ;;  %v1894_v34 = vrot.slane %v1893_v55, 4  ;;  %v1880_v33 = vrot.slane %v1879_v22, 4  ;;  %v1727_v50 = vpop.xlane.xlu1 %1726  ;;  %v1721_v52 = vpop.xlane.xlu0 %1720 }
 0x6fd   : > { %v1736_v59 = vadd.f32 %v5009_v53, %v1727_v50  ;;  %v1734_v36 = vadd.f32 %v5009_v53, %v1721_v52  ;;  %v1909_v32 = vadd.f32 %v1908_v58, %v1907_v23  ;;  %v1891_v53 = vrot.slane %v1890_v46, 1 }
 0x6fe   : > { %v1878_v0 = vadd.f32 %v1877_v30, %v1876_v37  ;;  %v1895_v44 = vadd.f32 %v1894_v34, %v1893_v55  ;;  %v1881_v61 = vadd.f32 %v1880_v33, %v1879_v22 }
 0x6ff   : > { %v1856_v6 = vmul.f32 %v3632_v51, %v1736_v59  ;;  %v1854_v57 = vmul.f32 %v3634_v49, %v1734_v36  ;;  %v1910_v54 = vrot.slane %v1909_v32, 2  ;;  %v1892_v40 = vadd.f32 %v1891_v53, %v1890_v46  ;;  %v1960_v53 = vld [vmem:[%s5410_s2 + $0x230] sm:$0xff] }
 0x700   : > { %v1929_v35 = vsel %vm819_vm2, %v1878_v0, %v1871_v63  ;;  %v1896_v45 = vrot.slane %v1895_v44, 2  ;;  %v1882_v8 = vrot.slane %v1881_v61, 2 }
 0x701   : > { %v1864_v11 = vmul.f32 %v1856_v6, %v4458_v56  ;;  %v1862_v1 = vmul.f32 %v1854_v57, %v4436_v2  ;;  %v1911_v7 = vadd.f32 %v1910_v54, %v1909_v32  ;;  %v1959_v54 = vld [vmem:[%s5410_s2 + $0x228] sm:$0xff] }
 0x702   : > { %v1897_v16 = vadd.f32 %v1896_v45, %v1895_v44  ;;  %v1883_v29 = vadd.f32 %v1882_v8, %v1881_v61 }
 0x703   : > { %v1914_v19 = vsel %vm312_vm1, %v1864_v11, 0.0  ;;  %v1900_v18 = vsel %vm312_vm1, %v1862_v1, 0.0  ;;  %v1912_v24 = vrot.slane %v1911_v7, 1 }
 0x704   : > { %v1898_v13 = vrot.slane %v1897_v16, 1  ;;  %v1884_v15 = vrot.slane %v1883_v29, 1  ;;  %v1915_v27 = vrot.slane %v1914_v19, 4  ;;  %v1901_v48 = vrot.slane %v1900_v18, 4 }
 0x705   : > { %v1913_v39 = vadd.f32 %v1912_v24, %v1911_v7  ;;  %v2486_v24 = vld [vmem:[%s5410_s2 + $0x240] sm:$0xff] }
 0x706   : > { %v1885_v14 = vadd.f32 %v1884_v15, %v1883_v29  ;;  %v1916_v17 = vadd.f32 %v1915_v27, %v1914_v19  ;;  %v1902_v42 = vadd.f32 %v1901_v48, %v1900_v18  ;;  %v1899_v56 = vadd.f32 %v1898_v13, %v1897_v16  ;;  %v1961_v29 = vld [vmem:[%s5410_s2 + $0x238] sm:$0xff]  ;;  %v1958_v19 = vld [vmem:[%s5410_s2 + $0x220] sm:$0xff]  ;;  %v3241_v18 = vld [vmem:[%s5411_s3 + $0x12] ss:$0 sm:$0xff]  ;;  %v2451_v13 = vpop.f32.mrf.mxu1 }
 0x707   : > { %2478 = vmatpush.msrb.mxu2 %v1961_v29 }
 0x708   : > { %v1930_v2 = vsel %vm821_vm3, %v1885_v14, %v1929_v35  ;;  %v1917_v38 = vrot.slane %v1916_v17, 2  ;;  %v1903_v62 = vrot.slane %v1902_v42, 2 }
 0x709   : > { %v1931_v12 = vsel %vm823_vm4, %v1892_v40, %v1930_v2  ;;  %2479 = vmatpush.msrb.mxu2 %v1960_v53  ;;  %v2493_v2 = vld [vmem:[%s5410_s2 + $0x278] sm:$0xff] }
 0x70a   : > { %v1918_v60 = vadd.f32 %v1917_v38, %v1916_v17  ;;  %v1932_v10 = vsel %vm825_vm5, %v1899_v56, %v1931_v12  ;;  %v1904_v43 = vadd.f32 %v1903_v62, %v1902_v42  ;;  %v2489_v38 = vld [vmem:[%s5410_s2 + $0x258] sm:$0xff]  ;;  %v2492_v62 = vld [vmem:[%s5410_s2 + $0x270] sm:$0xff] }
 0x70b   : > { %2480 = vmatpush.msrb.mxu2 %v1959_v54  ;;  %2566 = vmatpush.msrb.mxu1 %v2489_v38  ;;  %v2488_v12 = vld [vmem:[%s5410_s2 + $0x250] sm:$0xff] }
 0x70c   : > { %v1919_v31 = vrot.slane %v1918_v60, 1  ;;  %v1905_v4 = vrot.slane %v1904_v43, 1 }
 0x70d   : > { %2481 = vmatpush.msrb.mxu2 %v1958_v19  ;;  %2567 = vmatpush.msrb.mxu1 %v2488_v12 }
 0x70e   : > { %v1906_v5 = vadd.f32 %v1905_v4, %v1904_v43  ;;  %v1920_v28 = vadd.f32 %v1919_v31, %v1918_v60  ;;  %v2491_v60 = vld [vmem:[%s5410_s2 + $0x268] sm:$0xff]  ;;  %v2490_v43 = vld [vmem:[%s5410_s2 + $0x260] sm:$0xff]  ;;  %v3242_v31 = vld [vmem:[%s5411_s3 + $0x13] ss:$0 sm:$0xff] }
 0x70f   : > { %2586 = vmatpush.msra.mxu2 %v2493_v2 }
 0x710   : > { %v1933_v3 = vsel %vm827_vm6, %v1906_v5, %v1932_v10  ;;  %v2487_v10 = vld [vmem:[%s5410_s2 + $0x248] sm:$0xff] }
 0x711   : > { %v1934_v26 = vsel %vm829_vm7, %v1913_v39, %v1933_v3  ;;  %2587 = vmatpush.msra.mxu2 %v2492_v62  ;;  %2568 = vmatpush.msrb.mxu1 %v2487_v10  ;;  %v2497_v39 = vld [vmem:[%s5410_s2 + $0x298] sm:$0xff]  ;;  %v2495_v3 = vld [vmem:[%s5410_s2 + $0x288] sm:$0xff] }
 0x712   : > { %v1935_v47 = vsel %vm831_vm8, %v1920_v28, %v1934_v26  ;;  %v2496_v28 = vld [vmem:[%s5410_s2 + $0x290] sm:$0xff]  ;;  %v2494_v26 = vld [vmem:[%s5410_s2 + $0x280] sm:$0xff] }
 0x713   : > { %v5071_v20 = vadd.f32 %v1935_v47, %v4412_v41  ;;  %2588 = vmatpush.msra.mxu2 %v2491_v60  ;;  %2569 = vmatpush.msrb.mxu1 %v2486_v24 }
 0x715   : > { %v2505_v9 = vperm.slane %v5071_v20, 2  ;;  %v2504_v21 = vperm.slane %v5071_v20, 1  ;;  %v2503_v37 = vperm.slane %v5071_v20, 0  ;;  %v2508_v23 = vperm.slane %v5071_v20, 5  ;;  %2589 = vmatpush.msra.mxu2 %v2490_v43  ;;  %2721 = vmatpush.msra.mxu1 %v2497_v39 }
 0x716   : > { %v2507_v41 = vperm.slane %v5071_v20, 4  ;;  %v2506_v22 = vperm.slane %v5071_v20, 3  ;;  %v2510_v44 = vperm.slane %v5071_v20, 7  ;;  %v2509_v46 = vperm.slane %v5071_v20, 6 }
 0x717   : > { %v5078_v25 = vsub.f32 %v5071_v20, %v2505_v9  ;;  %v5081_v58 = vsub.f32 %v5071_v20, %v2504_v21  ;;  %v5084_v55 = vsub.f32 %v5071_v20, %v2503_v37  ;;  %v5095_v50 = vsub.f32 %v5071_v20, %v2508_v23  ;;  %2722 = vmatpush.msra.mxu1 %v2496_v28  ;;  %v5191_v9 = vld [vmem:[%s5411_s3 + $0x14] ss:$0 sm:$0xff] }
 0x718   : > { %v5101_v36 = vsub.f32 %v5071_v20, %v2507_v41  ;;  %v5104_v49 = vsub.f32 %v5071_v20, %v2506_v22  ;;  %v5117_v57 = vsub.f32 %v5071_v20, %v2510_v44  ;;  %v5121_v45 = vsub.f32 %v5071_v20, %v2509_v46 }
 0x719   : > { %v2521_v30 = vmul.f32 %v5078_v25, %v5078_v25  ;;  %v2520_v34 = vmul.f32 %v5081_v58, %v5081_v58  ;;  %v2519_v33 = vmul.f32 %v5084_v55, %v5084_v55  ;;  %v2524_v63 = vmul.f32 %v5095_v50, %v5095_v50  ;;  %2723 = vmatpush.msra.mxu1 %v2495_v3 }
 0x71a   : > { %v2523_v0 = vmul.f32 %v5101_v36, %v5101_v36  ;;  %v2522_v61 = vmul.f32 %v5104_v49, %v5104_v49  ;;  %v2526_v8 = vmul.f32 %v5117_v57, %v5117_v57  ;;  %v2525_v11 = vmul.f32 %v5121_v45, %v5121_v45 }
 0x71b   : > { %v2533_v52 = vsel %vm312_vm1, %v2521_v30, 0.0  ;;  %v2530_v51 = vsel %vm312_vm1, %v2520_v34, 0.0  ;;  %v2527_v59 = vsel %vm312_vm1, %v2519_v33, 0.0  ;;  %v2542_v32 = vsel %vm312_vm1, %v2524_v63, 0.0  ;;  %2724 = vmatpush.msra.mxu1 %v2494_v26 }
 0x71c   : > { %2534 = vadd.xlane.f32.xlu1 %v2533_v52  ;;  %2531 = vadd.xlane.f32.xlu2 %v2530_v51  ;;  %v2539_v6 = vsel %vm312_vm1, %v2523_v0, 0.0  ;;  %v2536_v35 = vsel %vm312_vm1, %v2522_v61, 0.0  ;;  %v2548_v1 = vsel %vm312_vm1, %v2526_v8, 0.0  ;;  %v2545_v16 = vsel %vm312_vm1, %v2525_v11, 0.0 }
 0x71d   : > { %2528 = vadd.xlane.f32.xlu0 %v2527_v59  ;;  %v5212_v59 = vld [vmem:[%s5411_s3 + $0x15] ss:$0 sm:$0xff] }
 0x724   : > { %2543 = vadd.xlane.f32.xlu1 %v2542_v32  ;;  %2540 = vadd.xlane.f32.xlu2 %v2539_v6 }
 0x725   : > { %2537 = vadd.xlane.f32.xlu0 %v2536_v35 }
 0x72c   : > { %2549 = vadd.xlane.f32.xlu2 %v2548_v1 }
 0x72d   : > { %2546 = vadd.xlane.f32.xlu0 %v2545_v16 }
 0x75d   : > { %v2431_v15 = vpop.f32.mrf.mxu2 }
 0x75e   : > { %v2452_v27 = vadd.f32 %v2451_v13, %v2431_v15 }
 0x760   : > { %v2455_v48 = vadd.f32 %v3241_v18, %v2452_v27 }
 0x762   : > { %v2456_v14 = vsub.f32 0.0, %v2455_v48 }
 0x764   : > { %v2457_v17 = vmul.f32 1.442695, %v2456_v14 }
 0x766   : > { %3635 = vpow2.f32 %v2457_v17 }
 0x76c   : > { %v3636_v42 = vpop.eup %3635 }
 0x76d   : > { %v2459_v40 = vadd.f32 1.0, %v3636_v42 }
 0x76f   : > { %3637 = vrcp.f32 %v2459_v40 }
 0x775   : > { %v3638_v7 = vpop.eup %3637 }
 0x776   : > { %v2461_v56 = vmul.f32 %v3638_v7, %v2455_v48 }
 0x778   : > { %3177 = vmatmul.msk.f32.vlgmr.msrb.gmra.mxu2 %vm337_vm0, %v2461_v56 }
 0x78f   : > { %v5193_v21 = vpop.xlane.xlu2 %2531  ;;  %v5200_v30 = vpop.xlane.xlu1 %2534 }
 0x790   : > { %v5195_v37 = vpop.xlane.xlu0 %2528  ;;  %v2612_v33 = vmul.f32 %v5191_v9, %v5193_v21  ;;  %v2613_v46 = vmul.f32 %v5191_v9, %v5200_v30  ;;  %vm2859_vm14 = vcmp.eq.f32.partialorder %v5193_v21, inf  ;;  %vm2861_vm15 = vcmp.eq.f32.partialorder %v5193_v21, 0.0 }
 0x791   : > { %v2611_v51 = vmul.f32 %v5191_v9, %v5195_v37  ;;  %vm2849_vm13 = vcmp.eq.f32.partialorder %v5195_v37, 0.0  ;;  %vm2871_vm9 = vcmp.eq.f32.partialorder %v5200_v30, inf  ;;  %vm2873_vm10 = vcmp.eq.f32.partialorder %v5200_v30, 0.0 }
 0x797   : > { %v5228_v48 = vpop.xlane.xlu2 %2540  ;;  %v5235_v10 = vpop.xlane.xlu1 %2543 }
 0x798   : > { %v5221_v16 = vpop.xlane.xlu0 %2537  ;;  %v2615_v2 = vmul.f32 %v5191_v9, %v5228_v48  ;;  %v2616_v28 = vmul.f32 %v5191_v9, %v5235_v10 }
 0x799   : > { %v2614_v18 = vmul.f32 %v5191_v9, %v5221_v16  ;;  %vm2883_vm11 = vcmp.eq.f32.partialorder %v5221_v16, inf  ;;  %vm2885_vm12 = vcmp.eq.f32.partialorder %v5221_v16, 0.0 }
 0x7fb   : > { %v2483_v4 = vpop.f32.mrf.mxu2 }
 0x7fc   : > { %v2484_v5 = vadd.f32 %v3242_v31, %v2483_v4 }
 0x7fe   : > { %3179 = vmatmul.msk.f32.vlgmr.msrb.gmra.mxu1 %vm337_vm0, %v2484_v5  ;;  %3180 = vmatmul.msk.f32.vlgmr.msra.gmra.mxu2 %vm337_vm0, %v2484_v5 }
 0x87b   : > { %v5186_v47 = vpop.f32.mrf.mxu1 }
 0x87c   : > { %v2594_v23 = vperm.slane %v5186_v47, 0  ;;  %v2595_v41 = vperm.slane %v5186_v47, 1  ;;  %v2596_v22 = vperm.slane %v5186_v47, 2  ;;  %v2597_v1 = vperm.slane %v5186_v47, 3 }
 0x87d   : > { %v2598_v27 = vperm.slane %v5186_v47, 4  ;;  %v2599_v60 = vperm.slane %v5186_v47, 5 }
 0x881   : > { %v5202_v34 = vpop.f32.mrf.mxu2 }
 0x882   : > { %v2602_v52 = vadd.f32 %v2594_v23, %v5202_v34  ;;  %v2603_v63 = vadd.f32 %v2595_v41, %v5202_v34  ;;  %v2604_v0 = vadd.f32 %v2596_v22, %v5202_v34  ;;  %v2605_v19 = vadd.f32 %v2597_v1, %v5202_v34  ;;  %v5251_v1 = vpop.xlane.xlu2 %2549 }
 0x883   : > { %v2606_v40 = vadd.f32 %v2598_v27, %v5202_v34  ;;  %v2607_v31 = vadd.f32 %v2599_v60, %v5202_v34  ;;  %v2600_v41 = vperm.slane %v5186_v47, 6 }
 0x884   : > { %v2619_v44 = vadd.f32 %v2611_v51, %v2602_v52  ;;  %v2620_v61 = vadd.f32 %v2612_v33, %v2603_v63  ;;  %v2621_v35 = vadd.f32 %v2613_v46, %v2604_v0  ;;  %v2622_v15 = vadd.f32 %v2614_v18, %v2605_v19  ;;  %v5243_v33 = vpop.xlane.xlu0 %2546 }
 0x885   : > { %v2623_v62 = vadd.f32 %v2615_v2, %v2606_v40  ;;  %v2624_v26 = vadd.f32 %v2616_v28, %v2607_v31  ;;  %v2608_v63 = vadd.f32 %v2600_v41, %v5202_v34 }
 0x886   : > { %v2628_v32 = vadd.f32 %v5212_v59, %v2619_v44  ;;  %v2629_v6 = vadd.f32 %v5212_v59, %v2620_v61  ;;  %v2630_v54 = vadd.f32 %v5212_v59, %v2621_v35  ;;  %v2631_v42 = vadd.f32 %v5212_v59, %v2622_v15 }
 0x887   : > { %v2632_v24 = vadd.f32 %v5212_v59, %v2623_v62  ;;  %v2633_v51 = vadd.f32 %v5212_v59, %v2624_v26  ;;  %v2617_v61 = vmul.f32 %v5191_v9, %v5243_v33 }
 0x888   : > { %v2636_v8 = vsub.f32 0.0, %v2628_v32  ;;  %v2637_v11 = vsub.f32 0.0, %v2629_v6  ;;  %v2638_v13 = vsub.f32 0.0, %v2630_v54  ;;  %v2639_v38 = vsub.f32 0.0, %v2631_v42 }
 0x889   : > { %v2640_v3 = vsub.f32 0.0, %v2632_v24  ;;  %v2641_v46 = vsub.f32 0.0, %v2633_v51 }
 0x88a   : > { %v2644_v29 = vmul.f32 1.442695, %v2636_v8  ;;  %v2646_v53 = vmul.f32 1.442695, %v2637_v11  ;;  %v2648_v17 = vmul.f32 1.442695, %v2638_v13  ;;  %v2618_v13 = vmul.f32 %v5191_v9, %v5251_v1 }
 0x88b   : > { %v2650_v43 = vmul.f32 1.442695, %v2639_v38  ;;  %v2652_v52 = vmul.f32 1.442695, %v2640_v3  ;;  %v2601_v8 = vperm.slane %v5186_v47, 7 }
 0x88c   : > { %3639 = vpow2.f32 %v2644_v29  ;;  %v2654_v29 = vmul.f32 1.442695, %v2641_v46 }
 0x88d   : > { %3641 = vpow2.f32 %v2646_v53  ;;  %v2609_v19 = vadd.f32 %v2601_v8, %v5202_v34  ;;  %v5275_v8 = vld [vmem:[%s5411_s3 + $0x17] ss:$0 sm:$0xff] }
 0x88f   : > { %v2626_v27 = vadd.f32 %v2618_v13, %v2609_v19 }
 0x891   : > { %v2635_v40 = vadd.f32 %v5212_v59, %v2626_v27 }
 0x892   : > { %v3640_v14 = vpop.eup %3639 }
 0x893   : > { %v2660_v7 = vadd.f32 1.0, %v3640_v14  ;;  %v3642_v56 = vpop.eup %3641  ;;  %v2643_v34 = vsub.f32 0.0, %v2635_v40 }
 0x894   : > { %v2661_v12 = vadd.f32 1.0, %v3642_v56 }
 0x895   : > { %3643 = vrcp.f32 %v2660_v7  ;;  %v2658_v9 = vmul.f32 1.442695, %v2643_v34 }
 0x896   : > { %3645 = vpow2.f32 %v2648_v17 }
 0x897   : > { %3647 = vrcp.f32 %v2661_v12 }
 0x898   : > { %3649 = vpow2.f32 %v2650_v43 }
 0x89b   : > { %v3644_v4 = vpop.eup %3643 }
 0x89c   : > { %v3646_v5 = vpop.eup %3645  ;;  %v2676_v39 = vmul.f32 %v3644_v4, %v2628_v32  ;;  %v2625_v32 = vadd.f32 %v2617_v61, %v2608_v63 }
 0x89d   : > { %v2662_v23 = vadd.f32 1.0, %v3646_v5  ;;  %v3648_v22 = vpop.eup %3647 }
 0x89e   : > { %3181 = vmatmul.msk.f32.vlgmr.msra.gmra.mxu1 %vm337_vm0, %v2676_v39  ;;  %v3650_v0 = vpop.eup %3649  ;;  %v2677_v44 = vmul.f32 %v3648_v22, %v2629_v6  ;;  %v2634_v53 = vadd.f32 %v5212_v59, %v2625_v32 }
 0x89f   : > { %3651 = vrcp.f32 %v2662_v23  ;;  %v2663_v35 = vadd.f32 1.0, %v3650_v0 }
 0x8a0   : > { %3653 = vpow2.f32 %v2652_v52  ;;  %v2642_v15 = vsub.f32 0.0, %v2634_v53 }
 0x8a1   : > { %3655 = vrcp.f32 %v2663_v35 }
 0x8a2   : > { %3657 = vpow2.f32 %v2654_v29  ;;  %v2656_v17 = vmul.f32 1.442695, %v2642_v15 }
 0x8a5   : > { %v3652_v11 = vpop.eup %3651 }
 0x8a6   : > { %3182 = vmatmul.msk.f32.gmra.mxu1 %vm337_vm0, %v2677_v44  ;;  %v3654_v6 = vpop.eup %3653  ;;  %v2678_v18 = vmul.f32 %v3652_v11, %v2630_v54 }
 0x8a7   : > { %v2664_v47 = vadd.f32 1.0, %v3654_v6  ;;  %v3656_v14 = vpop.eup %3655 }
 0x8a8   : > { %v3658_v7 = vpop.eup %3657  ;;  %v2679_v56 = vmul.f32 %v3656_v14, %v2631_v42 }
 0x8a9   : > { %3659 = vrcp.f32 %v2664_v47  ;;  %v2665_v54 = vadd.f32 1.0, %v3658_v7 }
 0x8aa   : > { %3661 = vpow2.f32 %v2656_v17 }
 0x8ab   : > { %3663 = vrcp.f32 %v2665_v54 }
 0x8ac   : > { %3665 = vpow2.f32 %v2658_v9 }
 0x8ae   : > { %3183 = vmatmul.msk.f32.gmra.mxu1 %vm337_vm0, %v2678_v18 }
 0x8af   : > { %v3660_v2 = vpop.eup %3659 }
 0x8b0   : > { %v3662_v38 = vpop.eup %3661  ;;  %v2680_v62 = vmul.f32 %v3660_v2, %v2632_v24  ;;  %v5267_v24 = vld [vmem:[%s5411_s3 + $0x16] ss:$0 sm:$0xff] }
 0x8b1   : > { %v2666_v12 = vadd.f32 1.0, %v3662_v38  ;;  %v3664_v60 = vpop.eup %3663 }
 0x8b2   : > { %v3666_v59 = vpop.eup %3665  ;;  %v2681_v43 = vmul.f32 %v3664_v60, %v2633_v51 }
 0x8b3   : > { %3667 = vrcp.f32 %v2666_v12  ;;  %v2667_v42 = vadd.f32 1.0, %v3666_v59 }
 0x8b5   : > { %3669 = vrcp.f32 %v2667_v42 }
 0x8b6   : > { %3184 = vmatmul.msk.f32.gmra.mxu1 %vm337_vm0, %v2679_v56 }
 0x8b9   : > { %v3668_v31 = vpop.eup %3667 }
 0x8ba   : > { %v2682_v4 = vmul.f32 %v3668_v31, %v2634_v53 }
 0x8bb   : > { %v3670_v5 = vpop.eup %3669 }
 0x8bc   : > { %v2683_v39 = vmul.f32 %v3670_v5, %v2635_v40 }
 0x8be   : > { %3185 = vmatmul.msk.f32.gmra.mxu1 %vm337_vm0, %v2680_v62 }
 0x8c6   : > { %3186 = vmatmul.msk.f32.gmra.mxu1 %vm337_vm0, %v2681_v43 }
 0x8ce   : > { %3187 = vmatmul.msk.f32.gmra.mxu1 %vm337_vm0, %v2682_v4 }
 0x8d6   : > { %3188 = vmatmul.msk.f32.gmra.mxu1 %vm337_vm0, %v2683_v39 }
 0x91b   : > { %v2726_v28 = vpop.f32.mrf.mxu1 }
 0x91c   : > { %v2727_v3 = vadd.f32 %v5267_v24, %v2726_v28 }
 0x91e   : > { %v2750_v26 = vsub.f32 0.0, %v2727_v3 }
 0x920   : > { %v2758_v23 = vmul.f32 1.442695, %v2750_v26 }
 0x922   : > { %3671 = vpow2.f32 %v2758_v23 }
 0x923   : > { %v2729_v41 = vpop.f32.mrf.mxu1 }
 0x924   : > { %v2730_v22 = vadd.f32 %v5267_v24, %v2729_v41 }
 0x926   : > { %v2751_v52 = vsub.f32 0.0, %v2730_v22 }
 0x928   : > { %v3672_v51 = vpop.eup %3671  ;;  %v2760_v63 = vmul.f32 1.442695, %v2751_v52 }
 0x929   : > { %v2774_v0 = vadd.f32 1.0, %v3672_v51 }
 0x92a   : > { %3673 = vpow2.f32 %v2760_v63 }
 0x92b   : > { %3675 = vrcp.f32 %v2774_v0  ;;  %v2732_v44 = vpop.f32.mrf.mxu1 }
 0x92c   : > { %v2733_v61 = vadd.f32 %v5267_v24, %v2732_v44 }
 0x92e   : > { %v2752_v46 = vsub.f32 0.0, %v2733_v61 }
 0x930   : > { %v3674_v32 = vpop.eup %3673  ;;  %v2762_v35 = vmul.f32 1.442695, %v2752_v46 }
 0x931   : > { %v3676_v11 = vpop.eup %3675  ;;  %v2775_v29 = vadd.f32 1.0, %v3674_v32 }
 0x932   : > { %v2790_v53 = vmul.f32 %v3676_v11, %v2727_v3  ;;  %3677 = vpow2.f32 %v2762_v35 }
 0x933   : > { %3679 = vrcp.f32 %v2775_v29  ;;  %v2735_v19 = vpop.f32.mrf.mxu1 }
 0x934   : > { %v2736_v6 = vadd.f32 %v5267_v24, %v2735_v19  ;;  %v2799_v18 = vmul.f32 %v5275_v8, %v2790_v53 }
 0x936   : > { %v2753_v13 = vsub.f32 0.0, %v2736_v6  ;;  %v2807_v15 = vsel %vm337_vm0, %v2799_v18, 0.0 }
 0x937   : > { %2808 = vadd.xlane.f32.xlu1 %v2807_v15 }
 0x938   : > { %v3678_v27 = vpop.eup %3677  ;;  %v2764_v47 = vmul.f32 1.442695, %v2753_v13 }
 0x939   : > { %v3680_v14 = vpop.eup %3679  ;;  %v2776_v17 = vadd.f32 1.0, %v3678_v27 }
 0x93a   : > { %v2791_v40 = vmul.f32 %v3680_v14, %v2730_v22  ;;  %3681 = vpow2.f32 %v2764_v47 }
 0x93b   : > { %3683 = vrcp.f32 %v2776_v17  ;;  %v2738_v7 = vpop.f32.mrf.mxu1 }
 0x93c   : > { %v2739_v56 = vadd.f32 %v5267_v24, %v2738_v7  ;;  %v2800_v34 = vmul.f32 %v5275_v8, %v2791_v40 }
 0x93e   : > { %v2754_v54 = vsub.f32 0.0, %v2739_v56  ;;  %v2810_v2 = vsel %vm337_vm0, %v2800_v34, 0.0 }
 0x93f   : > { %2811 = vadd.xlane.f32.xlu0 %v2810_v2 }
 0x940   : > { %v3682_v9 = vpop.eup %3681  ;;  %v2766_v38 = vmul.f32 1.442695, %v2754_v54 }
 0x941   : > { %v3684_v62 = vpop.eup %3683  ;;  %v2777_v12 = vadd.f32 1.0, %v3682_v9 }
 0x942   : > { %v2792_v60 = vmul.f32 %v3684_v62, %v2733_v61  ;;  %3685 = vpow2.f32 %v2766_v38 }
 0x943   : > { %3687 = vrcp.f32 %v2777_v12  ;;  %v2741_v59 = vpop.f32.mrf.mxu1 }
 0x944   : > { %v2742_v43 = vadd.f32 %v5267_v24, %v2741_v59  ;;  %v2801_v42 = vmul.f32 %v5275_v8, %v2792_v60 }
 0x946   : > { %v2755_v31 = vsub.f32 0.0, %v2742_v43  ;;  %v2813_v4 = vsel %vm337_vm0, %v2801_v42, 0.0 }
 0x947   : > { %2814 = vadd.xlane.f32.xlu2 %v2813_v4 }
 0x948   : > { %v3686_v5 = vpop.eup %3685  ;;  %v2768_v39 = vmul.f32 1.442695, %v2755_v31 }
 0x949   : > { %v3688_v28 = vpop.eup %3687  ;;  %v2778_v3 = vadd.f32 1.0, %v3686_v5 }
 0x94a   : > { %v2793_v26 = vmul.f32 %v3688_v28, %v2736_v6  ;;  %3689 = vpow2.f32 %v2768_v39 }
 0x94b   : > { %3691 = vrcp.f32 %v2778_v3  ;;  %v2744_v23 = vpop.f32.mrf.mxu1 }
 0x94c   : > { %v2745_v41 = vadd.f32 %v5267_v24, %v2744_v23  ;;  %v2802_v22 = vmul.f32 %v5275_v8, %v2793_v26 }
 0x94e   : > { %v2756_v52 = vsub.f32 0.0, %v2745_v41  ;;  %v2816_v51 = vsel %vm337_vm0, %v2802_v22, 0.0 }
 0x94f   : > { %2817 = vadd.xlane.f32.xlu1 %v2816_v51 }
 0x950   : > { %v3690_v63 = vpop.eup %3689  ;;  %v2770_v0 = vmul.f32 1.442695, %v2756_v52 }
 0x951   : > { %v3692_v44 = vpop.eup %3691  ;;  %v2779_v61 = vadd.f32 1.0, %v3690_v63  ;;  %v2850_v63 = vand.u32 2147483648, %v5195_v37 }
 0x952   : > { %v2794_v46 = vmul.f32 %v3692_v44, %v2739_v56  ;;  %3693 = vpow2.f32 %v2770_v0 }
 0x953   : > { %3695 = vrcp.f32 %v2779_v61  ;;  %v2747_v32 = vpop.f32.mrf.mxu1 }
 0x954   : > { %v2748_v35 = vadd.f32 %v5267_v24, %v2747_v32  ;;  %v2803_v11 = vmul.f32 %v5275_v8, %v2794_v46 }
 0x956   : > { %v2757_v29 = vsub.f32 0.0, %v2748_v35  ;;  %v2819_v53 = vsel %vm337_vm0, %v2803_v11, 0.0 }
 0x957   : > { %2820 = vadd.xlane.f32.xlu0 %v2819_v53 }
 0x958   : > { %v3694_v19 = vpop.eup %3693  ;;  %v2772_v6 = vmul.f32 1.442695, %v2757_v29 }
 0x959   : > { %v3696_v18 = vpop.eup %3695  ;;  %v2780_v13 = vadd.f32 1.0, %v3694_v19 }
 0x95a   : > { %v2795_v15 = vmul.f32 %v3696_v18, %v2742_v43  ;;  %3697 = vpow2.f32 %v2772_v6 }
 0x95b   : > { %3699 = vrcp.f32 %v2780_v13 }
 0x95c   : > { %v2804_v27 = vmul.f32 %v5275_v8, %v2795_v15  ;;  %v5319_v15 = vstv %s3178_s11 }
 0x95e   : > { %v2822_v47 = vsel %vm337_vm0, %v2804_v27, 0.0 }
 0x95f   : > { %2823 = vadd.xlane.f32.xlu2 %v2822_v47 }
 0x960   : > { %v3698_v14 = vpop.eup %3697 }
 0x961   : > { %v3700_v24 = vpop.eup %3699  ;;  %v2781_v17 = vadd.f32 1.0, %v3698_v14 }
 0x962   : > { %v2796_v40 = vmul.f32 %v3700_v24, %v2745_v41 }
 0x963   : > { %3701 = vrcp.f32 %v2781_v17 }
 0x964   : > { %v2805_v7 = vmul.f32 %v5275_v8, %v2796_v40  ;;  %3703 = vrsqrt.f32 %v5195_v37 }
 0x965   : > { %3705 = vrsqrt.f32 %v5193_v21 }
 0x966   : > { %v2825_v56 = vsel %vm337_vm0, %v2805_v7, 0.0  ;;  %3707 = vrsqrt.f32 %v5200_v30 }
 0x967   : > { %2826 = vadd.xlane.f32.xlu1 %v2825_v56  ;;  %3709 = vrsqrt.f32 %v5221_v16 }
 0x968   : > { %3711 = vrsqrt.f32 %v5228_v48 }
 0x969   : > { %v3702_v34 = vpop.eup %3701  ;;  %3713 = vrsqrt.f32 %v5235_v10 }
 0x96a   : > { %v2797_v54 = vmul.f32 %v3702_v34, %v2748_v35  ;;  %v3704_v38 = vpop.eup %3703 }
 0x96b   : > { %v2841_v62 = vmul.f32 %v3704_v38, %v5195_v37  ;;  %v3706_v60 = vpop.eup %3705 }
 0x96c   : > { %v2806_v2 = vmul.f32 %v5275_v8, %v2797_v54  ;;  %v2853_v59 = vmul.f32 %v3706_v60, %v5193_v21  ;;  %v3708_v8 = vpop.eup %3707 }
 0x96d   : > { %v2842_v12 = vmul.f32 %v3704_v38, %v2841_v62  ;;  %v2865_v4 = vmul.f32 %v3708_v8, %v5200_v30  ;;  %v3710_v23 = vpop.eup %3709 }
 0x96e   : > { %v2828_v9 = vsel %vm337_vm0, %v2806_v2, 0.0  ;;  %v2854_v42 = vmul.f32 %v3706_v60, %v2853_v59  ;;  %vm2847_vm0 = vcmp.eq.f32.partialorder %v5195_v37, inf  ;;  %v2877_v41 = vmul.f32 %v3710_v23, %v5221_v16  ;;  %v3712_v32 = vpop.eup %3711 }
 0x96f   : > { %2829 = vadd.xlane.f32.xlu0 %v2828_v9  ;;  %v2843_v43 = vmul.f32 0.5, %v2842_v12  ;;  %v2866_v28 = vmul.f32 %v3708_v8, %v2865_v4  ;;  %v2889_v11 = vmul.f32 %v3712_v32, %v5228_v48  ;;  %v3714_v18 = vpop.eup %3713  ;;  %v2874_v2 = vand.u32 2147483648, %v5200_v30 }
 0x970   : > { %v2855_v39 = vmul.f32 0.5, %v2854_v42  ;;  %v2878_v44 = vmul.f32 %v3710_v23, %v2877_v41  ;;  %v2901_v17 = vmul.f32 %v3714_v18, %v5235_v10 }
 0x971   : > { %v2844_v31 = vsub.f32 1.5, %v2843_v43  ;;  %v2867_v51 = vmul.f32 0.5, %v2866_v28  ;;  %v2890_v13 = vmul.f32 %v3712_v32, %v2889_v11 }
 0x972   : > { %v2856_v26 = vsub.f32 1.5, %v2855_v39  ;;  %v2879_v19 = vmul.f32 0.5, %v2878_v44  ;;  %v2902_v9 = vmul.f32 %v3714_v18, %v2901_v17 }
 0x973   : > { %v2845_v5 = vmul.f32 %v3704_v38, %v2844_v31  ;;  %v2868_v46 = vsub.f32 1.5, %v2867_v51  ;;  %v2891_v34 = vmul.f32 0.5, %v2890_v13 }
 0x974   : > { %v2857_v52 = vmul.f32 %v3706_v60, %v2856_v26  ;;  %v2880_v47 = vsub.f32 1.5, %v2879_v19 }
 0x975   : > { %v2846_v3 = vmul.f32 %v2845_v5, %v5195_v37  ;;  %v2869_v53 = vmul.f32 %v3708_v8, %v2868_v46  ;;  %v2892_v60 = vsub.f32 1.5, %v2891_v34 }
 0x976   : > { %v2858_v61 = vmul.f32 %v2857_v52, %v5193_v21  ;;  %v2881_v56 = vmul.f32 %v3710_v23, %v2880_v47  ;;  %v2886_v23 = vand.u32 2147483648, %v5221_v16 }
 0x977   : > { %v2848_v22 = vsel %vm2847_vm0, %v5195_v37, %v2846_v3  ;;  %v2862_v37 = vand.u32 2147483648, %v5193_v21  ;;  %v2870_v27 = vmul.f32 %v2869_v53, %v5200_v30  ;;  %v2893_v3 = vmul.f32 %v3712_v32, %v2892_v60 }
 0x978   : > { %v2851_v0 = vsel %vm2849_vm13, %v2850_v63, %v2848_v22  ;;  %v2860_v29 = vsel %vm2859_vm14, %v5193_v21, %v2858_v61  ;;  %v2882_v12 = vmul.f32 %v2881_v56, %v5221_v16  ;;  %vm2895_vm0 = vcmp.eq.f32.partialorder %v5228_v48, inf }
 0x979   : > { %v2936_v35 = vadd.f32 1.0, %v2851_v0  ;;  %v2863_v6 = vsel %vm2861_vm15, %v2862_v37, %v2860_v29  ;;  %v2872_v21 = vsel %vm2871_vm9, %v5200_v30, %v2870_v27  ;;  %v2903_v30 = vmul.f32 0.5, %v2902_v9 }
 0x97a   : > { %v2937_v24 = vadd.f32 1.0, %v2863_v6  ;;  %v2875_v62 = vsel %vm2873_vm10, %v2874_v2, %v2872_v21  ;;  %v2884_v28 = vsel %vm2883_vm11, %v5221_v16, %v2882_v12  ;;  %v2894_v44 = vmul.f32 %v2893_v3, %v5228_v48 }
 0x97b   : > { %3715 = vrcp.f32 %v2936_v35  ;;  %v2938_v8 = vadd.f32 1.0, %v2875_v62  ;;  %v2887_v22 = vsel %vm2885_vm12, %v2886_v23, %v2884_v28  ;;  %v2904_v52 = vsub.f32 1.5, %v2903_v30 }
 0x97c   : > { %3717 = vrsqrt.f32 %v5243_v33  ;;  %v2939_v35 = vadd.f32 1.0, %v2887_v22  ;;  %v2896_v37 = vsel %vm2895_vm0, %v5228_v48, %v2894_v44  ;;  %v2898_v27 = vand.u32 2147483648, %v5228_v48 }
 0x97d   : > { %3719 = vrcp.f32 %v2937_v24  ;;  %vm2897_vm13 = vcmp.eq.f32.partialorder %v5228_v48, 0.0  ;;  %vm2907_vm14 = vcmp.eq.f32.partialorder %v5235_v10, inf  ;;  %vm2909_vm15 = vcmp.eq.f32.partialorder %v5235_v10, 0.0 }
 0x97e   : > { %3721 = vrsqrt.f32 %v5251_v1  ;;  %v2899_v17 = vsel %vm2897_vm13, %v2898_v27, %v2896_v37  ;;  %vm2921_vm9 = vcmp.eq.f32.partialorder %v5243_v33, 0.0  ;;  %vm2933_vm10 = vcmp.eq.f32.partialorder %v5251_v1, 0.0 }
 0x97f   : > { %3723 = vrcp.f32 %v2938_v8  ;;  %v2940_v9 = vadd.f32 1.0, %v2899_v17  ;;  %v2910_v8 = vand.u32 2147483648, %v5235_v10 }
 0x980   : > { %3725 = vrcp.f32 %v2939_v35 }
 0x981   : > { %v3716_v7 = vpop.eup %3715  ;;  %3727 = vrcp.f32 %v2940_v9 }
 0x982   : > { %v5331_v59 = vpop.eup %3717 }
 0x983   : > { %v3720_v5 = vpop.eup %3719 }
 0x984   : > { %v5343_v51 = vpop.eup %3721 }
 0x985   : > { %v2925_v11 = vmul.f32 %v5343_v51, %v5251_v1  ;;  %v3724_v29 = vpop.eup %3723 }
 0x9aa   : > { %v2809_v14 = vpop.xlane.xlu1 %2808 }
 0x9ab   : > { %v2832_v40 = vadd.f32 %v5319_v15, %v2809_v14  ;;  %v2926_v14 = vmul.f32 %v5343_v51, %v2925_v11 }
 0x9ad   : > { %v2952_v54 = vmul.f32 %v3716_v7, %v2832_v40  ;;  %v2927_v62 = vmul.f32 0.5, %v2926_v14 }
 0x9af   : > { %v2960_v38 = vmul.f32 %v2952_v54, %v5084_v55  ;;  %v2913_v55 = vmul.f32 %v5331_v59, %v5243_v33  ;;  %v2928_v3 = vsub.f32 1.5, %v2927_v62 }
 0x9b1   : > { %v2968_v43 = vsel %vm312_vm1, %v2960_v38, 0.0  ;;  %v2914_v63 = vmul.f32 %v5331_v59, %v2913_v55  ;;  %v2929_v44 = vmul.f32 %v5343_v51, %v2928_v3 }
 0x9b2   : > { %v2969_v42 = vrot.slane %v2968_v43, 4  ;;  %v2812_v31 = vpop.xlane.xlu0 %2811 }
 0x9b3   : > { %v2833_v4 = vadd.f32 %v5319_v15, %v2812_v31  ;;  %v2915_v6 = vmul.f32 0.5, %v2914_v63 }
 0x9b4   : > { %v2970_v39 = vadd.f32 %v2969_v42, %v2968_v43 }
 0x9b5   : > { %v2953_v26 = vmul.f32 %v3720_v5, %v2833_v4  ;;  %v2916_v21 = vsub.f32 1.5, %v2915_v6 }
 0x9b6   : > { %v2971_v0 = vrot.slane %v2970_v39, 2 }
 0x9b7   : > { %v2961_v41 = vmul.f32 %v2953_v26, %v5081_v58  ;;  %v2905_v58 = vmul.f32 %v3714_v18, %v2904_v52  ;;  %v2917_v42 = vmul.f32 %v5331_v59, %v2916_v21 }
 0x9b8   : > { %v2972_v53 = vadd.f32 %v2971_v0, %v2970_v39 }
 0x9b9   : > { %v2975_v61 = vsel %vm312_vm1, %v2961_v41, 0.0  ;;  %v2906_v18 = vmul.f32 %v2905_v58, %v5235_v10  ;;  %v2918_v28 = vmul.f32 %v2917_v42, %v5243_v33 }
 0x9ba   : > { %v2976_v46 = vrot.slane %v2975_v61, 4  ;;  %v2815_v32 = vpop.xlane.xlu2 %2814  ;;  %v2973_v40 = vrot.slane %v2972_v53, 1 }
 0x9bb   : > { %v2834_v16 = vadd.f32 %v5319_v15, %v2815_v32  ;;  %v2908_v38 = vsel %vm2907_vm14, %v5235_v10, %v2906_v18 }
 0x9bc   : > { %v2977_v19 = vadd.f32 %v2976_v46, %v2975_v61  ;;  %v2974_v12 = vadd.f32 %v2973_v40, %v2972_v53  ;;  %v2911_v55 = vsel %vm2909_vm15, %v2910_v8, %v2908_v38  ;;  %v2922_v46 = vand.u32 2147483648, %v5243_v33 }
 0x9bd   : > { %v2954_v13 = vmul.f32 %v3724_v29, %v2834_v16  ;;  %v2941_v22 = vadd.f32 1.0, %v2911_v55  ;;  %v2930_v29 = vmul.f32 %v2929_v44, %v5251_v1 }
 0x9be   : > { %v2978_v47 = vrot.slane %v2977_v19, 2 }
 0x9bf   : > { %v2962_v24 = vmul.f32 %v2954_v13, %v5078_v25  ;;  %v3726_v25 = vpop.eup %3725  ;;  %3729 = vrcp.f32 %v2941_v22 }
 0x9c0   : > { %v2979_v7 = vadd.f32 %v2978_v47, %v2977_v19  ;;  %v3728_v63 = vpop.eup %3727 }
 0x9c1   : > { %v2982_v56 = vsel %vm312_vm1, %v2962_v24, 0.0  ;;  %v2934_v24 = vand.u32 2147483648, %v5251_v1 }
 0x9c2   : > { %v2980_v34 = vrot.slane %v2979_v7, 1  ;;  %v2983_v54 = vrot.slane %v2982_v56, 4  ;;  %v2818_v2 = vpop.xlane.xlu1 %2817 }
 0x9c3   : > { %v2835_v48 = vadd.f32 %v5319_v15, %v2818_v2 }
 0x9c4   : > { %v2981_v60 = vadd.f32 %v2980_v34, %v2979_v7  ;;  %v2984_v43 = vadd.f32 %v2983_v54, %v2982_v56 }
 0x9c5   : > { %v2955_v31 = vmul.f32 %v3726_v25, %v2835_v48  ;;  %v3730_v27 = vpop.eup %3729 }
 0x9c6   : > { %v3032_v4 = vsel %vm819_vm2, %v2981_v60, %v2974_v12  ;;  %v2985_v30 = vrot.slane %v2984_v43, 2  ;;  %vm2919_vm2 = vcmp.eq.f32.partialorder %v5243_v33, inf }
 0x9c7   : > { %v2963_v5 = vmul.f32 %v2955_v31, %v5104_v49  ;;  %v2920_v49 = vsel %vm2919_vm2, %v5243_v33, %v2918_v28 }
 0x9c8   : > { %v2986_v39 = vadd.f32 %v2985_v30, %v2984_v43  ;;  %v2923_v16 = vsel %vm2921_vm9, %v2922_v46, %v2920_v49  ;;  %v3774_v46 = vmov 0.0  }
 0x9c9   : > { %v2989_v26 = vsel %vm312_vm1, %v2963_v5, 0.0  ;;  %v2942_v6 = vadd.f32 1.0, %v2923_v16 }
 0x9ca   : > { %v2987_v23 = vrot.slane %v2986_v39, 1  ;;  %v2990_v59 = vrot.slane %v2989_v26, 4  ;;  %v2821_v41 = vpop.xlane.xlu0 %2820 }
 0x9cb   : > { %v2836_v52 = vadd.f32 %v5319_v15, %v2821_v41  ;;  %3731 = vrcp.f32 %v2942_v6 }
 0x9cc   : > { %v2988_v0 = vadd.f32 %v2987_v23, %v2986_v39  ;;  %v2991_v10 = vadd.f32 %v2990_v59, %v2989_v26 }
 0x9cd   : > { %v2956_v61 = vmul.f32 %v3728_v63, %v2836_v52 }
 0x9ce   : > { %v3033_v32 = vsel %vm821_vm3, %v2988_v0, %v3032_v4  ;;  %v2992_v35 = vrot.slane %v2991_v10, 2  ;;  %vm2931_vm3 = vcmp.eq.f32.partialorder %v5251_v1, inf }
 0x9cf   : > { %v2964_v11 = vmul.f32 %v2956_v61, %v5101_v36  ;;  %v2932_v33 = vsel %vm2931_vm3, %v5251_v1, %v2930_v29 }
 0x9d0   : > { %v2993_v58 = vadd.f32 %v2992_v35, %v2991_v10  ;;  %v2935_v7 = vsel %vm2933_vm10, %v2934_v24, %v2932_v33 }
 0x9d1   : > { %v2996_v53 = vsel %vm312_vm1, %v2964_v11, 0.0  ;;  %v2943_v2 = vadd.f32 1.0, %v2935_v7  ;;  %v3732_v48 = vpop.eup %3731 }
 0x9d2   : > { %v2994_v19 = vrot.slane %v2993_v58, 1  ;;  %v2997_v37 = vrot.slane %v2996_v53, 4  ;;  %v2824_v51 = vpop.xlane.xlu2 %2823 }
 0x9d3   : > { %v2837_v13 = vadd.f32 %v5319_v15, %v2824_v51  ;;  %3733 = vrcp.f32 %v2943_v2 }
 0x9d4   : > { %v2995_v47 = vadd.f32 %v2994_v19, %v2993_v58  ;;  %v2998_v14 = vadd.f32 %v2997_v37, %v2996_v53 }
 0x9d5   : > { %v2957_v36 = vmul.f32 %v3730_v27, %v2837_v13 }
 0x9d6   : > { %v2999_v17 = vrot.slane %v2998_v14, 2  ;;  %v3034_v18 = vsel %vm823_vm4, %v2995_v47, %v3033_v32 }
 0x9d7   : > { %v2965_v40 = vmul.f32 %v2957_v36, %v5095_v50 }
 0x9d8   : > { %v3000_v21 = vadd.f32 %v2999_v17, %v2998_v14 }
 0x9d9   : > { %v3003_v56 = vsel %vm312_vm1, %v2965_v40, 0.0  ;;  %v3734_v8 = vpop.eup %3733 }
 0x9da   : > { %v3001_v34 = vrot.slane %v3000_v21, 1  ;;  %v2827_v54 = vpop.xlane.xlu1 %2826  ;;  %v3004_v62 = vrot.slane %v3003_v56, 4 }
 0x9db   : > { %v2838_v9 = vadd.f32 %v5319_v15, %v2827_v54 }
 0x9dc   : > { %v3002_v38 = vadd.f32 %v3001_v34, %v3000_v21  ;;  %v3005_v60 = vadd.f32 %v3004_v62, %v3003_v56 }
 0x9dd   : > { %v2958_v25 = vmul.f32 %v3732_v48, %v2838_v9 }
 0x9de   : > { %v3035_v1 = vsel %vm825_vm5, %v3002_v38, %v3034_v18  ;;  %v3006_v4 = vrot.slane %v3005_v60, 2 }
 0x9df   : > { %v2966_v12 = vmul.f32 %v2958_v25, %v5121_v45 }
 0x9e0   : > { %v3007_v28 = vadd.f32 %v3006_v4, %v3005_v60 }
 0x9e1   : > { %v3010_v50 = vsel %vm312_vm1, %v2966_v12, 0.0 }
 0x9e2   : > { %v3011_v43 = vrot.slane %v3010_v50, 4  ;;  %v2830_v42 = vpop.xlane.xlu0 %2829  ;;  %v3008_v45 = vrot.slane %v3007_v28, 1 }
 0x9e3   : > { %v2839_v31 = vadd.f32 %v5319_v15, %v2830_v42 }
 0x9e4   : > { %v3012_v30 = vadd.f32 %v3011_v43, %v3010_v50  ;;  %v3009_v52 = vadd.f32 %v3008_v45, %v3007_v28 }
 0x9e5   : > { %v2959_v5 = vmul.f32 %v3734_v8, %v2839_v31 }
 0x9e6   : > { %v3013_v55 = vrot.slane %v3012_v30, 2  ;;  %v3036_v49 = vsel %vm827_vm6, %v3009_v52, %v3035_v1 }
 0x9e7   : > { %v2967_v39 = vmul.f32 %v2959_v5, %v5117_v57 }
 0x9e8   : > { %v3014_v3 = vadd.f32 %v3013_v55, %v3012_v30 }
 0x9e9   : > { %v3017_v26 = vsel %vm312_vm1, %v2967_v39, 0.0 }
 0x9ea   : > { %v3018_v23 = vrot.slane %v3017_v26, 4  ;;  %v3015_v41 = vrot.slane %v3014_v3, 1 }
 0x9ec   : > { %v3019_v59 = vadd.f32 %v3018_v23, %v3017_v26  ;;  %v3016_v0 = vadd.f32 %v3015_v41, %v3014_v3 }
 0x9ee   : > { %v3020_v22 = vrot.slane %v3019_v59, 2  ;;  %v3037_v44 = vsel %vm829_vm7, %v3016_v0, %v3036_v49 }
 0x9f0   : > { %v3021_v63 = vadd.f32 %v3020_v22, %v3019_v59 }
 0x9f2   : > { %v3022_v15 = vrot.slane %v3021_v63, 1 }
 0x9f4   : > { %v3023_v10 = vadd.f32 %v3022_v15, %v3021_v63 }
 0x9f6   : > { %v3038_v57 = vsel %vm831_vm8, %v3023_v10, %v3037_v44 }
 0x9f7   : > { %v3040_v61 = vadd.f32 %v3038_v57, %v5071_v20 }
 0x9f9   : > { %vm3041_vm4 = vcmp.ne.f32.partialorder %v3040_v61, %v3040_v61 }
 0x9fa   : > { %v3042_v32 = vsel %vm3041_vm4, 1.0, %v3774_v46 }
 0x9fb   : > { %v3043_v35 = vsel %vm312_vm1, %v3042_v32, -inf }
 0x9fc   : > { %3044 = vmax.xlane.f32.xlu2 %v3043_v35 }
 0xa6f   : > { %v3045_v11 = vpop.xlane.xlu2 %3044 }
 0xa70   : > { %v3046_v16 = vrot.slane %v3045_v11, 4 }
 0xa72   : > { %v3047_v58 = vmax.f32 %v3045_v11, %v3046_v16 }
 0xa74   : > { %v3048_v29 = vrot.slane %v3047_v58, 2 }
 0xa76   : > { %v3049_v53 = vmax.f32 %v3047_v58, %v3048_v29 }
 0xa78   : > { %v3050_v19 = vrot.slane %v3049_v53, 1 }
 0xa7a   : > { %v3051_v37 = vmax.f32 %v3049_v53, %v3050_v19 }
 0xa7c   : > { %vm3052_vm5 = vcmp.gt.f32.partialorder %v3051_v37, 0.0 }
 0xa7d   : > { %v3055_v20 = vsel %vm3052_vm5, 0.0, %v3040_v61 }
 0xa7e   : > { %3056 = vst.msk [vmem:[%s260_s14] sm:$0xff] %vm312_vm1, %v3055_v20 }
 0xa7f PF: > { %s17_s21 = sadd.s32 1, %s3770_s21  }
 0xa80   : > { %p14_p7 = scmp.ge.s32.totalorder %s17_s21, 6  }
 0xa82   :  { %16 = sbr.rel (!%p14_p7) target bundleno = 1 (0x1), region = 79 }
 0xa87   :  { %3076 = vsyncpa [#allocation3], 1 }
 0xa88   :  { %3078 = vsyncpa [#allocation3 + $0x1], 1 }

</bundles_post_ra>
